<compile_context>
chip_gen: v5e
topology: v5e:2x2
jax: 0.10.0
libtpu: 0.0.40
codegen_flags: <defaults>
</compile_context>

<pallas_src>
import jax
import jax.numpy as jnp
from jax.experimental import pallas as pl
from jax.experimental.pallas import tpu as pltpu


# ----------------------------- Pallas kernels ------------------------------

def _conv_bn_relu_pool_kernel(p_ref, w_ref, b_ref, o_ref):
    # p_ref: (Kp, 4*TM) bf16  im2col patches; the four 2x2 pool-window positions are
    #                         concatenated along the lane axis (each TM is a multiple of 128)
    # w_ref: (Cout, Kp) bf16  conv weight with the BatchNorm scale folded in
    # b_ref: (Cout, 1)  f32   folded BatchNorm shift (conv bias included)
    # o_ref: (Cout, TM) bf16  pooled activations, spatial on lanes (dense 128-lane stores)
    tm = o_ref.shape[-1]
    # One wide matmul (amortizes MXU weight load / pipeline fill over 4x longer N).
    z = jnp.dot(w_ref[...], p_ref[...], preferred_element_type=jnp.float32)  # (Cout, 4*TM)
    # 2x2 max-pool = elementwise max of the four lane-aligned TM-wide slices.
    zmax = jnp.maximum(jnp.maximum(z[:, 0 * tm:1 * tm], z[:, 1 * tm:2 * tm]),
                       jnp.maximum(z[:, 2 * tm:3 * tm], z[:, 3 * tm:4 * tm]))
    # Per-channel additive shift commutes with the max; ReLU is monotone.
    o_ref[...] = jnp.maximum(zmax + b_ref[...], 0.0).astype(o_ref.dtype)


def _head_kernel(x_ref, w1_ref, b1_ref, w2_ref, b2_ref, o_ref):
    # fc1 + ReLU + fc2 + ReLU + log_softmax, fused (all operands are tiny).
    h = jnp.dot(x_ref[...], w1_ref[...], preferred_element_type=jnp.float32) + b1_ref[...]
    h = jnp.maximum(h, 0.0).astype(jnp.bfloat16)
    z = jnp.dot(h, w2_ref[...], preferred_element_type=jnp.float32) + b2_ref[...]
    z = jnp.maximum(z, 0.0)
    m = jnp.max(z, axis=1, keepdims=True)
    lse = jnp.log(jnp.sum(jnp.exp(z - m), axis=1, keepdims=True)) + m
    o_ref[...] = z - lse


# ------------------------------ JAX wrappers --------------------------------

def extract_pooled_patches_wide(x, k_pad, tile_m):
    """im2col for conv(k=3, s=2), pool-window positions concatenated along lanes.

    x: (N, C, H, W) -> patches (N, k_pad, 4*tile_m) bf16, plus pooled dims (Hp, Wp).
    Lane index q*tile_m + (hp*Wp + wp) holds the patch feeding the conv output at
    spatial position (2*hp + q//2, 2*wp + q%2).  K ordering is (kh, kw, cin).
    Only positions that survive the floor-mode 2x2 pool are materialized; K and M
    are padded with zeros directly to the kernel's block layout.
    """
    N, C, H, W = x.shape
    Ho, Wo = (H - 3) // 2 + 1, (W - 3) // 2 + 1
    Hp, Wp = Ho // 2, Wo // 2
    Mp = Hp * Wp
    K = 9 * C
    x = x.astype(jnp.bfloat16)           # halve XLA-side slice traffic too
    slabs = []
    for qr in range(2):
        for qc in range(2):
            taps = []
            for dh in range(3):
                for dw in range(3):
                    taps.append(
                        x[:, :, 2 * qr + dh::4, 2 * qc + dw::4][:, :, :Hp, :Wp])
            p = jnp.stack(taps, axis=1).reshape(N, K, Mp)          # (N, 9*C, Mp)
            p = jnp.pad(p, ((0, 0), (0, k_pad - K), (0, tile_m - Mp)))
            slabs.append(p)
    return jnp.concatenate(slabs, axis=-1), Hp, Wp                 # (N, Kp, 4*tile_m)


def conv_bn_relu_pool(x, w_t, shift):
    """One fused conv+BN+ReLU+maxpool block.  x: (N, Cin, H, W) -> (N, Cout, Hp, Wp) bf16."""
    N = x.shape[0]
    Cout, Kp = w_t.shape
    H, W = x.shape[2], x.shape[3]
    Ho, Wo = (H - 3) // 2 + 1, (W - 3) // 2 + 1
    Hp, Wp = Ho // 2, Wo // 2
    Mp = Hp * Wp
    tile_m = 128 * ((Mp + 127) // 128)   # one lane-dense M tile per image (<= 2816 here)
    patches, Hp, Wp = extract_pooled_patches_wide(x, Kp, tile_m)   # (N, Kp, 4*tile_m) bf16

    out = pl.pallas_call(
        _conv_bn_relu_pool_kernel,
        out_shape=jax.ShapeDtypeStruct((N, Cout, tile_m), jnp.bfloat16),
        grid=(N,),
        in_specs=[
            pl.BlockSpec((None, Kp, 4 * tile_m), lambda n: (n, 0, 0)),
            pl.BlockSpec((Cout, Kp), lambda n: (0, 0)),
            pl.BlockSpec((Cout, 1), lambda n: (0, 0)),
        ],
        out_specs=pl.BlockSpec((None, Cout, tile_m), lambda n: (n, 0, 0)),
        compiler_params=pltpu.CompilerParams(dimension_semantics=("parallel",)),
    )(patches, w_t, shift)
    return out[:, :, :Mp].reshape(N, Cout, Hp, Wp)


def head(xf, w1t, b1, w2t, b2):
    N, D = xf.shape
    H1 = w1t.shape[1]
    H2 = w2t.shape[1]
    return pl.pallas_call(
        _head_kernel,
        out_shape=jax.ShapeDtypeStruct((N, H2), jnp.float32),
        grid=(1,),
        in_specs=[
            pl.BlockSpec((N, D), lambda i: (0, 0)),
            pl.BlockSpec((D, H1), lambda i: (0, 0)),
            pl.BlockSpec((1, H1), lambda i: (0, 0)),
            pl.BlockSpec((H1, H2), lambda i: (0, 0)),
            pl.BlockSpec((1, H2), lambda i: (0, 0)),
        ],
        out_specs=pl.BlockSpec((N, H2), lambda i: (0, 0)),
    )(xf, w1t, b1, w2t, b2)


# -------------------------- parameter construction --------------------------

def init_params(key):
    ks = jax.random.split(key, 10)

    def conv(kw, kb, cin, cout):
        w = jax.random.normal(kw, (cout, cin, 3, 3), jnp.float32) / jnp.sqrt(9.0 * cin)
        b = jax.random.normal(kb, (cout,), jnp.float32) * 0.01
        return w, b

    def lin(kw, kb, din, dout):
        w = jax.random.normal(kw, (dout, din), jnp.float32) / jnp.sqrt(float(din))
        b = jax.random.normal(kb, (dout,), jnp.float32) * 0.01
        return w, b

    return {
        "conv1": conv(ks[0], ks[1], 3, 16),
        "conv2": conv(ks[2], ks[3], 16, 32),
        "conv3": conv(ks[4], ks[5], 32, 64),
        "fc1": lin(ks[6], ks[7], 576, 64),
        "fc2": lin(ks[8], ks[9], 64, 10),
    }


def fold_conv_bn(w, b, eps=1e-5):
    """Fold eval-mode BatchNorm (default stats) into the conv weight (scale) and a
    per-channel shift (conv bias included).  Weight is reshaped to (Cout, Kp) with
    K ordering (kh, kw, cin), K padded to a multiple of 16, and cast to bf16."""
    cout, cin = w.shape[0], w.shape[1]
    gamma = jnp.ones((cout,), jnp.float32)
    beta = jnp.zeros((cout,), jnp.float32)
    mean = jnp.zeros((cout,), jnp.float32)
    var = jnp.ones((cout,), jnp.float32)
    scale = gamma * jax.lax.rsqrt(var + eps)
    shift = beta + (b - mean) * scale
    K = 9 * cin
    Kp = 16 * ((K + 15) // 16)                                    # bf16 sublane-align K
    w_t = jnp.transpose(w, (0, 2, 3, 1)).reshape(cout, K) * scale[:, None]
    w_t = jnp.pad(w_t, ((0, 0), (0, Kp - K))).astype(jnp.bfloat16)
    return w_t, shift.reshape(cout, 1)


# ------------------------------- forward pass -------------------------------

def cnn_forward(x_nchw, params):
    x = x_nchw.astype(jnp.float32)
    for name in ("conv1", "conv2", "conv3"):
        w, b = params[name]
        w_t, shift = fold_conv_bn(w, b)
        x = conv_bn_relu_pool(x, w_t, shift)                      # (N, Cout, Hp, Wp) bf16
    N = x.shape[0]
    xf = x.reshape(N, -1)                 # channel-first flatten = torch .view on NCHW
    w1, b1 = params["fc1"]
    w2, b2 = params["fc2"]
    return head(xf.astype(jnp.bfloat16),
                jnp.transpose(w1).astype(jnp.bfloat16), b1.reshape(1, -1),
                jnp.transpose(w2).astype(jnp.bfloat16), b2.reshape(1, -1))


def reference_forward(x_nchw, params):
    """Pure-JAX reference (lax.conv based), mirroring the bf16 operand rounding."""
    x = x_nchw.astype(jnp.float32)
    eps = 1e-5
    scale = 1.0 / jnp.sqrt(1.0 + eps)     # eval-mode BN defaults: gamma=1, mean=0, var=1
    for name in ("conv1", "conv2", "conv3"):
        w, b = params[name]
        w_s = (w * scale).astype(jnp.bfloat16)
        shift = b * scale
        y = jax.lax.conv_general_dilated(
            x.astype(jnp.bfloat16), w_s, window_strides=(2, 2), padding="VALID",
            dimension_numbers=("NCHW", "OIHW", "NCHW"),
            preferred_element_type=jnp.float32)
        y = jnp.maximum(y + shift[None, :, None, None], 0.0)
        N, C, Hh, Ww = y.shape
        Hp, Wp = Hh // 2, Ww // 2
        x = y[:, :, :2 * Hp, :2 * Wp].reshape(N, C, Hp, 2, Wp, 2).max(axis=(3, 5))
    N = x.shape[0]
    xf = x.reshape(N, -1)
    w1, b1 = params["fc1"]
    w2, b2 = params["fc2"]
    h = jnp.maximum(jnp.dot(xf.astype(jnp.bfloat16), w1.T.astype(jnp.bfloat16),
                            preferred_element_type=jnp.float32) + b1, 0.0)
    z = jnp.maximum(jnp.dot(h.astype(jnp.bfloat16), w2.T.astype(jnp.bfloat16),
                            preferred_element_type=jnp.float32) + b2, 0.0)
    return jax.nn.log_softmax(z, axis=1)


if __name__ == "__main__":
    key = jax.random.PRNGKey(0)
    k_x, k_p = jax.random.split(key)
    # 213x213 is the smallest input that yields the 3*3*64 = 576 features fc1 expects.
    x = jax.random.normal(k_x, (2, 3, 213, 213), jnp.float32)
    params = init_params(k_p)

    out = jax.block_until_ready(jax.jit(cnn_forward)(x, params))
    assert out.shape == (2, 10), out.shape

    ref = jax.block_until_ready(reference_forward(x, params))
    # Both paths use identical bf16 operand rounding; remaining diffs are f32
    # accumulation-order / rare bf16 tie-rounding effects, well below 1e-2.
    assert jnp.allclose(out, ref, atol=1e-2, rtol=1e-2), (
        "mismatch", float(jnp.max(jnp.abs(out - ref))))
    # log_softmax rows must sum to 1 in probability space.
    assert jnp.allclose(jnp.sum(jnp.exp(out), axis=1), 1.0, atol=1e-4)

    print("KERNEL_OK")
</pallas_src>

<mosaic_0001>
module attributes {stable_mosaic.version = 11 : i64} {
  func.func @_conv_bn_relu_pool_kernel(%arg0: i32, %arg1: memref<1x32x11264xbf16, #tpu.memory_space<vmem>>, %arg2: memref<16x32xbf16, #tpu.memory_space<vmem>>, %arg3: memref<16x1xf32, #tpu.memory_space<vmem>>, %arg4: memref<1x16x2816xbf16, #tpu.memory_space<vmem>>) attributes {dimension_semantics = [#tpu.dimension_semantics<parallel>], iteration_bounds = array<i64: 2>, scalar_prefetch = 0 : i64, scratch_operands = 0 : i64, tpu.core_type = #tpu.core_type<tc>, window_params = [{transform_indices = @transform_0, window_bounds = array<i64: 1, 32, 11264>}, {pipeline_mode = #tpu.pipeline_mode<synchronous>, transform_indices = @transform_1, window_bounds = array<i64: 16, 32>}, {pipeline_mode = #tpu.pipeline_mode<synchronous>, transform_indices = @transform_2, window_bounds = array<i64: 16, 1>}, {transform_indices = @transform_3, window_bounds = array<i64: 1, 16, 2816>}]} {
    %c0 = arith.constant 0 : index
    %c0_0 = arith.constant 0 : index
    %0 = vector.load %arg2[%c0, %c0_0] : memref<16x32xbf16, #tpu.memory_space<vmem>>, vector<16x32xbf16>
    %c0_1 = arith.constant 0 : index
    %c0_2 = arith.constant 0 : index
    %c0_3 = arith.constant 0 : index
    %1 = vector.load %arg1[%c0_1, %c0_2, %c0_3] : memref<1x32x11264xbf16, #tpu.memory_space<vmem>>, vector<1x32x11264xbf16>
    %2 = vector.shape_cast %1 : vector<1x32x11264xbf16> to vector<32x11264xbf16>
    %cst = arith.constant dense<0.000000e+00> : vector<16x11264xf32>
    %3 = tpu.matmul %0, %2, %cst {dimension_numbers = #tpu.dot_dimension_numbers<[1], [0], [0], [1], [0, 0, 1, 1], [], []>} : vector<16x32xbf16>, vector<32x11264xbf16>, vector<16x11264xf32> -> vector<16x11264xf32>
    %4 = vector.extract_strided_slice %3 {offsets = [0, 0], sizes = [16, 2816], strides = [1, 1]} : vector<16x11264xf32> to vector<16x2816xf32>
    %5 = vector.extract_strided_slice %3 {offsets = [0, 2816], sizes = [16, 2816], strides = [1, 1]} : vector<16x11264xf32> to vector<16x2816xf32>
    %6 = arith.maximumf %4, %5 : vector<16x2816xf32>
    %7 = vector.extract_strided_slice %3 {offsets = [0, 5632], sizes = [16, 2816], strides = [1, 1]} : vector<16x11264xf32> to vector<16x2816xf32>
    %8 = vector.extract_strided_slice %3 {offsets = [0, 8448], sizes = [16, 2816], strides = [1, 1]} : vector<16x11264xf32> to vector<16x2816xf32>
    %9 = arith.maximumf %7, %8 : vector<16x2816xf32>
    %10 = arith.maximumf %6, %9 : vector<16x2816xf32>
    %c0_4 = arith.constant 0 : index
    %c0_5 = arith.constant 0 : index
    %11 = vector.load %arg3[%c0_4, %c0_5] : memref<16x1xf32, #tpu.memory_space<vmem>>, vector<16x1xf32>
    %12 = vector.broadcast %11 : vector<16x1xf32> to vector<16x2816xf32>
    %13 = arith.addf %10, %12 : vector<16x2816xf32>
    %cst_6 = arith.constant 0.000000e+00 : f32
    %14 = vector.broadcast %cst_6 : f32 to vector<16x2816xf32>
    %15 = arith.maximumf %13, %14 : vector<16x2816xf32>
    %16 = arith.truncf %15 : vector<16x2816xf32> to vector<16x2816xbf16>
    %c0_7 = arith.constant 0 : index
    %c0_8 = arith.constant 0 : index
    %c0_9 = arith.constant 0 : index
    %17 = vector.load %arg4[%c0_7, %c0_8, %c0_9] : memref<1x16x2816xbf16, #tpu.memory_space<vmem>>, vector<1x16x2816xbf16>
    %18 = vector.shape_cast %17 : vector<1x16x2816xbf16> to vector<16x2816xbf16>
    %19 = vector.shape_cast %16 : vector<16x2816xbf16> to vector<1x16x2816xbf16>
    tpu.vector_store %arg4[%c0_7, %c0_8, %c0_9], %19 {strides = array<i32>} : memref<1x16x2816xbf16, #tpu.memory_space<vmem>>, vector<1x16x2816xbf16>,
    return
  }
  func.func @transform_0(%arg0: i32) -> (i32, i32, i32) {
    %c0_i32 = arith.constant 0 : i32
    %c0_i32_0 = arith.constant 0 : i32
    %c0_i32_1 = arith.constant 0 : i32
    return %arg0, %c0_i32, %c0_i32_0 : i32, i32, i32
  }
  func.func @transform_1(%arg0: i32) -> (i32, i32) {
    %c0_i32 = arith.constant 0 : i32
    %c0_i32_0 = arith.constant 0 : i32
    %c0_i32_1 = arith.constant 0 : i32
    return %c0_i32, %c0_i32_0 : i32, i32
  }
  func.func @transform_2(%arg0: i32) -> (i32, i32) {
    %c0_i32 = arith.constant 0 : i32
    %c0_i32_0 = arith.constant 0 : i32
    %c0_i32_1 = arith.constant 0 : i32
    return %c0_i32, %c0_i32_0 : i32, i32
  }
  func.func @transform_3(%arg0: i32) -> (i32, i32, i32) {
    %c0_i32 = arith.constant 0 : i32
    %c0_i32_0 = arith.constant 0 : i32
    %c0_i32_1 = arith.constant 0 : i32
    return %arg0, %c0_i32, %c0_i32_0 : i32, i32, i32
  }
}

module attributes {stable_mosaic.version = 11 : i64} {
  func.func @_conv_bn_relu_pool_kernel(%arg0: i32, %arg1: memref<1x144x1024xbf16, #tpu.memory_space<vmem>>, %arg2: memref<32x144xbf16, #tpu.memory_space<vmem>>, %arg3: memref<32x1xf32, #tpu.memory_space<vmem>>, %arg4: memref<1x32x256xbf16, #tpu.memory_space<vmem>>) attributes {dimension_semantics = [#tpu.dimension_semantics<parallel>], iteration_bounds = array<i64: 2>, scalar_prefetch = 0 : i64, scratch_operands = 0 : i64, tpu.core_type = #tpu.core_type<tc>, window_params = [{transform_indices = @transform_0, window_bounds = array<i64: 1, 144, 1024>}, {pipeline_mode = #tpu.pipeline_mode<synchronous>, transform_indices = @transform_1, window_bounds = array<i64: 32, 144>}, {pipeline_mode = #tpu.pipeline_mode<synchronous>, transform_indices = @transform_2, window_bounds = array<i64: 32, 1>}, {transform_indices = @transform_3, window_bounds = array<i64: 1, 32, 256>}]} {
    %c0 = arith.constant 0 : index
    %c0_0 = arith.constant 0 : index
    %0 = vector.load %arg2[%c0, %c0_0] : memref<32x144xbf16, #tpu.memory_space<vmem>>, vector<32x144xbf16>
    %c0_1 = arith.constant 0 : index
    %c0_2 = arith.constant 0 : index
    %c0_3 = arith.constant 0 : index
    %1 = vector.load %arg1[%c0_1, %c0_2, %c0_3] : memref<1x144x1024xbf16, #tpu.memory_space<vmem>>, vector<1x144x1024xbf16>
    %2 = vector.shape_cast %1 : vector<1x144x1024xbf16> to vector<144x1024xbf16>
    %cst = arith.constant dense<0.000000e+00> : vector<32x1024xf32>
    %3 = tpu.matmul %0, %2, %cst {dimension_numbers = #tpu.dot_dimension_numbers<[1], [0], [0], [1], [0, 0, 1, 1], [], []>} : vector<32x144xbf16>, vector<144x1024xbf16>, vector<32x1024xf32> -> vector<32x1024xf32>
    %4 = vector.extract_strided_slice %3 {offsets = [0, 0], sizes = [32, 256], strides = [1, 1]} : vector<32x1024xf32> to vector<32x256xf32>
    %5 = vector.extract_strided_slice %3 {offsets = [0, 256], sizes = [32, 256], strides = [1, 1]} : vector<32x1024xf32> to vector<32x256xf32>
    %6 = arith.maximumf %4, %5 : vector<32x256xf32>
    %7 = vector.extract_strided_slice %3 {offsets = [0, 512], sizes = [32, 256], strides = [1, 1]} : vector<32x1024xf32> to vector<32x256xf32>
    %8 = vector.extract_strided_slice %3 {offsets = [0, 768], sizes = [32, 256], strides = [1, 1]} : vector<32x1024xf32> to vector<32x256xf32>
    %9 = arith.maximumf %7, %8 : vector<32x256xf32>
    %10 = arith.maximumf %6, %9 : vector<32x256xf32>
    %c0_4 = arith.constant 0 : index
    %c0_5 = arith.constant 0 : index
    %11 = vector.load %arg3[%c0_4, %c0_5] : memref<32x1xf32, #tpu.memory_space<vmem>>, vector<32x1xf32>
    %12 = vector.broadcast %11 : vector<32x1xf32> to vector<32x256xf32>
    %13 = arith.addf %10, %12 : vector<32x256xf32>
    %cst_6 = arith.constant 0.000000e+00 : f32
    %14 = vector.broadcast %cst_6 : f32 to vector<32x256xf32>
    %15 = arith.maximumf %13, %14 : vector<32x256xf32>
    %16 = arith.truncf %15 : vector<32x256xf32> to vector<32x256xbf16>
    %c0_7 = arith.constant 0 : index
    %c0_8 = arith.constant 0 : index
    %c0_9 = arith.constant 0 : index
    %17 = vector.load %arg4[%c0_7, %c0_8, %c0_9] : memref<1x32x256xbf16, #tpu.memory_space<vmem>>, vector<1x32x256xbf16>
    %18 = vector.shape_cast %17 : vector<1x32x256xbf16> to vector<32x256xbf16>
    %19 = vector.shape_cast %16 : vector<32x256xbf16> to vector<1x32x256xbf16>
    tpu.vector_store %arg4[%c0_7, %c0_8, %c0_9], %19 {strides = array<i32>} : memref<1x32x256xbf16, #tpu.memory_space<vmem>>, vector<1x32x256xbf16>,
    return
  }
  func.func @transform_0(%arg0: i32) -> (i32, i32, i32) {
    %c0_i32 = arith.constant 0 : i32
    %c0_i32_0 = arith.constant 0 : i32
    %c0_i32_1 = arith.constant 0 : i32
    return %arg0, %c0_i32, %c0_i32_0 : i32, i32, i32
  }
  func.func @transform_1(%arg0: i32) -> (i32, i32) {
    %c0_i32 = arith.constant 0 : i32
    %c0_i32_0 = arith.constant 0 : i32
    %c0_i32_1 = arith.constant 0 : i32
    return %c0_i32, %c0_i32_0 : i32, i32
  }
  func.func @transform_2(%arg0: i32) -> (i32, i32) {
    %c0_i32 = arith.constant 0 : i32
    %c0_i32_0 = arith.constant 0 : i32
    %c0_i32_1 = arith.constant 0 : i32
    return %c0_i32, %c0_i32_0 : i32, i32
  }
  func.func @transform_3(%arg0: i32) -> (i32, i32, i32) {
    %c0_i32 = arith.constant 0 : i32
    %c0_i32_0 = arith.constant 0 : i32
    %c0_i32_1 = arith.constant 0 : i32
    return %arg0, %c0_i32, %c0_i32_0 : i32, i32, i32
  }
}

module attributes {stable_mosaic.version = 11 : i64} {
  func.func @_conv_bn_relu_pool_kernel(%arg0: i32, %arg1: memref<1x288x512xbf16, #tpu.memory_space<vmem>>, %arg2: memref<64x288xbf16, #tpu.memory_space<vmem>>, %arg3: memref<64x1xf32, #tpu.memory_space<vmem>>, %arg4: memref<1x64x128xbf16, #tpu.memory_space<vmem>>) attributes {dimension_semantics = [#tpu.dimension_semantics<parallel>], iteration_bounds = array<i64: 2>, scalar_prefetch = 0 : i64, scratch_operands = 0 : i64, tpu.core_type = #tpu.core_type<tc>, window_params = [{transform_indices = @transform_0, window_bounds = array<i64: 1, 288, 512>}, {pipeline_mode = #tpu.pipeline_mode<synchronous>, transform_indices = @transform_1, window_bounds = array<i64: 64, 288>}, {pipeline_mode = #tpu.pipeline_mode<synchronous>, transform_indices = @transform_2, window_bounds = array<i64: 64, 1>}, {transform_indices = @transform_3, window_bounds = array<i64: 1, 64, 128>}]} {
    %c0 = arith.constant 0 : index
    %c0_0 = arith.constant 0 : index
    %0 = vector.load %arg2[%c0, %c0_0] : memref<64x288xbf16, #tpu.memory_space<vmem>>, vector<64x288xbf16>
    %c0_1 = arith.constant 0 : index
    %c0_2 = arith.constant 0 : index
    %c0_3 = arith.constant 0 : index
    %1 = vector.load %arg1[%c0_1, %c0_2, %c0_3] : memref<1x288x512xbf16, #tpu.memory_space<vmem>>, vector<1x288x512xbf16>
    %2 = vector.shape_cast %1 : vector<1x288x512xbf16> to vector<288x512xbf16>
    %cst = arith.constant dense<0.000000e+00> : vector<64x512xf32>
    %3 = tpu.matmul %0, %2, %cst {dimension_numbers = #tpu.dot_dimension_numbers<[1], [0], [0], [1], [0, 0, 1, 1], [], []>} : vector<64x288xbf16>, vector<288x512xbf16>, vector<64x512xf32> -> vector<64x512xf32>
    %4 = vector.extract_strided_slice %3 {offsets = [0, 0], sizes = [64, 128], strides = [1, 1]} : vector<64x512xf32> to vector<64x128xf32>
    %5 = vector.extract_strided_slice %3 {offsets = [0, 128], sizes = [64, 128], strides = [1, 1]} : vector<64x512xf32> to vector<64x128xf32>
    %6 = arith.maximumf %4, %5 : vector<64x128xf32>
    %7 = vector.extract_strided_slice %3 {offsets = [0, 256], sizes = [64, 128], strides = [1, 1]} : vector<64x512xf32> to vector<64x128xf32>
    %8 = vector.extract_strided_slice %3 {offsets = [0, 384], sizes = [64, 128], strides = [1, 1]} : vector<64x512xf32> to vector<64x128xf32>
    %9 = arith.maximumf %7, %8 : vector<64x128xf32>
    %10 = arith.maximumf %6, %9 : vector<64x128xf32>
    %c0_4 = arith.constant 0 : index
    %c0_5 = arith.constant 0 : index
    %11 = vector.load %arg3[%c0_4, %c0_5] : memref<64x1xf32, #tpu.memory_space<vmem>>, vector<64x1xf32>
    %12 = vector.broadcast %11 : vector<64x1xf32> to vector<64x128xf32>
    %13 = arith.addf %10, %12 : vector<64x128xf32>
    %cst_6 = arith.constant 0.000000e+00 : f32
    %14 = vector.broadcast %cst_6 : f32 to vector<64x128xf32>
    %15 = arith.maximumf %13, %14 : vector<64x128xf32>
    %16 = arith.truncf %15 : vector<64x128xf32> to vector<64x128xbf16>
    %c0_7 = arith.constant 0 : index
    %c0_8 = arith.constant 0 : index
    %c0_9 = arith.constant 0 : index
    %17 = vector.load %arg4[%c0_7, %c0_8, %c0_9] : memref<1x64x128xbf16, #tpu.memory_space<vmem>>, vector<1x64x128xbf16>
    %18 = vector.shape_cast %17 : vector<1x64x128xbf16> to vector<64x128xbf16>
    %19 = vector.shape_cast %16 : vector<64x128xbf16> to vector<1x64x128xbf16>
    tpu.vector_store %arg4[%c0_7, %c0_8, %c0_9], %19 {strides = array<i32>} : memref<1x64x128xbf16, #tpu.memory_space<vmem>>, vector<1x64x128xbf16>,
    return
  }
  func.func @transform_0(%arg0: i32) -> (i32, i32, i32) {
    %c0_i32 = arith.constant 0 : i32
    %c0_i32_0 = arith.constant 0 : i32
    %c0_i32_1 = arith.constant 0 : i32
    return %arg0, %c0_i32, %c0_i32_0 : i32, i32, i32
  }
  func.func @transform_1(%arg0: i32) -> (i32, i32) {
    %c0_i32 = arith.constant 0 : i32
    %c0_i32_0 = arith.constant 0 : i32
    %c0_i32_1 = arith.constant 0 : i32
    return %c0_i32, %c0_i32_0 : i32, i32
  }
  func.func @transform_2(%arg0: i32) -> (i32, i32) {
    %c0_i32 = arith.constant 0 : i32
    %c0_i32_0 = arith.constant 0 : i32
    %c0_i32_1 = arith.constant 0 : i32
    return %c0_i32, %c0_i32_0 : i32, i32
  }
  func.func @transform_3(%arg0: i32) -> (i32, i32, i32) {
    %c0_i32 = arith.constant 0 : i32
    %c0_i32_0 = arith.constant 0 : i32
    %c0_i32_1 = arith.constant 0 : i32
    return %arg0, %c0_i32, %c0_i32_0 : i32, i32, i32
  }
}

module attributes {stable_mosaic.version = 11 : i64} {
  func.func @_head_kernel(%arg0: i32, %arg1: memref<2x576xbf16, #tpu.memory_space<vmem>>, %arg2: memref<576x64xbf16, #tpu.memory_space<vmem>>, %arg3: memref<1x64xf32, #tpu.memory_space<vmem>>, %arg4: memref<64x10xbf16, #tpu.memory_space<vmem>>, %arg5: memref<1x10xf32, #tpu.memory_space<vmem>>, %arg6: memref<2x10xf32, #tpu.memory_space<vmem>>) attributes {dimension_semantics = [#tpu.dimension_semantics<arbitrary>], iteration_bounds = array<i64: 1>, scalar_prefetch = 0 : i64, scratch_operands = 0 : i64, tpu.core_type = #tpu.core_type<tc>, window_params = [{pipeline_mode = #tpu.pipeline_mode<synchronous>, transform_indices = @transform_0, window_bounds = array<i64: 2, 576>}, {pipeline_mode = #tpu.pipeline_mode<synchronous>, transform_indices = @transform_1, window_bounds = array<i64: 576, 64>}, {pipeline_mode = #tpu.pipeline_mode<synchronous>, transform_indices = @transform_2, window_bounds = array<i64: 1, 64>}, {pipeline_mode = #tpu.pipeline_mode<synchronous>, transform_indices = @transform_3, window_bounds = array<i64: 64, 10>}, {pipeline_mode = #tpu.pipeline_mode<synchronous>, transform_indices = @transform_4, window_bounds = array<i64: 1, 10>}, {pipeline_mode = #tpu.pipeline_mode<synchronous>, transform_indices = @transform_5, window_bounds = array<i64: 2, 10>}]} {
    %c0 = arith.constant 0 : index
    %c0_0 = arith.constant 0 : index
    %0 = vector.load %arg1[%c0, %c0_0] : memref<2x576xbf16, #tpu.memory_space<vmem>>, vector<2x576xbf16>
    %c0_1 = arith.constant 0 : index
    %c0_2 = arith.constant 0 : index
    %1 = vector.load %arg2[%c0_1, %c0_2] : memref<576x64xbf16, #tpu.memory_space<vmem>>, vector<576x64xbf16>
    %cst = arith.constant dense<0.000000e+00> : vector<2x64xf32>
    %2 = tpu.matmul %0, %1, %cst {dimension_numbers = #tpu.dot_dimension_numbers<[1], [0], [0], [1], [0, 0, 1, 1], [], []>} : vector<2x576xbf16>, vector<576x64xbf16>, vector<2x64xf32> -> vector<2x64xf32>
    %c0_3 = arith.constant 0 : index
    %c0_4 = arith.constant 0 : index
    %3 = vector.load %arg3[%c0_3, %c0_4] : memref<1x64xf32, #tpu.memory_space<vmem>>, vector<1x64xf32>
    %4 = vector.broadcast %3 : vector<1x64xf32> to vector<2x64xf32>
    %5 = arith.addf %2, %4 : vector<2x64xf32>
    %cst_5 = arith.constant 0.000000e+00 : f32
    %6 = vector.broadcast %cst_5 : f32 to vector<2x64xf32>
    %7 = arith.maximumf %5, %6 : vector<2x64xf32>
    %8 = arith.truncf %7 : vector<2x64xf32> to vector<2x64xbf16>
    %c0_6 = arith.constant 0 : index
    %c0_7 = arith.constant 0 : index
    %9 = vector.load %arg4[%c0_6, %c0_7] : memref<64x10xbf16, #tpu.memory_space<vmem>>, vector<64x10xbf16>
    %cst_8 = arith.constant dense<0.000000e+00> : vector<2x10xf32>
    %10 = tpu.matmul %8, %9, %cst_8 {dimension_numbers = #tpu.dot_dimension_numbers<[1], [0], [0], [1], [0, 0, 1, 1], [], []>} : vector<2x64xbf16>, vector<64x10xbf16>, vector<2x10xf32> -> vector<2x10xf32>
    %c0_9 = arith.constant 0 : index
    %c0_10 = arith.constant 0 : index
    %11 = vector.load %arg5[%c0_9, %c0_10] : memref<1x10xf32, #tpu.memory_space<vmem>>, vector<1x10xf32>
    %12 = vector.broadcast %11 : vector<1x10xf32> to vector<2x10xf32>
    %13 = arith.addf %10, %12 : vector<2x10xf32>
    %cst_11 = arith.constant 0.000000e+00 : f32
    %14 = vector.broadcast %cst_11 : f32 to vector<2x10xf32>
    %15 = arith.maximumf %13, %14 : vector<2x10xf32>
    %cst_12 = arith.constant dense<0xFF800000> : vector<2xf32>
    %16 = vector.multi_reduction <maximumf>, %15, %cst_12 [1] : vector<2x10xf32> to vector<2xf32>
    %17 = vector.shape_cast %16 : vector<2xf32> to vector<2x1xf32>
    %18 = vector.broadcast %17 : vector<2x1xf32> to vector<2x10xf32>
    %19 = arith.subf %15, %18 : vector<2x10xf32>
    %20 = math.exp %19 : vector<2x10xf32>
    %cst_13 = arith.constant dense<0.000000e+00> : vector<2xf32>
    %21 = vector.multi_reduction <add>, %20, %cst_13 [1] : vector<2x10xf32> to vector<2xf32>
    %22 = vector.shape_cast %21 : vector<2xf32> to vector<2x1xf32>
    %23 = math.log %22 : vector<2x1xf32>
    %24 = arith.addf %23, %17 : vector<2x1xf32>
    %25 = vector.broadcast %24 : vector<2x1xf32> to vector<2x10xf32>
    %26 = arith.subf %15, %25 : vector<2x10xf32>
    %c0_14 = arith.constant 0 : index
    %c0_15 = arith.constant 0 : index
    %27 = vector.load %arg6[%c0_14, %c0_15] : memref<2x10xf32, #tpu.memory_space<vmem>>, vector<2x10xf32>
    tpu.vector_store %arg6[%c0_14, %c0_15], %26 {strides = array<i32>} : memref<2x10xf32, #tpu.memory_space<vmem>>, vector<2x10xf32>,
    return
  }
  func.func @transform_0(%arg0: i32) -> (i32, i32) {
    %c0_i32 = arith.constant 0 : i32
    %c0_i32_0 = arith.constant 0 : i32
    %c0_i32_1 = arith.constant 0 : i32
    return %c0_i32, %c0_i32_0 : i32, i32
  }
  func.func @transform_1(%arg0: i32) -> (i32, i32) {
    %c0_i32 = arith.constant 0 : i32
    %c0_i32_0 = arith.constant 0 : i32
    %c0_i32_1 = arith.constant 0 : i32
    return %c0_i32, %c0_i32_0 : i32, i32
  }
  func.func @transform_2(%arg0: i32) -> (i32, i32) {
    %c0_i32 = arith.constant 0 : i32
    %c0_i32_0 = arith.constant 0 : i32
    %c0_i32_1 = arith.constant 0 : i32
    return %c0_i32, %c0_i32_0 : i32, i32
  }
  func.func @transform_3(%arg0: i32) -> (i32, i32) {
    %c0_i32 = arith.constant 0 : i32
    %c0_i32_0 = arith.constant 0 : i32
    %c0_i32_1 = arith.constant 0 : i32
    return %c0_i32, %c0_i32_0 : i32, i32
  }
  func.func @transform_4(%arg0: i32) -> (i32, i32) {
    %c0_i32 = arith.constant 0 : i32
    %c0_i32_0 = arith.constant 0 : i32
    %c0_i32_1 = arith.constant 0 : i32
    return %c0_i32, %c0_i32_0 : i32, i32
  }
  func.func @transform_5(%arg0: i32) -> (i32, i32) {
    %c0_i32 = arith.constant 0 : i32
    %c0_i32_0 = arith.constant 0 : i32
    %c0_i32_1 = arith.constant 0 : i32
    return %c0_i32, %c0_i32_0 : i32, i32
  }
}

</mosaic_0001>

<bundles_post_ra>
// kernel: cnn_forward.4
= control target key start
LH: loop header
LB: loop body
LE: loop exit
PB: predicated region body
PF: predicated region fallthrough
CT: control target
= control target key end

     0   :  { %s3826_s12 = smov 0   ;;  %s4861_s0 = inlined_call_operand.vmem [shape: bf16[2,32,11264], index: 0, kind: input, shape index: {}]   ;;  %s4862_s1 = inlined_call_operand.vmem [shape: bf16[16,32], index: 1, kind: input, shape index: {}]   ;;  %s4863_s2 = inlined_call_operand.vmem [shape: f32[16,1], index: 2, kind: input, shape index: {}]   ;;  %s4864_s3 = inlined_call_operand.vmem [shape: bf16[2,16,2816], index: 3, kind: output, shape index: {}]  }
   0x1 LB: > { %s2802_s13 = sadd.s32 4294967295, %s3803_s12   ;;  %p2806_p0 = scmp.ge.s32.totalorder %s3803_s12, 1  ;;  %s3803_s12 = sphi %s3826_s12, %s13_s12  }
   0x2   : > { %p137_p1 = scmp.lt.s32.totalorder %s3803_s12, 3 }
   0x4   : > { %p138_p2 = pnand %p2806_p0, %p137_p1 }
   0x6   : > { %141 = sbr.rel (%p138_p2) target bundleno = 517 (0x205), region = 32 }
   0xb   : > { %p161_p3 = scmp.lt.s32.totalorder %s2802_s13, 1  ;;  %vm1235_vm0 = vcmask 261120   ;;  %v3860_v21 = vld [vmem:[%s4862_s1] sm:$0xff] }
   0xd   : > { %s5024_s13 = smov (!%p161_p3, %s2802_s13), 1 }
   0xe   : > { %s3784_s14 = smul.u32 1408, %s5024_s13 }
   0xf   : > { %s3785_s26 = smul.u32 176, %s5024_s13 }
  0x10   : > { %s3840_s17 = scalar_lea.vmem %s4861_s0, %s3784_s14 }
  0x11   : > { %v3167_v0 = vld [vmem:[%s3840_s17 + $0x2c0] sm:$0xf]  ;;  %v3696_v2 = vld [vmem:[%s3840_s17 + $0x2c4] sm:$0xf]  ;;  %v3175_v5 = vld [vmem:[%s3840_s17 + $0x2c8] sm:$0xf]  ;;  %s4669_s29 = scalar_lea.vmem %s4864_s3, %s3785_s26 }
  0x12   : > { %v3740_v1 = vld [vmem:[%s3840_s17 + $0x41c] sm:$0xf0]  ;;  %v3169_v4 = vld [vmem:[%s3840_s17 + $0x420] sm:$0xf0]  ;;  %v3741_v6 = vld [vmem:[%s3840_s17 + $0x424] sm:$0xf0] }
  0x13   : > { %v3168_v3 = vor.u32 %v3740_v1, %v3167_v0  ;;  %v3172_v7 = vor.u32 %v3696_v2, %v3169_v4  ;;  %v3176_v8 = vor.u32 %v3741_v6, %v3175_v5  ;;  %v3697_v9 = vld [vmem:[%s3840_s17 + $0x2cc] sm:$0xf]  ;;  %v2815_v11 = vld [vmem:[%s3840_s17] sm:$0xf]  ;;  %v3608_v14 = vld [vmem:[%s3840_s17 + $0x4] sm:$0xf] }
  0x14   : > { %v3177_v10 = vld [vmem:[%s3840_s17 + $0x428] sm:$0xf0]  ;;  %v3652_v13 = vld [vmem:[%s3840_s17 + $0x15c] sm:$0xf0]  ;;  %v2817_v15 = vld [vmem:[%s3840_s17 + $0x160] sm:$0xf0] }
  0x15   : > { %1245 = vmatpush.bf16.msra.mxu0 %v3168_v3  ;;  %v3180_v12 = vor.u32 %v3697_v9, %v3177_v10  ;;  %1259 = vmatpush.bf16.msra.mxu1 %v3172_v7  ;;  %v2816_v16 = vor.u32 %v3652_v13, %v2815_v11  ;;  %v2820_v17 = vor.u32 %v3608_v14, %v2817_v15  ;;  %v2823_v18 = vld [vmem:[%s3840_s17 + $0x8] sm:$0xf]  ;;  %v3609_v20 = vld [vmem:[%s3840_s17 + $0xc] sm:$0xf]  ;;  %v3191_v24 = vld [vmem:[%s3840_s17 + $0x2d8] sm:$0xf] }
  0x16   : > { %1273 = vmatpush.bf16.msra.mxu2 %v3176_v8  ;;  %v3653_v19 = vld [vmem:[%s3840_s17 + $0x164] sm:$0xf0]  ;;  %v2825_v23 = vld [vmem:[%s3840_s17 + $0x168] sm:$0xf0]  ;;  %v3743_v25 = vld [vmem:[%s3840_s17 + $0x434] sm:$0xf0] }
  0x17   : > { %1287 = vmatpush.bf16.msra.mxu3 %v3180_v12  ;;  %v2824_v22 = vor.u32 %v3653_v19, %v2823_v18  ;;  %v2828_v26 = vor.u32 %v3609_v20, %v2825_v23  ;;  %v3192_v27 = vor.u32 %v3743_v25, %v3191_v24  ;;  %v3699_v28 = vld [vmem:[%s3840_s17 + $0x2dc] sm:$0xf]  ;;  %v3183_v30 = vld [vmem:[%s3840_s17 + $0x2d0] sm:$0xf]  ;;  %v3698_v33 = vld [vmem:[%s3840_s17 + $0x2d4] sm:$0xf] }
  0x18   : > { %v3193_v29 = vld [vmem:[%s3840_s17 + $0x438] sm:$0xf0]  ;;  %v3742_v32 = vld [vmem:[%s3840_s17 + $0x42c] sm:$0xf0]  ;;  %v3185_v34 = vld [vmem:[%s3840_s17 + $0x430] sm:$0xf0] }
  0x19   : > { %1246 = vmatpush.bf16.msra.mxu0 %v2816_v16  ;;  %v3196_v31 = vor.u32 %v3699_v28, %v3193_v29  ;;  %1260 = vmatpush.bf16.msra.mxu1 %v2820_v17  ;;  %v3184_v35 = vor.u32 %v3742_v32, %v3183_v30  ;;  %v2839_v36 = vld [vmem:[%s3840_s17 + $0x18] sm:$0xf]  ;;  %v3611_v38 = vld [vmem:[%s3840_s17 + $0x1c] sm:$0xf]  ;;  %v3188_v39 = vor.u32 %v3698_v33, %v3185_v34  ;;  %v2831_v42 = vld [vmem:[%s3840_s17 + $0x10] sm:$0xf] }
  0x1a   : > { %1274 = vmatpush.bf16.msra.mxu2 %v2824_v22  ;;  %v3655_v37 = vld [vmem:[%s3840_s17 + $0x174] sm:$0xf0]  ;;  %v2841_v41 = vld [vmem:[%s3840_s17 + $0x178] sm:$0xf0]  ;;  %v3654_v43 = vld [vmem:[%s3840_s17 + $0x16c] sm:$0xf0] }
  0x1b   : > { %1288 = vmatpush.bf16.msra.mxu3 %v2828_v26  ;;  %v2840_v40 = vor.u32 %v3655_v37, %v2839_v36  ;;  %v2844_v44 = vor.u32 %v3611_v38, %v2841_v41  ;;  %v3610_v45 = vld [vmem:[%s3840_s17 + $0x14] sm:$0xf]  ;;  %v3207_v47 = vld [vmem:[%s3840_s17 + $0x2e8] sm:$0xf]  ;;  %v3701_v49 = vld [vmem:[%s3840_s17 + $0x2ec] sm:$0xf]  ;;  %v2832_v51 = vor.u32 %v3654_v43, %v2831_v42 }
  0x1c   : > { %3517 = vmatmul.msk.bf16.vlgmr.msra.gmra.mxu0 %vm1235_vm0, %v3860_v21  ;;  %v2833_v46 = vld [vmem:[%s3840_s17 + $0x170] sm:$0xf0]  ;;  %3518 = vmatmul.msk.bf16.vlgmr.msra.gmra.mxu1 %vm1235_vm0, %v3860_v21  ;;  %v3745_v48 = vld [vmem:[%s3840_s17 + $0x444] sm:$0xf0]  ;;  %v3209_v50 = vld [vmem:[%s3840_s17 + $0x448] sm:$0xf0] }
  0x1d   : > { %3519 = vmatmul.msk.bf16.vlgmr.msra.gmra.mxu2 %vm1235_vm0, %v3860_v21  ;;  %1301 = vmatpush.bf16.msrb.mxu0 %v3184_v35  ;;  %v3208_v52 = vor.u32 %v3745_v48, %v3207_v47  ;;  %v3212_v53 = vor.u32 %v3701_v49, %v3209_v50  ;;  %v3199_v54 = vld [vmem:[%s3840_s17 + $0x2e0] sm:$0xf]  ;;  %v3700_v56 = vld [vmem:[%s3840_s17 + $0x2e4] sm:$0xf]  ;;  %v2836_v57 = vor.u32 %v3610_v45, %v2833_v46  ;;  %v2855_v60 = vld [vmem:[%s3840_s17 + $0x28] sm:$0xf] }
  0x1e   : > { %1329 = vmatpush.bf16.msrb.mxu2 %v3192_v27  ;;  %3520 = vmatmul.msk.bf16.vlgmr.msra.gmra.mxu3 %vm1235_vm0, %v3860_v21  ;;  %v3744_v55 = vld [vmem:[%s3840_s17 + $0x43c] sm:$0xf0]  ;;  %v3201_v59 = vld [vmem:[%s3840_s17 + $0x440] sm:$0xf0]  ;;  %v3657_v61 = vld [vmem:[%s3840_s17 + $0x184] sm:$0xf0] }
  0x1f   : > { %1343 = vmatpush.bf16.msrb.mxu3 %v3196_v31  ;;  %1315 = vmatpush.bf16.msrb.mxu1 %v3188_v39  ;;  %v3200_v58 = vor.u32 %v3744_v55, %v3199_v54  ;;  %v3204_v62 = vor.u32 %v3700_v56, %v3201_v59  ;;  %v2856_v63 = vor.u32 %v3657_v61, %v2855_v60  ;;  %v3613_v0 = vld [vmem:[%s3840_s17 + $0x2c] sm:$0xf]  ;;  %v2847_v2 = vld [vmem:[%s3840_s17 + $0x20] sm:$0xf]  ;;  %v3612_v5 = vld [vmem:[%s3840_s17 + $0x24] sm:$0xf] }
  0x20   : > { %v2857_v1 = vld [vmem:[%s3840_s17 + $0x188] sm:$0xf0]  ;;  %v3656_v4 = vld [vmem:[%s3840_s17 + $0x17c] sm:$0xf0]  ;;  %v2849_v6 = vld [vmem:[%s3840_s17 + $0x180] sm:$0xf0] }
  0x21   : > { %v2860_v3 = vor.u32 %v3613_v0, %v2857_v1  ;;  %1302 = vmatpush.bf16.msrb.mxu0 %v2832_v51  ;;  %v2848_v7 = vor.u32 %v3656_v4, %v2847_v2  ;;  %v2852_v8 = vor.u32 %v3612_v5, %v2849_v6  ;;  %v3223_v9 = vld [vmem:[%s3840_s17 + $0x2f8] sm:$0xf]  ;;  %v3703_v11 = vld [vmem:[%s3840_s17 + $0x2fc] sm:$0xf]  ;;  %v3215_v13 = vld [vmem:[%s3840_s17 + $0x2f0] sm:$0xf] }
  0x22   : > { %1330 = vmatpush.bf16.msrb.mxu2 %v2840_v40  ;;  %v3747_v10 = vld [vmem:[%s3840_s17 + $0x454] sm:$0xf0]  ;;  %v3225_v12 = vld [vmem:[%s3840_s17 + $0x458] sm:$0xf0]  ;;  %v3746_v14 = vld [vmem:[%s3840_s17 + $0x44c] sm:$0xf0] }
  0x23   : > { %1344 = vmatpush.bf16.msrb.mxu3 %v2844_v44  ;;  %1316 = vmatpush.bf16.msrb.mxu1 %v2836_v57  ;;  %v3702_v15 = vld [vmem:[%s3840_s17 + $0x2f4] sm:$0xf]  ;;  %v3224_v17 = vor.u32 %v3747_v10, %v3223_v9  ;;  %v3228_v18 = vor.u32 %v3703_v11, %v3225_v12  ;;  %v3216_v19 = vor.u32 %v3746_v14, %v3215_v13  ;;  %v2871_v20 = vld [vmem:[%s3840_s17 + $0x38] sm:$0xf]  ;;  %v3615_v23 = vld [vmem:[%s3840_s17 + $0x3c] sm:$0xf] }
  0x24   : > { %v3217_v16 = vld [vmem:[%s3840_s17 + $0x450] sm:$0xf0]  ;;  %v3659_v22 = vld [vmem:[%s3840_s17 + $0x194] sm:$0xf0]  ;;  %v2873_v25 = vld [vmem:[%s3840_s17 + $0x198] sm:$0xf0] }
  0x25   : > { %1357 = vmatpush.bf16.msra.mxu0 %v3200_v58  ;;  %v3220_v24 = vor.u32 %v3702_v15, %v3217_v16  ;;  %v2863_v26 = vld [vmem:[%s3840_s17 + $0x30] sm:$0xf]  ;;  %v3614_v28 = vld [vmem:[%s3840_s17 + $0x34] sm:$0xf]  ;;  %v2872_v30 = vor.u32 %v3659_v22, %v2871_v20  ;;  %v2876_v31 = vor.u32 %v3615_v23, %v2873_v25  ;;  %v3239_v34 = vld [vmem:[%s3840_s17 + $0x308] sm:$0xf] }
  0x26   : > { %1385 = vmatpush.bf16.msra.mxu2 %v3208_v52  ;;  %v3658_v27 = vld [vmem:[%s3840_s17 + $0x18c] sm:$0xf0]  ;;  %v2865_v29 = vld [vmem:[%s3840_s17 + $0x190] sm:$0xf0]  ;;  %v3749_v35 = vld [vmem:[%s3840_s17 + $0x464] sm:$0xf0] }
  0x27   : > { %1399 = vmatpush.bf16.msra.mxu3 %v3212_v53  ;;  %1371 = vmatpush.bf16.msra.mxu1 %v3204_v62  ;;  %v2864_v32 = vor.u32 %v3658_v27, %v2863_v26  ;;  %v2868_v33 = vor.u32 %v3614_v28, %v2865_v29  ;;  %v3705_v36 = vld [vmem:[%s3840_s17 + $0x30c] sm:$0xf]  ;;  %v3231_v38 = vld [vmem:[%s3840_s17 + $0x300] sm:$0xf]  ;;  %v3704_v40 = vld [vmem:[%s3840_s17 + $0x304] sm:$0xf]  ;;  %v3240_v42 = vor.u32 %v3749_v35, %v3239_v34 }
  0x28   : > { %v3241_v37 = vld [vmem:[%s3840_s17 + $0x468] sm:$0xf0]  ;;  %v3748_v39 = vld [vmem:[%s3840_s17 + $0x45c] sm:$0xf0]  ;;  %v3233_v41 = vld [vmem:[%s3840_s17 + $0x460] sm:$0xf0] }
  0x29   : > { %1358 = vmatpush.bf16.msra.mxu0 %v2848_v7  ;;  %v3244_v43 = vor.u32 %v3705_v36, %v3241_v37  ;;  %v3232_v44 = vor.u32 %v3748_v39, %v3231_v38  ;;  %v2887_v45 = vld [vmem:[%s3840_s17 + $0x48] sm:$0xf]  ;;  %v3617_v47 = vld [vmem:[%s3840_s17 + $0x4c] sm:$0xf]  ;;  %v3236_v48 = vor.u32 %v3704_v40, %v3233_v41  ;;  %v2879_v50 = vld [vmem:[%s3840_s17 + $0x40] sm:$0xf] }
  0x2a   : > { %1386 = vmatpush.bf16.msra.mxu2 %v2856_v63  ;;  %v3661_v46 = vld [vmem:[%s3840_s17 + $0x1a4] sm:$0xf0]  ;;  %v2889_v49 = vld [vmem:[%s3840_s17 + $0x1a8] sm:$0xf0]  ;;  %v3660_v51 = vld [vmem:[%s3840_s17 + $0x19c] sm:$0xf0] }
  0x2b   : > { %1400 = vmatpush.bf16.msra.mxu3 %v2860_v3  ;;  %1372 = vmatpush.bf16.msra.mxu1 %v2852_v8  ;;  %v3616_v52 = vld [vmem:[%s3840_s17 + $0x44] sm:$0xf]  ;;  %v2888_v54 = vor.u32 %v3661_v46, %v2887_v45  ;;  %v2892_v55 = vor.u32 %v3617_v47, %v2889_v49  ;;  %v2880_v56 = vor.u32 %v3660_v51, %v2879_v50  ;;  %v3255_v58 = vld [vmem:[%s3840_s17 + $0x318] sm:$0xf]  ;;  %v3707_v60 = vld [vmem:[%s3840_s17 + $0x31c] sm:$0xf] }
  0x2c   : > { %3521 = vmatmul.msk.bf16.vlgmr.msrb.gmra.mxu0 %vm1235_vm0, %v3860_v21  ;;  %3522 = vmatmul.msk.bf16.vlgmr.msrb.gmra.mxu1 %vm1235_vm0, %v3860_v21  ;;  %v2881_v53 = vld [vmem:[%s3840_s17 + $0x1a0] sm:$0xf0]  ;;  %v3751_v59 = vld [vmem:[%s3840_s17 + $0x474] sm:$0xf0]  ;;  %v3257_v61 = vld [vmem:[%s3840_s17 + $0x478] sm:$0xf0] }
  0x2d   : > { %3523 = vmatmul.msk.bf16.vlgmr.msrb.gmra.mxu2 %vm1235_vm0, %v3860_v21  ;;  %1413 = vmatpush.bf16.msrb.mxu0 %v3216_v19  ;;  %v2884_v57 = vor.u32 %v3616_v52, %v2881_v53  ;;  %v3247_v62 = vld [vmem:[%s3840_s17 + $0x310] sm:$0xf]  ;;  %v3706_v0 = vld [vmem:[%s3840_s17 + $0x314] sm:$0xf]  ;;  %v3256_v2 = vor.u32 %v3751_v59, %v3255_v58  ;;  %v3260_v3 = vor.u32 %v3707_v60, %v3257_v61  ;;  %v2903_v5 = vld [vmem:[%s3840_s17 + $0x58] sm:$0xf] }
  0x2e   : > { %3524 = vmatmul.msk.bf16.vlgmr.msrb.gmra.mxu3 %vm1235_vm0, %v3860_v21  ;;  %1441 = vmatpush.bf16.msrb.mxu2 %v3224_v17  ;;  %v3750_v63 = vld [vmem:[%s3840_s17 + $0x46c] sm:$0xf0]  ;;  %v3249_v1 = vld [vmem:[%s3840_s17 + $0x470] sm:$0xf0]  ;;  %v3663_v6 = vld [vmem:[%s3840_s17 + $0x1b4] sm:$0xf0] }
  0x2f   : > { %1455 = vmatpush.bf16.msrb.mxu3 %v3228_v18  ;;  %1427 = vmatpush.bf16.msrb.mxu1 %v3220_v24  ;;  %v3248_v4 = vor.u32 %v3750_v63, %v3247_v62  ;;  %v3619_v7 = vld [vmem:[%s3840_s17 + $0x5c] sm:$0xf]  ;;  %v3252_v8 = vor.u32 %v3706_v0, %v3249_v1  ;;  %v2895_v10 = vld [vmem:[%s3840_s17 + $0x50] sm:$0xf]  ;;  %v3618_v12 = vld [vmem:[%s3840_s17 + $0x54] sm:$0xf]  ;;  %v2904_v14 = vor.u32 %v3663_v6, %v2903_v5 }
  0x30   : > { %v2905_v9 = vld [vmem:[%s3840_s17 + $0x1b8] sm:$0xf0]  ;;  %v3662_v11 = vld [vmem:[%s3840_s17 + $0x1ac] sm:$0xf0]  ;;  %v2897_v13 = vld [vmem:[%s3840_s17 + $0x1b0] sm:$0xf0] }
  0x31   : > { %1414 = vmatpush.bf16.msrb.mxu0 %v2864_v32  ;;  %v2908_v15 = vor.u32 %v3619_v7, %v2905_v9  ;;  %v2896_v16 = vor.u32 %v3662_v11, %v2895_v10  ;;  %v2900_v17 = vor.u32 %v3618_v12, %v2897_v13  ;;  %v3271_v18 = vld [vmem:[%s3840_s17 + $0x328] sm:$0xf]  ;;  %v3709_v20 = vld [vmem:[%s3840_s17 + $0x32c] sm:$0xf]  ;;  %v3263_v23 = vld [vmem:[%s3840_s17 + $0x320] sm:$0xf] }
  0x32   : > { %1442 = vmatpush.bf16.msrb.mxu2 %v2872_v30  ;;  %v3753_v19 = vld [vmem:[%s3840_s17 + $0x484] sm:$0xf0]  ;;  %v3273_v22 = vld [vmem:[%s3840_s17 + $0x488] sm:$0xf0]  ;;  %v3752_v24 = vld [vmem:[%s3840_s17 + $0x47c] sm:$0xf0] }
  0x33   : > { %1456 = vmatpush.bf16.msrb.mxu3 %v2876_v31  ;;  %1428 = vmatpush.bf16.msrb.mxu1 %v2868_v33  ;;  %v3708_v25 = vld [vmem:[%s3840_s17 + $0x324] sm:$0xf]  ;;  %v3272_v27 = vor.u32 %v3753_v19, %v3271_v18  ;;  %v3276_v28 = vor.u32 %v3709_v20, %v3273_v22  ;;  %v3264_v29 = vor.u32 %v3752_v24, %v3263_v23  ;;  %v2919_v30 = vld [vmem:[%s3840_s17 + $0x68] sm:$0xf]  ;;  %v3621_v32 = vld [vmem:[%s3840_s17 + $0x6c] sm:$0xf] }
  0x34   : > { %v3265_v26 = vld [vmem:[%s3840_s17 + $0x480] sm:$0xf0]  ;;  %v3665_v31 = vld [vmem:[%s3840_s17 + $0x1c4] sm:$0xf0]  ;;  %v2921_v34 = vld [vmem:[%s3840_s17 + $0x1c8] sm:$0xf0] }
  0x35   : > { %v3268_v33 = vor.u32 %v3708_v25, %v3265_v26  ;;  %v2911_v35 = vld [vmem:[%s3840_s17 + $0x60] sm:$0xf]  ;;  %v3620_v37 = vld [vmem:[%s3840_s17 + $0x64] sm:$0xf]  ;;  %v2920_v39 = vor.u32 %v3665_v31, %v2919_v30  ;;  %v2924_v40 = vor.u32 %v3621_v32, %v2921_v34  ;;  %v3711_v45 = vld [vmem:[%s3840_s17 + $0x33c] sm:$0xf] }
  0x36   : > { %v3664_v36 = vld [vmem:[%s3840_s17 + $0x1bc] sm:$0xf0]  ;;  %v2913_v38 = vld [vmem:[%s3840_s17 + $0x1c0] sm:$0xf0]  ;;  %v3289_v46 = vld [vmem:[%s3840_s17 + $0x498] sm:$0xf0] }
  0x37   : > { %v2912_v41 = vor.u32 %v3664_v36, %v2911_v35  ;;  %v3279_v47 = vld [vmem:[%s3840_s17 + $0x330] sm:$0xf]  ;;  %v3710_v49 = vld [vmem:[%s3840_s17 + $0x334] sm:$0xf]  ;;  %v3292_v52 = vor.u32 %v3711_v45, %v3289_v46  ;;  %v2937_v58 = vld [vmem:[%s3840_s17 + $0x1d8] sm:$0xf0] }
  0x38   : > { %v3281_v50 = vld [vmem:[%s3840_s17 + $0x490] sm:$0xf0]  ;;  %v2927_v59 = vld [vmem:[%s3840_s17 + $0x70] sm:$0xf]  ;;  %v3713_v5 = vld [vmem:[%s3840_s17 + $0x34c] sm:$0xf] }
  0x39   : > { %v3666_v60 = vld [vmem:[%s3840_s17 + $0x1cc] sm:$0xf0]  ;;  %v3622_v61 = vld [vmem:[%s3840_s17 + $0x74] sm:$0xf]  ;;  %v3305_v6 = vld [vmem:[%s3840_s17 + $0x4a8] sm:$0xf0] }
  0x3a   : > { %v2929_v62 = vld [vmem:[%s3840_s17 + $0x1d0] sm:$0xf0]  ;;  %v2928_v1 = vor.u32 %v3666_v60, %v2927_v59  ;;  %v3295_v7 = vld [vmem:[%s3840_s17 + $0x340] sm:$0xf]  ;;  %v3712_v9 = vld [vmem:[%s3840_s17 + $0x344] sm:$0xf]  ;;  %v3308_v12 = vor.u32 %v3713_v5, %v3305_v6 }
  0x3b   : > { %v3297_v10 = vld [vmem:[%s3840_s17 + $0x4a0] sm:$0xf0]  ;;  %v2953_v18 = vld [vmem:[%s3840_s17 + $0x1e8] sm:$0xf0]  ;;  %v2943_v19 = vld [vmem:[%s3840_s17 + $0x80] sm:$0xf] }
  0x3c   : > { %3525 = vmatmul.msk.bf16.vlgmr.msra.gmra.mxu0 %vm1235_vm0, %v3860_v21  ;;  %3526 = vmatmul.msk.bf16.vlgmr.msra.gmra.mxu1 %vm1235_vm0, %v3860_v21  ;;  %v3668_v20 = vld [vmem:[%s3840_s17 + $0x1dc] sm:$0xf0]  ;;  %v3624_v22 = vld [vmem:[%s3840_s17 + $0x84] sm:$0xf]  ;;  %v3715_v30 = vld [vmem:[%s3840_s17 + $0x35c] sm:$0xf] }
  0x3d   : > { %3527 = vmatmul.msk.bf16.vlgmr.msra.gmra.mxu2 %vm1235_vm0, %v3860_v21  ;;  %1469 = vmatpush.bf16.msra.mxu0 %v3232_v44  ;;  %v3755_v44 = vld [vmem:[%s3840_s17 + $0x494] sm:$0xf0]  ;;  %v2945_v23 = vld [vmem:[%s3840_s17 + $0x1e0] sm:$0xf0]  ;;  %v2944_v26 = vor.u32 %v3668_v20, %v2943_v19  ;;  %v3321_v31 = vld [vmem:[%s3840_s17 + $0x4b8] sm:$0xf0] }
  0x3e   : > { %3528 = vmatmul.msk.bf16.vlgmr.msra.gmra.mxu3 %vm1235_vm0, %v3860_v21  ;;  %1497 = vmatpush.bf16.msra.mxu2 %v3240_v42  ;;  %v2916_v42 = vor.u32 %v3620_v37, %v2913_v38  ;;  %v3311_v32 = vld [vmem:[%s3840_s17 + $0x350] sm:$0xf]  ;;  %v3714_v34 = vld [vmem:[%s3840_s17 + $0x354] sm:$0xf]  ;;  %v3324_v37 = vor.u32 %v3715_v30, %v3321_v31  ;;  %v3716_v59 = vld [vmem:[%s3840_s17 + $0x364] sm:$0xf] }
  0x3f   : > { %1511 = vmatpush.bf16.msra.mxu3 %v3244_v43  ;;  %1483 = vmatpush.bf16.msra.mxu1 %v3236_v48  ;;  %v3287_v43 = vld [vmem:[%s3840_s17 + $0x338] sm:$0xf]  ;;  %v3754_v48 = vld [vmem:[%s3840_s17 + $0x48c] sm:$0xf0]  ;;  %v3313_v35 = vld [vmem:[%s3840_s17 + $0x4b0] sm:$0xf0] }
  0x40   : > { %v3288_v51 = vor.u32 %v3755_v44, %v3287_v43  ;;  %v3280_v53 = vor.u32 %v3754_v48, %v3279_v47  ;;  %v2969_v43 = vld [vmem:[%s3840_s17 + $0x1f8] sm:$0xf0]  ;;  %v2959_v44 = vld [vmem:[%s3840_s17 + $0x90] sm:$0xf]  ;;  %v3626_v46 = vld [vmem:[%s3840_s17 + $0x94] sm:$0xf] }
  0x41   : > { %1470 = vmatpush.bf16.msra.mxu0 %v2880_v56  ;;  %v3623_v56 = vld [vmem:[%s3840_s17 + $0x7c] sm:$0xf]  ;;  %v3670_v45 = vld [vmem:[%s3840_s17 + $0x1ec] sm:$0xf0]  ;;  %v2961_v47 = vld [vmem:[%s3840_s17 + $0x1f0] sm:$0xf0] }
  0x42   : > { %1498 = vmatpush.bf16.msra.mxu2 %v2888_v54  ;;  %v2935_v54 = vld [vmem:[%s3840_s17 + $0x78] sm:$0xf]  ;;  %v2940_v0 = vor.u32 %v3623_v56, %v2937_v58  ;;  %v3327_v56 = vld [vmem:[%s3840_s17 + $0x360] sm:$0xf]  ;;  %v3329_v60 = vld [vmem:[%s3840_s17 + $0x4c0] sm:$0xf0] }
  0x43   : > { %1512 = vmatpush.bf16.msra.mxu3 %v2892_v55  ;;  %1484 = vmatpush.bf16.msra.mxu1 %v2884_v57  ;;  %v3667_v55 = vld [vmem:[%s3840_s17 + $0x1d4] sm:$0xf0]  ;;  %v3284_v57 = vor.u32 %v3710_v49, %v3281_v50  ;;  %v2960_v50 = vor.u32 %v3670_v45, %v2959_v44  ;;  %v2985_v5 = vld [vmem:[%s3840_s17 + $0x208] sm:$0xf0]  ;;  %v2975_v6 = vld [vmem:[%s3840_s17 + $0xa0] sm:$0xf] }
  0x44   : > { %v2936_v63 = vor.u32 %v3667_v55, %v2935_v54  ;;  %v3717_v54 = vld [vmem:[%s3840_s17 + $0x36c] sm:$0xf]  ;;  %v3763_v19 = vld [vmem:[%s3840_s17 + $0x4d4] sm:$0xf0]  ;;  %v3719_v20 = vld [vmem:[%s3840_s17 + $0x37c] sm:$0xf] }
  0x45   : > { %v3337_v55 = vld [vmem:[%s3840_s17 + $0x4c8] sm:$0xf0] }
  0x4c   : > { %3529 = vmatmul.msk.bf16.vlgmr.msrb.gmra.mxu0 %vm1235_vm0, %v3860_v21  ;;  %3530 = vmatmul.msk.bf16.vlgmr.msrb.gmra.mxu1 %vm1235_vm0, %v3860_v21 }
  0x4d   : > { %3531 = vmatmul.msk.bf16.vlgmr.msrb.gmra.mxu2 %vm1235_vm0, %v3860_v21  ;;  %1525 = vmatpush.bf16.msrb.mxu0 %v3248_v4  ;;  %v3757_v4 = vld [vmem:[%s3840_s17 + $0x4a4] sm:$0xf0] }
  0x4e   : > { %3532 = vmatmul.msk.bf16.vlgmr.msrb.gmra.mxu3 %vm1235_vm0, %v3860_v21  ;;  %1553 = vmatpush.bf16.msrb.mxu2 %v3256_v2  ;;  %v2932_v2 = vor.u32 %v3622_v61, %v2929_v62 }
  0x4f   : > { %1567 = vmatpush.bf16.msrb.mxu3 %v3260_v3  ;;  %1539 = vmatpush.bf16.msrb.mxu1 %v3252_v8  ;;  %v3303_v3 = vld [vmem:[%s3840_s17 + $0x348] sm:$0xf]  ;;  %v3756_v8 = vld [vmem:[%s3840_s17 + $0x49c] sm:$0xf0] }
  0x50   : > { %v3304_v11 = vor.u32 %v3757_v4, %v3303_v3  ;;  %v3296_v13 = vor.u32 %v3756_v8, %v3295_v7  ;;  %v3629_v3 = vld [vmem:[%s3840_s17 + $0xac] sm:$0xf]  ;;  %v3332_v4 = vor.u32 %v3716_v59, %v3329_v60  ;;  %v3672_v7 = vld [vmem:[%s3840_s17 + $0x1fc] sm:$0xf0]  ;;  %v3628_v8 = vld [vmem:[%s3840_s17 + $0xa4] sm:$0xf] }
  0x51   : > { %1526 = vmatpush.bf16.msrb.mxu0 %v2896_v16  ;;  %v3625_v16 = vld [vmem:[%s3840_s17 + $0x8c] sm:$0xf] }
  0x52   : > { %1554 = vmatpush.bf16.msrb.mxu2 %v2904_v14  ;;  %v2951_v14 = vld [vmem:[%s3840_s17 + $0x88] sm:$0xf]  ;;  %v2956_v25 = vor.u32 %v3625_v16, %v2953_v18  ;;  %v3351_v18 = vld [vmem:[%s3840_s17 + $0x378] sm:$0xf] }
  0x53   : > { %1568 = vmatpush.bf16.msrb.mxu3 %v2908_v15  ;;  %1540 = vmatpush.bf16.msrb.mxu1 %v2900_v17  ;;  %v3669_v15 = vld [vmem:[%s3840_s17 + $0x1e4] sm:$0xf0]  ;;  %v3300_v17 = vor.u32 %v3712_v9, %v3297_v10  ;;  %v2977_v9 = vld [vmem:[%s3840_s17 + $0x200] sm:$0xf0]  ;;  %v3352_v31 = vor.u32 %v3763_v19, %v3351_v18 }
  0x54   : > { %v2952_v24 = vor.u32 %v3669_v15, %v2951_v14  ;;  %v2980_v14 = vor.u32 %v3628_v8, %v2977_v9  ;;  %v3017_v8 = vld [vmem:[%s3840_s17 + $0x228] sm:$0xf0]  ;;  %v3007_v9 = vld [vmem:[%s3840_s17 + $0xc0] sm:$0xf] }
  0x5c   : > { %3533 = vmatmul.msk.bf16.vlgmr.msra.gmra.mxu0 %vm1235_vm0, %v3860_v21  ;;  %3534 = vmatmul.msk.bf16.vlgmr.msra.gmra.mxu1 %vm1235_vm0, %v3860_v21 }
  0x5d   : > { %3535 = vmatmul.msk.bf16.vlgmr.msra.gmra.mxu2 %vm1235_vm0, %v3860_v21  ;;  %1581 = vmatpush.bf16.msra.mxu0 %v3264_v29  ;;  %v3759_v29 = vld [vmem:[%s3840_s17 + $0x4b4] sm:$0xf0] }
  0x5e   : > { %3536 = vmatmul.msk.bf16.vlgmr.msra.gmra.mxu3 %vm1235_vm0, %v3860_v21  ;;  %1609 = vmatpush.bf16.msra.mxu2 %v3272_v27  ;;  %v2948_v27 = vor.u32 %v3624_v22, %v2945_v23  ;;  %v3353_v23 = vld [vmem:[%s3840_s17 + $0x4d8] sm:$0xf0] }
  0x5f   : > { %1623 = vmatpush.bf16.msra.mxu3 %v3276_v28  ;;  %1595 = vmatpush.bf16.msra.mxu1 %v3268_v33  ;;  %v3319_v28 = vld [vmem:[%s3840_s17 + $0x358] sm:$0xf]  ;;  %v3758_v33 = vld [vmem:[%s3840_s17 + $0x4ac] sm:$0xf0] }
  0x60   : > { %v3320_v36 = vor.u32 %v3759_v29, %v3319_v28  ;;  %v3312_v38 = vor.u32 %v3758_v33, %v3311_v32  ;;  %v3718_v28 = vld [vmem:[%s3840_s17 + $0x374] sm:$0xf]  ;;  %v3356_v32 = vor.u32 %v3719_v20, %v3353_v23 }
  0x61   : > { %1582 = vmatpush.bf16.msra.mxu0 %v2912_v41  ;;  %v3627_v41 = vld [vmem:[%s3840_s17 + $0x9c] sm:$0xf]  ;;  %v3345_v29 = vld [vmem:[%s3840_s17 + $0x4d0] sm:$0xf0] }
  0x62   : > { %1610 = vmatpush.bf16.msra.mxu2 %v2920_v39  ;;  %v2967_v39 = vld [vmem:[%s3840_s17 + $0x98] sm:$0xf]  ;;  %v2972_v49 = vor.u32 %v3627_v41, %v2969_v43  ;;  %v3630_v41 = vld [vmem:[%s3840_s17 + $0xb4] sm:$0xf] }
  0x63   : > { %1624 = vmatpush.bf16.msra.mxu3 %v2924_v40  ;;  %1596 = vmatpush.bf16.msra.mxu1 %v2916_v42  ;;  %v3671_v40 = vld [vmem:[%s3840_s17 + $0x1f4] sm:$0xf0]  ;;  %v3316_v42 = vor.u32 %v3714_v34, %v3313_v35 }
  0x64   : > { %v2968_v48 = vor.u32 %v3671_v40, %v2967_v39  ;;  %v2999_v34 = vld [vmem:[%s3840_s17 + $0xb8] sm:$0xf]  ;;  %v2991_v39 = vld [vmem:[%s3840_s17 + $0xb0] sm:$0xf] }
  0x65   : > { %v3675_v35 = vld [vmem:[%s3840_s17 + $0x214] sm:$0xf0]  ;;  %v3674_v40 = vld [vmem:[%s3840_s17 + $0x20c] sm:$0xf0] }
  0x66   : > { %v3000_v43 = vor.u32 %v3675_v35, %v2999_v34  ;;  %v2992_v45 = vor.u32 %v3674_v40, %v2991_v39  ;;  %v3385_v34 = vld [vmem:[%s3840_s17 + $0x4f8] sm:$0xf0]  ;;  %v3375_v35 = vld [vmem:[%s3840_s17 + $0x390] sm:$0xf]  ;;  %v3722_v39 = vld [vmem:[%s3840_s17 + $0x394] sm:$0xf] }
  0x67   : > { %v3377_v40 = vld [vmem:[%s3840_s17 + $0x4f0] sm:$0xf0] }
  0x6c   : > { %3537 = vmatmul.msk.bf16.vlgmr.msrb.gmra.mxu0 %vm1235_vm0, %v3860_v21  ;;  %3538 = vmatmul.msk.bf16.vlgmr.msrb.gmra.mxu1 %vm1235_vm0, %v3860_v21 }
  0x6d   : > { %3539 = vmatmul.msk.bf16.vlgmr.msrb.gmra.mxu2 %vm1235_vm0, %v3860_v21  ;;  %1637 = vmatpush.bf16.msrb.mxu0 %v3280_v53  ;;  %v3761_v53 = vld [vmem:[%s3840_s17 + $0x4c4] sm:$0xf0] }
  0x6e   : > { %3540 = vmatmul.msk.bf16.vlgmr.msrb.gmra.mxu3 %vm1235_vm0, %v3860_v21  ;;  %1665 = vmatpush.bf16.msrb.mxu2 %v3288_v51  ;;  %v2964_v51 = vor.u32 %v3626_v46, %v2961_v47 }
  0x6f   : > { %1679 = vmatpush.bf16.msrb.mxu3 %v3292_v52  ;;  %1651 = vmatpush.bf16.msrb.mxu1 %v3284_v57  ;;  %v3335_v52 = vld [vmem:[%s3840_s17 + $0x368] sm:$0xf]  ;;  %v3760_v57 = vld [vmem:[%s3840_s17 + $0x4bc] sm:$0xf0] }
  0x70   : > { %v3336_v62 = vor.u32 %v3761_v53, %v3335_v52  ;;  %v3765_v52 = vld [vmem:[%s3840_s17 + $0x4e4] sm:$0xf0]  ;;  %v3721_v53 = vld [vmem:[%s3840_s17 + $0x38c] sm:$0xf] }
  0x71   : > { %1638 = vmatpush.bf16.msrb.mxu0 %v2928_v1  ;;  %v2983_v1 = vld [vmem:[%s3840_s17 + $0xa8] sm:$0xf] }
  0x72   : > { %1666 = vmatpush.bf16.msrb.mxu2 %v2936_v63  ;;  %v3340_v63 = vor.u32 %v3717_v54, %v3337_v55  ;;  %v3369_v55 = vld [vmem:[%s3840_s17 + $0x4e8] sm:$0xf0] }
  0x73   : > { %1680 = vmatpush.bf16.msrb.mxu3 %v2940_v0  ;;  %1652 = vmatpush.bf16.msrb.mxu1 %v2932_v2  ;;  %v3328_v0 = vor.u32 %v3760_v57, %v3327_v56  ;;  %v3673_v2 = vld [vmem:[%s3840_s17 + $0x204] sm:$0xf0]  ;;  %v3359_v56 = vld [vmem:[%s3840_s17 + $0x380] sm:$0xf] }
  0x74   : > { %v2984_v10 = vor.u32 %v3673_v2, %v2983_v1  ;;  %v3764_v57 = vld [vmem:[%s3840_s17 + $0x4dc] sm:$0xf0]  ;;  %v3372_v2 = vor.u32 %v3721_v53, %v3369_v55  ;;  %v3033_v53 = vld [vmem:[%s3840_s17 + $0x238] sm:$0xf0]  ;;  %v3023_v55 = vld [vmem:[%s3840_s17 + $0xd0] sm:$0xf] }
  0x7c   : > { %3541 = vmatmul.msk.bf16.vlgmr.msra.gmra.mxu0 %vm1235_vm0, %v3860_v21  ;;  %3542 = vmatmul.msk.bf16.vlgmr.msra.gmra.mxu1 %vm1235_vm0, %v3860_v21 }
  0x7d   : > { %3543 = vmatmul.msk.bf16.vlgmr.msra.gmra.mxu2 %vm1235_vm0, %v3860_v21  ;;  %1693 = vmatpush.bf16.msra.mxu0 %v3296_v13 }
  0x7e   : > { %3544 = vmatmul.msk.bf16.vlgmr.msra.gmra.mxu3 %vm1235_vm0, %v3860_v21  ;;  %1721 = vmatpush.bf16.msra.mxu2 %v3304_v11  ;;  %v2988_v11 = vor.u32 %v3629_v3, %v2985_v5  ;;  %v3360_v3 = vor.u32 %v3764_v57, %v3359_v56  ;;  %v3677_v5 = vld [vmem:[%s3840_s17 + $0x224] sm:$0xf0]  ;;  %v3678_v56 = vld [vmem:[%s3840_s17 + $0x22c] sm:$0xf0]  ;;  %v3634_v57 = vld [vmem:[%s3840_s17 + $0xd4] sm:$0xf] }
  0x7f   : > { %1735 = vmatpush.bf16.msra.mxu3 %v3308_v12  ;;  %1707 = vmatpush.bf16.msra.mxu1 %v3300_v17  ;;  %v2976_v12 = vor.u32 %v3672_v7, %v2975_v6  ;;  %v3633_v6 = vld [vmem:[%s3840_s17 + $0xcc] sm:$0xf] }
  0x80   : > { %v3020_v18 = vor.u32 %v3633_v6, %v3017_v8  ;;  %v3769_v8 = vld [vmem:[%s3840_s17 + $0x504] sm:$0xf0] }
  0x81   : > { %1694 = vmatpush.bf16.msra.mxu0 %v2944_v26 }
  0x82   : > { %1722 = vmatpush.bf16.msra.mxu2 %v2952_v24  ;;  %v3343_v24 = vld [vmem:[%s3840_s17 + $0x370] sm:$0xf] }
  0x83   : > { %1736 = vmatpush.bf16.msra.mxu3 %v2956_v25  ;;  %1708 = vmatpush.bf16.msra.mxu1 %v2948_v27  ;;  %v3762_v25 = vld [vmem:[%s3840_s17 + $0x4cc] sm:$0xf0] }
  0x84   : > { %v3344_v33 = vor.u32 %v3762_v25, %v3343_v24 }
  0x8c   : > { %3545 = vmatmul.msk.bf16.vlgmr.msrb.gmra.mxu0 %vm1235_vm0, %v3860_v21  ;;  %3546 = vmatmul.msk.bf16.vlgmr.msrb.gmra.mxu1 %vm1235_vm0, %v3860_v21 }
  0x8d   : > { %3547 = vmatmul.msk.bf16.vlgmr.msrb.gmra.mxu2 %vm1235_vm0, %v3860_v21  ;;  %1749 = vmatpush.bf16.msrb.mxu0 %v3312_v38  ;;  %v3001_v38 = vld [vmem:[%s3840_s17 + $0x218] sm:$0xf0] }
  0x8e   : > { %3548 = vmatmul.msk.bf16.vlgmr.msrb.gmra.mxu3 %vm1235_vm0, %v3860_v21  ;;  %1777 = vmatpush.bf16.msrb.mxu2 %v3320_v36  ;;  %v3631_v36 = vld [vmem:[%s3840_s17 + $0xbc] sm:$0xf] }
  0x8f   : > { %1791 = vmatpush.bf16.msrb.mxu3 %v3324_v37  ;;  %1763 = vmatpush.bf16.msrb.mxu1 %v3316_v42  ;;  %v3348_v37 = vor.u32 %v3718_v28, %v3345_v29  ;;  %v2993_v42 = vld [vmem:[%s3840_s17 + $0x210] sm:$0xf0]  ;;  %v3004_v44 = vor.u32 %v3631_v36, %v3001_v38  ;;  %v3383_v29 = vld [vmem:[%s3840_s17 + $0x398] sm:$0xf]  ;;  %v3766_v36 = vld [vmem:[%s3840_s17 + $0x4ec] sm:$0xf0] }
  0x90   : > { %v2996_v47 = vor.u32 %v3630_v41, %v2993_v42 }
  0x91   : > { %1750 = vmatpush.bf16.msrb.mxu0 %v2960_v50 }
  0x92   : > { %1778 = vmatpush.bf16.msrb.mxu2 %v2968_v48 }
  0x93   : > { %1792 = vmatpush.bf16.msrb.mxu3 %v2972_v49  ;;  %1764 = vmatpush.bf16.msrb.mxu1 %v2964_v51  ;;  %v3367_v51 = vld [vmem:[%s3840_s17 + $0x388] sm:$0xf] }
  0x94   : > { %v3368_v1 = vor.u32 %v3765_v52, %v3367_v51  ;;  %v3635_v51 = vld [vmem:[%s3840_s17 + $0xdc] sm:$0xf]  ;;  %v3380_v52 = vor.u32 %v3722_v39, %v3377_v40  ;;  %v3681_v39 = vld [vmem:[%s3840_s17 + $0x244] sm:$0xf0]  ;;  %v3637_v40 = vld [vmem:[%s3840_s17 + $0xec] sm:$0xf] }
  0x99   : > { %v4077_v58 = vpop.f32.mrf.mxu0  ;;  %v4081_v61 = vpop.f32.mrf.mxu1 }
  0x9c   : > { %3549 = vmatmul.msk.bf16.vlgmr.msra.gmra.mxu0 %vm1235_vm0, %v3860_v21  ;;  %3550 = vmatmul.msk.bf16.vlgmr.msra.gmra.mxu1 %vm1235_vm0, %v3860_v21 }
  0x9d   : > { %3551 = vmatmul.msk.bf16.vlgmr.msra.gmra.mxu2 %vm1235_vm0, %v3860_v21  ;;  %1805 = vmatpush.bf16.msra.mxu0 %v3328_v0 }
  0x9e   : > { %3552 = vmatmul.msk.bf16.vlgmr.msra.gmra.mxu3 %vm1235_vm0, %v3860_v21  ;;  %1833 = vmatpush.bf16.msra.mxu2 %v3336_v62  ;;  %v3720_v62 = vld [vmem:[%s3840_s17 + $0x384] sm:$0xf] }
  0x9f   : > { %1847 = vmatpush.bf16.msra.mxu3 %v3340_v63  ;;  %1819 = vmatpush.bf16.msra.mxu1 %v3332_v4  ;;  %v3361_v63 = vld [vmem:[%s3840_s17 + $0x4e0] sm:$0xf0]  ;;  %v3015_v4 = vld [vmem:[%s3840_s17 + $0xc8] sm:$0xf] }
  0xa0   : > { %v4099_v13 = vpop.f32.mrf.mxu2  ;;  %v3364_v7 = vor.u32 %v3720_v62, %v3361_v63  ;;  %v3025_v62 = vld [vmem:[%s3840_s17 + $0x230] sm:$0xf0] }
  0xa1   : > { %v4101_v15 = vpop.f32.mrf.mxu3  ;;  %v4103_v16 = vpop.f32.mrf.mxu0  ;;  %1806 = vmatpush.bf16.msra.mxu0 %v2976_v12  ;;  %v3009_v12 = vld [vmem:[%s3840_s17 + $0x220] sm:$0xf0] }
  0xa2   : > { %v4105_v17 = vpop.f32.mrf.mxu1  ;;  %1834 = vmatpush.bf16.msra.mxu2 %v2984_v10  ;;  %v3676_v10 = vld [vmem:[%s3840_s17 + $0x21c] sm:$0xf0] }
  0xa3   : > { %1848 = vmatpush.bf16.msra.mxu3 %v2988_v11  ;;  %1820 = vmatpush.bf16.msra.mxu1 %v2980_v14  ;;  %v3632_v11 = vld [vmem:[%s3840_s17 + $0xc4] sm:$0xf]  ;;  %v3016_v14 = vor.u32 %v3677_v5, %v3015_v4  ;;  %v3008_v19 = vor.u32 %v3676_v10, %v3007_v9  ;;  %v3028_v4 = vor.u32 %v3634_v57, %v3025_v62  ;;  %v3725_v9 = vld [vmem:[%s3840_s17 + $0x3ac] sm:$0xf] }
  0xa4   : > { %v3012_v23 = vor.u32 %v3632_v11, %v3009_v12  ;;  %v3401_v11 = vld [vmem:[%s3840_s17 + $0x508] sm:$0xf0]  ;;  %v3391_v12 = vld [vmem:[%s3840_s17 + $0x3a0] sm:$0xf] }
  0xa8   : > { %v4110_v22 = vpop.f32.mrf.mxu2 }
  0xa9   : > { %v4115_v26 = vpop.f32.mrf.mxu3  ;;  %v4117_v27 = vpop.f32.mrf.mxu0 }
  0xaa   : > { %v4121_v30 = vpop.f32.mrf.mxu1 }
  0xac   : > { %3553 = vmatmul.msk.bf16.vlgmr.msrb.gmra.mxu0 %vm1235_vm0, %v3860_v21  ;;  %3554 = vmatmul.msk.bf16.vlgmr.msrb.gmra.mxu1 %vm1235_vm0, %v3860_v21 }
  0xad   : > { %3555 = vmatmul.msk.bf16.vlgmr.msrb.gmra.mxu2 %vm1235_vm0, %v3860_v21  ;;  %1861 = vmatpush.bf16.msrb.mxu0 %v3344_v33 }
  0xae   : > { %3556 = vmatmul.msk.bf16.vlgmr.msrb.gmra.mxu3 %vm1235_vm0, %v3860_v21  ;;  %1889 = vmatpush.bf16.msrb.mxu2 %v3352_v31  ;;  %v3767_v31 = vld [vmem:[%s3840_s17 + $0x4f4] sm:$0xf0] }
  0xaf   : > { %1903 = vmatpush.bf16.msrb.mxu3 %v3356_v32  ;;  %1875 = vmatpush.bf16.msrb.mxu1 %v3348_v37  ;;  %v3723_v32 = vld [vmem:[%s3840_s17 + $0x39c] sm:$0xf]  ;;  %v3384_v42 = vor.u32 %v3767_v31, %v3383_v29  ;;  %v3393_v29 = vld [vmem:[%s3840_s17 + $0x500] sm:$0xf0] }
  0xb0   : > { %v4139_v46 = vpop.f32.mrf.mxu2 }
  0xb1   : > { %v4141_v48 = vpop.f32.mrf.mxu3  ;;  %v4143_v49 = vpop.f32.mrf.mxu0  ;;  %1862 = vmatpush.bf16.msrb.mxu0 %v2992_v45  ;;  %v3031_v45 = vld [vmem:[%s3840_s17 + $0xd8] sm:$0xf] }
  0xb2   : > { %v4145_v50 = vpop.f32.mrf.mxu1  ;;  %1890 = vmatpush.bf16.msrb.mxu2 %v3000_v43  ;;  %v3388_v43 = vor.u32 %v3723_v32, %v3385_v34  ;;  %v3404_v34 = vor.u32 %v3725_v9, %v3401_v11  ;;  %v3417_v11 = vld [vmem:[%s3840_s17 + $0x518] sm:$0xf0] }
  0xb3   : > { %1904 = vmatpush.bf16.msrb.mxu3 %v3004_v44  ;;  %1876 = vmatpush.bf16.msrb.mxu1 %v2996_v47  ;;  %v3376_v44 = vor.u32 %v3766_v36, %v3375_v35  ;;  %v3679_v47 = vld [vmem:[%s3840_s17 + $0x234] sm:$0xf0]  ;;  %v3047_v36 = vld [vmem:[%s3840_s17 + $0xe8] sm:$0xf] }
  0xb4   : > { %v3032_v63 = vor.u32 %v3679_v47, %v3031_v45  ;;  %v3039_v45 = vld [vmem:[%s3840_s17 + $0xe0] sm:$0xf] }
  0xb5   : > { %v3680_v47 = vld [vmem:[%s3840_s17 + $0x23c] sm:$0xf0] }
  0xb8   : > { %v4150_v54 = vpop.f32.mrf.mxu2 }
  0xb9   : > { %v4155_v59 = vpop.f32.mrf.mxu3  ;;  %v4157_v60 = vpop.f32.mrf.mxu0 }
  0xba   : > { %4865 = vst [vmem:[#allocation2_spill] sm:$0xff] %v4155_v59  ;;  %v4161_v0 = vpop.f32.mrf.mxu1 }
  0xbc   : > { %3557 = vmatmul.msk.bf16.vlgmr.msra.gmra.mxu0 %vm1235_vm0, %v3860_v21  ;;  %3558 = vmatmul.msk.bf16.vlgmr.msra.gmra.mxu1 %vm1235_vm0, %v3860_v21 }
  0xbd   : > { %3559 = vmatmul.msk.bf16.vlgmr.msra.gmra.mxu2 %vm1235_vm0, %v3860_v21  ;;  %1917 = vmatpush.bf16.msra.mxu0 %v3360_v3 }
  0xbe   : > { %3560 = vmatmul.msk.bf16.vlgmr.msra.gmra.mxu3 %vm1235_vm0, %v3860_v21  ;;  %1945 = vmatpush.bf16.msra.mxu2 %v3368_v1  ;;  %v3036_v1 = vor.u32 %v3635_v51, %v3033_v53  ;;  %v3636_v51 = vld [vmem:[%s3840_s17 + $0xe4] sm:$0xf]  ;;  %v3048_v53 = vor.u32 %v3681_v39, %v3047_v36 }
  0xbf   : > { %1959 = vmatpush.bf16.msra.mxu3 %v3372_v2  ;;  %1931 = vmatpush.bf16.msra.mxu1 %v3364_v7  ;;  %v3024_v2 = vor.u32 %v3678_v56, %v3023_v55  ;;  %v3399_v7 = vld [vmem:[%s3840_s17 + $0x3a8] sm:$0xf]  ;;  %v3040_v56 = vor.u32 %v3680_v47, %v3039_v45  ;;  %v3639_v45 = vld [vmem:[%s3840_s17 + $0xfc] sm:$0xf] }
  0xc0   : > { %v4179_v20 = vpop.f32.mrf.mxu2  ;;  %v3400_v32 = vor.u32 %v3769_v8, %v3399_v7  ;;  %v3771_v7 = vld [vmem:[%s3840_s17 + $0x514] sm:$0xf0]  ;;  %v3727_v8 = vld [vmem:[%s3840_s17 + $0x3bc] sm:$0xf] }
  0xc1   : > { %4866 = vst [vmem:[#allocation3_spill] sm:$0xff] %v4179_v20  ;;  %v4181_v24 = vpop.f32.mrf.mxu3  ;;  %v4183_v25 = vpop.f32.mrf.mxu0  ;;  %1918 = vmatpush.bf16.msra.mxu0 %v3008_v19  ;;  %v3420_v39 = vor.u32 %v3727_v8, %v3417_v11 }
  0xc2   : > { %4867 = vst [vmem:[#allocation4_spill] sm:$0xff] %v4181_v24  ;;  %v4185_v28 = vpop.f32.mrf.mxu1  ;;  %1946 = vmatpush.bf16.msra.mxu2 %v3016_v14  ;;  %v3768_v14 = vld [vmem:[%s3840_s17 + $0x4fc] sm:$0xf0]  ;;  %v3690_v24 = vld [vmem:[%s3840_s17 + $0x28c] sm:$0xf0] }
  0xc3   : > { %4868 = vst [vmem:[#allocation5_spill] sm:$0xff] %v4183_v25  ;;  %1960 = vmatpush.bf16.msra.mxu3 %v3020_v18  ;;  %1932 = vmatpush.bf16.msra.mxu1 %v3012_v23  ;;  %v3724_v23 = vld [vmem:[%s3840_s17 + $0x3a4] sm:$0xf]  ;;  %v3392_v35 = vor.u32 %v3768_v14, %v3391_v12  ;;  %v3407_v12 = vld [vmem:[%s3840_s17 + $0x3b0] sm:$0xf] }
  0xc4   : > { %4869 = vst [vmem:[#allocation6_spill] sm:$0xff] %v4185_v28  ;;  %v3770_v14 = vld [vmem:[%s3840_s17 + $0x50c] sm:$0xf0] }
  0xc8   : > { %v4190_v33 = vpop.f32.mrf.mxu2 }
  0xc9   : > { %4870 = vst [vmem:[#allocation7_spill] sm:$0xff] %v4190_v33  ;;  %v4195_v37 = vpop.f32.mrf.mxu3  ;;  %v4197_v38 = vpop.f32.mrf.mxu0  ;;  %v3113_v33 = vld [vmem:[%s3840_s17 + $0x288] sm:$0xf0] }
  0xca   : > { %4871 = vst [vmem:[#allocation8_spill] sm:$0xff] %v4195_v37  ;;  %v4201_v41 = vpop.f32.mrf.mxu1 }
  0xcb   : > { %4872 = vst [vmem:[#allocation9_spill] sm:$0xff] %v4197_v38  ;;  %v3688_v38 = vld [vmem:[%s3840_s17 + $0x27c] sm:$0xf0] }
  0xcc   : > { %4873 = vst [vmem:[#allocation10_spill] sm:$0xff] %v4201_v41  ;;  %3561 = vmatmul.msk.bf16.vlgmr.msrb.gmra.mxu0 %vm1235_vm0, %v3860_v21  ;;  %3562 = vmatmul.msk.bf16.vlgmr.msrb.gmra.mxu1 %vm1235_vm0, %v3860_v21  ;;  %v3103_v41 = vld [vmem:[%s3840_s17 + $0x120] sm:$0xf] }
  0xcd   : > { %3563 = vmatmul.msk.bf16.vlgmr.msrb.gmra.mxu2 %vm1235_vm0, %v3860_v21  ;;  %1973 = vmatpush.bf16.msrb.mxu0 %v3376_v44  ;;  %v3049_v44 = vld [vmem:[%s3840_s17 + $0x248] sm:$0xf0] }
  0xce   : > { %3564 = vmatmul.msk.bf16.vlgmr.msrb.gmra.mxu3 %vm1235_vm0, %v3860_v21  ;;  %2001 = vmatpush.bf16.msrb.mxu2 %v3384_v42  ;;  %v4249_v42 = vld [vmem:[%s4862_s1] sm:$0xff]  ;;  %v3052_v55 = vor.u32 %v3637_v40, %v3049_v44  ;;  %v3408_v40 = vor.u32 %v3770_v14, %v3407_v12  ;;  %v3683_v44 = vld [vmem:[%s3840_s17 + $0x254] sm:$0xf0] }
  0xcf   : > { %2015 = vmatpush.bf16.msrb.mxu3 %v3388_v43  ;;  %1987 = vmatpush.bf16.msrb.mxu1 %v3380_v52  ;;  %v3396_v43 = vor.u32 %v3724_v23, %v3393_v29  ;;  %v3041_v52 = vld [vmem:[%s3840_s17 + $0x240] sm:$0xf0] }
  0xd0   : > { %v4219_v3 = vpop.f32.mrf.mxu2  ;;  %v3044_v62 = vor.u32 %v3636_v51, %v3041_v52  ;;  %v3065_v51 = vld [vmem:[%s3840_s17 + $0x258] sm:$0xf0]  ;;  %v3055_v52 = vld [vmem:[%s3840_s17 + $0xf0] sm:$0xf] }
  0xd1   : > { %4874 = vst [vmem:[#allocation11_spill] sm:$0xff] %v4219_v3  ;;  %v4221_v5 = vpop.f32.mrf.mxu3  ;;  %v4223_v21 = vpop.f32.mrf.mxu0  ;;  %1974 = vmatpush.bf16.msrb.mxu0 %v3024_v2  ;;  %v3111_v3 = vld [vmem:[%s3840_s17 + $0x128] sm:$0xf] }
  0xd2   : > { %4875 = vst [vmem:[#allocation12_spill] sm:$0xff] %v4221_v5  ;;  %v4225_v6 = vpop.f32.mrf.mxu1  ;;  %2002 = vmatpush.bf16.msrb.mxu2 %v3032_v63 }
  0xd3   : > { %4876 = vst [vmem:[#allocation13_spill] sm:$0xff] %v4223_v21  ;;  %2016 = vmatpush.bf16.msrb.mxu3 %v3036_v1  ;;  %1988 = vmatpush.bf16.msrb.mxu1 %v3028_v4  ;;  %v3415_v4 = vld [vmem:[%s3840_s17 + $0x3b8] sm:$0xf]  ;;  %v3645_v21 = vld [vmem:[%s3840_s17 + $0x12c] sm:$0xf] }
  0xd4   : > { %4877 = vst [vmem:[#allocation14_spill] sm:$0xff] %v4225_v6  ;;  %v3416_v36 = vor.u32 %v3771_v7, %v3415_v4  ;;  %v3068_v4 = vor.u32 %v3639_v45, %v3065_v51  ;;  %v3772_v45 = vld [vmem:[%s3840_s17 + $0x51c] sm:$0xf0]  ;;  %v3689_v6 = vld [vmem:[%s3840_s17 + $0x284] sm:$0xf0] }
  0xd8   : > { %v4230_v10 = vpop.f32.mrf.mxu2 }
  0xd9   : > { %4878 = vst [vmem:[#allocation15_spill] sm:$0xff] %v4230_v10  ;;  %v4235_v18 = vpop.f32.mrf.mxu3  ;;  %v4237_v19 = vpop.f32.mrf.mxu0  ;;  %v3087_v10 = vld [vmem:[%s3840_s17 + $0x110] sm:$0xf] }
  0xda   : > { %4879 = vst [vmem:[#allocation16_spill] sm:$0xff] %v4235_v18  ;;  %v4241_v31 = vpop.f32.mrf.mxu1  ;;  %v3097_v18 = vld [vmem:[%s3840_s17 + $0x278] sm:$0xf0] }
  0xdb   : > { %4880 = vst [vmem:[#allocation17_spill] sm:$0xff] %v4237_v19  ;;  %v3642_v19 = vld [vmem:[%s3840_s17 + $0x114] sm:$0xf] }
  0xdc   : > { %4881 = vst [vmem:[#allocation18_spill] sm:$0xff] %v4241_v31  ;;  %3565 = vmatmul.msk.bf16.vlgmr.msra.gmra.mxu0 %vm1235_vm0, %v4249_v42  ;;  %3566 = vmatmul.msk.bf16.vlgmr.msra.gmra.mxu1 %vm1235_vm0, %v4249_v42  ;;  %v3686_v31 = vld [vmem:[%s3840_s17 + $0x26c] sm:$0xf0] }
  0xdd   : > { %3567 = vmatmul.msk.bf16.vlgmr.msra.gmra.mxu2 %vm1235_vm0, %v4249_v42  ;;  %2029 = vmatpush.bf16.msra.mxu0 %v3392_v35 }
  0xde   : > { %3568 = vmatmul.msk.bf16.vlgmr.msra.gmra.mxu3 %vm1235_vm0, %v4249_v42  ;;  %2057 = vmatpush.bf16.msra.mxu2 %v3400_v32  ;;  %v3726_v32 = vld [vmem:[%s3840_s17 + $0x3b4] sm:$0xf] }
  0xdf   : > { %2071 = vmatpush.bf16.msra.mxu3 %v3404_v34  ;;  %2043 = vmatpush.bf16.msra.mxu1 %v3396_v43  ;;  %v3409_v34 = vld [vmem:[%s3840_s17 + $0x510] sm:$0xf0]  ;;  %v3063_v43 = vld [vmem:[%s3840_s17 + $0xf8] sm:$0xf] }
  0xe0   : > { %v4264_v57 = vpop.f32.mrf.mxu2  ;;  %v3412_v47 = vor.u32 %v3726_v32, %v3409_v34  ;;  %v3431_v34 = vld [vmem:[%s3840_s17 + $0x3c8] sm:$0xf] }
  0xe1   : > { %4882 = vst [vmem:[#allocation19_spill] sm:$0xff] %v4264_v57  ;;  %v4266_v63 = vpop.f32.mrf.mxu3  ;;  %v4268_v1 = vpop.f32.mrf.mxu0  ;;  %2030 = vmatpush.bf16.msra.mxu0 %v3040_v56  ;;  %v3057_v56 = vld [vmem:[%s3840_s17 + $0x250] sm:$0xf0]  ;;  %v3687_v57 = vld [vmem:[%s3840_s17 + $0x274] sm:$0xf0] }
  0xe2   : > { %4883 = vst [vmem:[#allocation20_spill] sm:$0xff] %v4266_v63  ;;  %v4270_v2 = vpop.f32.mrf.mxu1  ;;  %2058 = vmatpush.bf16.msra.mxu2 %v3048_v53  ;;  %v3682_v53 = vld [vmem:[%s3840_s17 + $0x24c] sm:$0xf0]  ;;  %v3095_v63 = vld [vmem:[%s3840_s17 + $0x118] sm:$0xf] }
  0xe3   : > { %4884 = vst [vmem:[#allocation21_spill] sm:$0xff] %v4268_v1  ;;  %2072 = vmatpush.bf16.msra.mxu3 %v3052_v55  ;;  %2044 = vmatpush.bf16.msra.mxu1 %v3044_v62  ;;  %v3638_v55 = vld [vmem:[%s3840_s17 + $0xf4] sm:$0xf]  ;;  %v3064_v62 = vor.u32 %v3683_v44, %v3063_v43  ;;  %v3056_v7 = vor.u32 %v3682_v53, %v3055_v52  ;;  %v3433_v43 = vld [vmem:[%s3840_s17 + $0x528] sm:$0xf0] }
  0xe4   : > { %4885 = vst [vmem:[#allocation22_spill] sm:$0xff] %v4270_v2  ;;  %v3060_v11 = vor.u32 %v3638_v55, %v3057_v56  ;;  %v3423_v44 = vld [vmem:[%s3840_s17 + $0x3c0] sm:$0xf]  ;;  %v3728_v52 = vld [vmem:[%s3840_s17 + $0x3c4] sm:$0xf] }
  0xe5   : > { %v3425_v53 = vld [vmem:[%s3840_s17 + $0x520] sm:$0xf0]  ;;  %v3643_v2 = vld [vmem:[%s3840_s17 + $0x11c] sm:$0xf] }
  0xe8   : > { %v4275_v9 = vpop.f32.mrf.mxu2 }
  0xe9   : > { %4886 = vst [vmem:[#allocation23_spill] sm:$0xff] %v4275_v9  ;;  %v4280_v23 = vpop.f32.mrf.mxu3  ;;  %v4282_v29 = vpop.f32.mrf.mxu0  ;;  %v3071_v9 = vld [vmem:[%s3840_s17 + $0x100] sm:$0xf] }
  0xea   : > { %4887 = vst [vmem:[#allocation24_spill] sm:$0xff] %v4280_v23  ;;  %v4286_v35 = vpop.f32.mrf.mxu1  ;;  %v3081_v23 = vld [vmem:[%s3840_s17 + $0x268] sm:$0xf0] }
  0xeb   : > { %4888 = vst [vmem:[#allocation25_spill] sm:$0xff] %v4282_v29  ;;  %v3640_v29 = vld [vmem:[%s3840_s17 + $0x104] sm:$0xf] }
  0xec   : > { %4889 = vst [vmem:[#allocation26_spill] sm:$0xff] %v4286_v35  ;;  %3569 = vmatmul.msk.bf16.vlgmr.msrb.gmra.mxu0 %vm1235_vm0, %v4249_v42  ;;  %3570 = vmatmul.msk.bf16.vlgmr.msrb.gmra.mxu1 %vm1235_vm0, %v4249_v42  ;;  %v3684_v35 = vld [vmem:[%s3840_s17 + $0x25c] sm:$0xf0] }
  0xed   : > { %3571 = vmatmul.msk.bf16.vlgmr.msrb.gmra.mxu2 %vm1235_vm0, %v4249_v42  ;;  %2085 = vmatpush.bf16.msrb.mxu0 %v3408_v40 }
  0xee   : > { %3572 = vmatmul.msk.bf16.vlgmr.msrb.gmra.mxu3 %vm1235_vm0, %v4249_v42  ;;  %2113 = vmatpush.bf16.msrb.mxu2 %v3416_v36  ;;  %v3773_v36 = vld [vmem:[%s3840_s17 + $0x524] sm:$0xf0] }
  0xef   : > { %2127 = vmatpush.bf16.msrb.mxu3 %v3420_v39  ;;  %2099 = vmatpush.bf16.msrb.mxu1 %v3412_v47  ;;  %v3729_v39 = vld [vmem:[%s3840_s17 + $0x3cc] sm:$0xf]  ;;  %v3432_v56 = vor.u32 %v3773_v36, %v3431_v34  ;;  %v3073_v34 = vld [vmem:[%s3840_s17 + $0x260] sm:$0xf0] }
  0xf0   : > { %v4304_v8 = vpop.f32.mrf.mxu2 }
  0xf1   : > { %v4306_v12 = vpop.f32.mrf.mxu3  ;;  %v4308_v14 = vpop.f32.mrf.mxu0  ;;  %2086 = vmatpush.bf16.msrb.mxu0 %v3056_v7  ;;  %v3079_v7 = vld [vmem:[%s3840_s17 + $0x108] sm:$0xf] }
  0xf2   : > { %4890 = vst [vmem:[#allocation27_spill] sm:$0xff] %v4308_v14  ;;  %v4310_v32 = vpop.f32.mrf.mxu1  ;;  %2114 = vmatpush.bf16.msrb.mxu2 %v3064_v62  ;;  %v3436_v62 = vor.u32 %v3729_v39, %v3433_v43  ;;  %v3428_v14 = vor.u32 %v3728_v52, %v3425_v53  ;;  %v3072_v43 = vor.u32 %v3684_v35, %v3071_v9  ;;  %v3447_v9 = vld [vmem:[%s3840_s17 + $0x3d8] sm:$0xf]  ;;  %v3731_v35 = vld [vmem:[%s3840_s17 + $0x3dc] sm:$0xf] }
  0xf3   : > { %4891 = vst [vmem:[#allocation28_spill] sm:$0xff] %v4310_v32  ;;  %2128 = vmatpush.bf16.msrb.mxu3 %v3068_v4  ;;  %2100 = vmatpush.bf16.msrb.mxu1 %v3060_v11  ;;  %v3424_v4 = vor.u32 %v3772_v45, %v3423_v44  ;;  %v3685_v11 = vld [vmem:[%s3840_s17 + $0x264] sm:$0xf0]  ;;  %v3641_v32 = vld [vmem:[%s3840_s17 + $0x10c] sm:$0xf]  ;;  %v3076_v45 = vor.u32 %v3640_v29, %v3073_v34 }
  0xf4   : > { %v3080_v36 = vor.u32 %v3685_v11, %v3079_v7  ;;  %v3084_v39 = vor.u32 %v3641_v32, %v3081_v23  ;;  %v3775_v23 = vld [vmem:[%s3840_s17 + $0x534] sm:$0xf0]  ;;  %v3449_v29 = vld [vmem:[%s3840_s17 + $0x538] sm:$0xf0]  ;;  %v3439_v32 = vld [vmem:[%s3840_s17 + $0x3d0] sm:$0xf] }
  0xf5   : > { %v3730_v11 = vld [vmem:[%s3840_s17 + $0x3d4] sm:$0xf] }
  0xf6   : > { %v3441_v34 = vld [vmem:[%s3840_s17 + $0x530] sm:$0xf0] }
  0xf7   : > { %v3444_v1 = vor.u32 %v3730_v11, %v3441_v34 }
  0xf8   : > { %v4315_v40 = vpop.f32.mrf.mxu2 }
  0xf9   : > { %v4320_v47 = vpop.f32.mrf.mxu3  ;;  %v4322_v51 = vpop.f32.mrf.mxu0 }
  0xfa   : > { %v4326_v55 = vpop.f32.mrf.mxu1 }
  0xfc   : > { %3573 = vmatmul.msk.bf16.vlgmr.msra.gmra.mxu0 %vm1235_vm0, %v4249_v42  ;;  %3574 = vmatmul.msk.bf16.vlgmr.msra.gmra.mxu1 %vm1235_vm0, %v4249_v42 }
  0xfd   : > { %3575 = vmatmul.msk.bf16.vlgmr.msra.gmra.mxu2 %vm1235_vm0, %v4249_v42  ;;  %2141 = vmatpush.bf16.msra.mxu0 %v3424_v4 }
  0xfe   : > { %3576 = vmatmul.msk.bf16.vlgmr.msra.gmra.mxu3 %vm1235_vm0, %v4249_v42  ;;  %2169 = vmatpush.bf16.msra.mxu2 %v3432_v56 }
  0xff   : > { %2183 = vmatpush.bf16.msra.mxu3 %v3436_v62  ;;  %2155 = vmatpush.bf16.msra.mxu1 %v3428_v14  ;;  %v3774_v62 = vld [vmem:[%s3840_s17 + $0x52c] sm:$0xf0] }
 0x100   : > { %v4344_v44 = vpop.f32.mrf.mxu2 }
 0x101   : > { %v4346_v52 = vpop.f32.mrf.mxu3  ;;  %v4348_v53 = vpop.f32.mrf.mxu0  ;;  %2142 = vmatpush.bf16.msra.mxu0 %v3072_v43  ;;  %v3452_v43 = vor.u32 %v3731_v35, %v3449_v29  ;;  %v3100_v35 = vor.u32 %v3643_v2, %v3097_v18  ;;  %v3088_v29 = vor.u32 %v3686_v31, %v3087_v10  ;;  %v2603_v10 = vld [vmem:[%s4863_s2] sm:$0xff]  ;;  %v3463_v18 = vld [vmem:[%s3840_s17 + $0x3e8] sm:$0xf]  ;;  %v3733_v31 = vld [vmem:[%s3840_s17 + $0x3ec] sm:$0xf] }
 0x102   : > { %v4350_v56 = vpop.f32.mrf.mxu1  ;;  %2170 = vmatpush.bf16.msra.mxu2 %v3080_v36  ;;  %v3455_v2 = vld [vmem:[%s3840_s17 + $0x3e0] sm:$0xf] }
 0x103   : > { %2184 = vmatpush.bf16.msra.mxu3 %v3084_v39  ;;  %2156 = vmatpush.bf16.msra.mxu1 %v3076_v45  ;;  %v3448_v39 = vor.u32 %v3775_v23, %v3447_v9  ;;  %v3440_v45 = vor.u32 %v3774_v62, %v3439_v32  ;;  %v3089_v9 = vld [vmem:[%s3840_s17 + $0x270] sm:$0xf0]  ;;  %v3096_v23 = vor.u32 %v3687_v57, %v3095_v63  ;;  %v3805_v57 = vmov 0  }
 0x104   : > { %v3092_v62 = vor.u32 %v3642_v19, %v3089_v9  ;;  %3795 = vset.pattern.permute.xlu0 %v3805_v57  ;;  %v3777_v19 = vld [vmem:[%s3840_s17 + $0x544] sm:$0xf0] }
 0x105   : > { %2607 = vperm.xlu0 %3795, %v2603_v10   ;;  %v2604_v57 = vld [vmem:[%s4863_s2 + $0x8] sm:$0xff] }
 0x108   : > { %v4355_v14 = vpop.f32.mrf.mxu2 }
 0x109   : > { %v4360_v4 = vpop.f32.mrf.mxu3  ;;  %v4362_v7 = vpop.f32.mrf.mxu0 }
 0x10a   : > { %v4366_v36 = vpop.f32.mrf.mxu1 }
 0x10c   : > { %3577 = vmatmul.msk.bf16.vlgmr.msrb.gmra.mxu0 %vm1235_vm0, %v4249_v42  ;;  %3578 = vmatmul.msk.bf16.vlgmr.msrb.gmra.mxu1 %vm1235_vm0, %v4249_v42 }
 0x10d   : > { %3579 = vmatmul.msk.bf16.vlgmr.msrb.gmra.mxu2 %vm1235_vm0, %v4249_v42  ;;  %2197 = vmatpush.bf16.msrb.mxu0 %v3440_v45 }
 0x10e   : > { %3580 = vmatmul.msk.bf16.vlgmr.msrb.gmra.mxu3 %vm1235_vm0, %v4249_v42  ;;  %2225 = vmatpush.bf16.msrb.mxu2 %v3448_v39 }
 0x10f   : > { %2239 = vmatpush.bf16.msrb.mxu3 %v3452_v43  ;;  %2211 = vmatpush.bf16.msrb.mxu1 %v3444_v1  ;;  %v3465_v1 = vld [vmem:[%s3840_s17 + $0x548] sm:$0xf0]  ;;  %v3776_v43 = vld [vmem:[%s3840_s17 + $0x53c] sm:$0xf0] }
 0x110   : > { %v4384_v32 = vpop.f32.mrf.mxu2  ;;  %v3468_v10 = vor.u32 %v3733_v31, %v3465_v1  ;;  %v3456_v5 = vor.u32 %v3776_v43, %v3455_v2  ;;  %2612 = vperm.xlu0 %3795, %v2604_v57   ;;  %v3112_v31 = vor.u32 %v3689_v6, %v3111_v3  ;;  %v3116_v1 = vor.u32 %v3645_v21, %v3113_v33  ;;  %v3479_v33 = vld [vmem:[%s3840_s17 + $0x3f8] sm:$0xf]  ;;  %v3471_v21 = vld [vmem:[%s3840_s17 + $0x3f0] sm:$0xf] }
 0x111   : > { %v4386_v11 = vpop.f32.mrf.mxu3  ;;  %v4388_v34 = vpop.f32.mrf.mxu0  ;;  %2198 = vmatpush.bf16.msrb.mxu0 %v3088_v29  ;;  %v3104_v2 = vor.u32 %v3688_v38, %v3103_v41  ;;  %v3779_v38 = vld [vmem:[%s3840_s17 + $0x554] sm:$0xf0]  ;;  %v3735_v41 = vld [vmem:[%s3840_s17 + $0x3fc] sm:$0xf]  ;;  %v3778_v6 = vld [vmem:[%s3840_s17 + $0x54c] sm:$0xf0] }
 0x112   : > { %v4390_v39 = vpop.f32.mrf.mxu1  ;;  %2226 = vmatpush.bf16.msrb.mxu2 %v3096_v23  ;;  %v3732_v23 = vld [vmem:[%s3840_s17 + $0x3e4] sm:$0xf] }
 0x113   : > { %4892 = vst [vmem:[#allocation29_spill] sm:$0xff] %v4390_v39  ;;  %2240 = vmatpush.bf16.msrb.mxu3 %v3100_v35  ;;  %2212 = vmatpush.bf16.msrb.mxu1 %v3092_v62  ;;  %v3457_v35 = vld [vmem:[%s3840_s17 + $0x540] sm:$0xf0]  ;;  %v3464_v62 = vor.u32 %v3777_v19, %v3463_v18 }
 0x114   : > { %v3460_v37 = vor.u32 %v3732_v23, %v3457_v35  ;;  %v3644_v18 = vld [vmem:[%s3840_s17 + $0x124] sm:$0xf] }
 0x115   : > { %v3105_v19 = vld [vmem:[%s3840_s17 + $0x280] sm:$0xf0] }
 0x116   : > { %v3108_v23 = vor.u32 %v3644_v18, %v3105_v19  ;;  %v3734_v18 = vld [vmem:[%s3840_s17 + $0x3f4] sm:$0xf] }
 0x117   : > { %v3473_v19 = vld [vmem:[%s3840_s17 + $0x550] sm:$0xf0] }
 0x118   : > { %v4398_v63 = vpop.f32.mrf.mxu2 }
 0x119   : > { %4893 = vst [vmem:[#allocation30_spill] sm:$0xff] %v4398_v63  ;;  %v4403_v45 = vpop.f32.mrf.mxu3  ;;  %v4405_v9 = vpop.f32.mrf.mxu0 }
 0x11a   : > { %4894 = vst [vmem:[#allocation31_spill] sm:$0xff] %v4403_v45  ;;  %v4409_v29 = vpop.f32.mrf.mxu1 }
 0x11b   : > { %4895 = vst [vmem:[#allocation32_spill] sm:$0xff] %v4405_v9 }
 0x11c   : > { %4896 = vst [vmem:[#allocation33_spill] sm:$0xff] %v4409_v29  ;;  %3581 = vmatmul.msk.bf16.vlgmr.msra.gmra.mxu0 %vm1235_vm0, %v4249_v42  ;;  %3582 = vmatmul.msk.bf16.vlgmr.msra.gmra.mxu1 %vm1235_vm0, %v4249_v42  ;;  %v3650_v29 = vld [vmem:[%s3840_s17 + $0x154] sm:$0xf] }
 0x11d   : > { %3583 = vmatmul.msk.bf16.vlgmr.msra.gmra.mxu2 %vm1235_vm0, %v4249_v42  ;;  %2253 = vmatpush.bf16.msra.mxu0 %v3456_v5  ;;  %v3481_v5 = vld [vmem:[%s3840_s17 + $0x558] sm:$0xf0] }
 0x11e   : > { %3584 = vmatmul.msk.bf16.vlgmr.msra.gmra.mxu3 %vm1235_vm0, %v4249_v42  ;;  %2281 = vmatpush.bf16.msra.mxu2 %v3464_v62 }
 0x11f   : > { %2295 = vmatpush.bf16.msra.mxu3 %v3468_v10  ;;  %2267 = vmatpush.bf16.msra.mxu1 %v3460_v37 }
 0x120   : > { %v4430_v43 = vpop.f32.mrf.mxu2 }
 0x121   : > { %4897 = vst [vmem:[#allocation34_spill] sm:$0xff] %v4430_v43  ;;  %v4432_v35 = vpop.f32.mrf.mxu3  ;;  %v4434_v57 = vpop.f32.mrf.mxu0  ;;  %2254 = vmatpush.bf16.msra.mxu0 %v3104_v2  ;;  %v3484_v2 = vor.u32 %v3735_v41, %v3481_v5  ;;  %v3129_v43 = vld [vmem:[%s3840_s17 + $0x298] sm:$0xf0] }
 0x122   : > { %4898 = vst [vmem:[#allocation35_spill] sm:$0xff] %v4432_v35  ;;  %v4436_v3 = vpop.f32.mrf.mxu1  ;;  %2282 = vmatpush.bf16.msra.mxu2 %v3112_v31  ;;  %v3476_v35 = vor.u32 %v3734_v18, %v3473_v19 }
 0x123   : > { %4899 = vst [vmem:[#allocation36_spill] sm:$0xff] %v4434_v57  ;;  %2296 = vmatpush.bf16.msra.mxu3 %v3116_v1  ;;  %2268 = vmatpush.bf16.msra.mxu1 %v3108_v23  ;;  %v3480_v1 = vor.u32 %v3779_v38, %v3479_v33  ;;  %v3472_v23 = vor.u32 %v3778_v6, %v3471_v21  ;;  %v3647_v57 = vld [vmem:[%s3840_s17 + $0x13c] sm:$0xf]  ;;  %v3121_v33 = vld [vmem:[%s3840_s17 + $0x290] sm:$0xf0] }
 0x124   : > { %4900 = vst [vmem:[#allocation37_spill] sm:$0xff] %v4436_v3  ;;  %v3691_v3 = vld [vmem:[%s3840_s17 + $0x294] sm:$0xf0]  ;;  %v3132_v41 = vor.u32 %v3647_v57, %v3129_v43  ;;  %v3781_v43 = vld [vmem:[%s3840_s17 + $0x564] sm:$0xf0] }
 0x125   : > { %v3737_v57 = vld [vmem:[%s3840_s17 + $0x40c] sm:$0xf] }
 0x128   : > { %v4441_v37 = vpop.f32.mrf.mxu2 }
 0x129   : > { %4901 = vst [vmem:[#allocation38_spill] sm:$0xff] %v4441_v37  ;;  %v4446_v62 = vpop.f32.mrf.mxu3  ;;  %v4448_v10 = vpop.f32.mrf.mxu0  ;;  %v3127_v37 = vld [vmem:[%s3840_s17 + $0x138] sm:$0xf] }
 0x12a   : > { %4902 = vst [vmem:[#allocation39_spill] sm:$0xff] %v4446_v62  ;;  %v4452_v31 = vpop.f32.mrf.mxu1  ;;  %v3119_v62 = vld [vmem:[%s3840_s17 + $0x130] sm:$0xf]  ;;  %v3128_v38 = vor.u32 %v3691_v3, %v3127_v37  ;;  %v3497_v37 = vld [vmem:[%s3840_s17 + $0x568] sm:$0xf0] }
 0x12b   : > { %4903 = vst [vmem:[#allocation40_spill] sm:$0xff] %v4448_v10  ;;  %v3120_v5 = vor.u32 %v3690_v24, %v3119_v62  ;;  %v3495_v24 = vld [vmem:[%s3840_s17 + $0x408] sm:$0xf]  ;;  %v3487_v62 = vld [vmem:[%s3840_s17 + $0x400] sm:$0xf] }
 0x12c   : > { %4904 = vst [vmem:[#allocation41_spill] sm:$0xff] %v4452_v31  ;;  %3585 = vmatmul.msk.bf16.vlgmr.msrb.gmra.mxu0 %vm1235_vm0, %v4249_v42  ;;  %3586 = vmatmul.msk.bf16.vlgmr.msrb.gmra.mxu1 %vm1235_vm0, %v4249_v42  ;;  %v3646_v31 = vld [vmem:[%s3840_s17 + $0x134] sm:$0xf]  ;;  %v3692_v10 = vld [vmem:[%s3840_s17 + $0x29c] sm:$0xf0] }
 0x12d   : > { %3587 = vmatmul.msk.bf16.vlgmr.msrb.gmra.mxu2 %vm1235_vm0, %v4249_v42  ;;  %2309 = vmatpush.bf16.msrb.mxu0 %v3472_v23  ;;  %v3124_v6 = vor.u32 %v3646_v31, %v3121_v33  ;;  %v3780_v31 = vld [vmem:[%s3840_s17 + $0x55c] sm:$0xf0]  ;;  %v3736_v23 = vld [vmem:[%s3840_s17 + $0x404] sm:$0xf] }
 0x12e   : > { %3588 = vmatmul.msk.bf16.vlgmr.msrb.gmra.mxu3 %vm1235_vm0, %v4249_v42  ;;  %2337 = vmatpush.bf16.msrb.mxu2 %v3480_v1  ;;  %v3489_v33 = vld [vmem:[%s3840_s17 + $0x560] sm:$0xf0] }
 0x12f   : > { %2351 = vmatpush.bf16.msrb.mxu3 %v3484_v2  ;;  %2323 = vmatpush.bf16.msrb.mxu1 %v3476_v35 }
 0x130   : > { %v4470_v21 = vpop.f32.mrf.mxu2 }
 0x131   : > { %4905 = vst [vmem:[#allocation42_spill] sm:$0xff] %v4470_v21  ;;  %v4472_v18 = vpop.f32.mrf.mxu3  ;;  %v4474_v19 = vpop.f32.mrf.mxu0  ;;  %2310 = vmatpush.bf16.msrb.mxu0 %v3120_v5  ;;  %v3500_v5 = vor.u32 %v3737_v57, %v3497_v37  ;;  %v3145_v21 = vld [vmem:[%s3840_s17 + $0x2a8] sm:$0xf0] }
 0x132   : > { %4906 = vst [vmem:[#allocation43_spill] sm:$0xff] %v4472_v18  ;;  %v4476_v3 = vpop.f32.mrf.mxu1  ;;  %2338 = vmatpush.bf16.msrb.mxu2 %v3128_v38  ;;  %v3492_v18 = vor.u32 %v3736_v23, %v3489_v33 }
 0x133   : > { %4907 = vst [vmem:[#allocation44_spill] sm:$0xff] %v4474_v19  ;;  %2352 = vmatpush.bf16.msrb.mxu3 %v3132_v41  ;;  %2324 = vmatpush.bf16.msrb.mxu1 %v3124_v6  ;;  %v3496_v41 = vor.u32 %v3781_v43, %v3495_v24  ;;  %v3488_v6 = vor.u32 %v3780_v31, %v3487_v62  ;;  %v3649_v19 = vld [vmem:[%s3840_s17 + $0x14c] sm:$0xf]  ;;  %v3137_v24 = vld [vmem:[%s3840_s17 + $0x2a0] sm:$0xf0] }
 0x134   : > { %4908 = vst [vmem:[#allocation45_spill] sm:$0xff] %v4476_v3  ;;  %v3693_v3 = vld [vmem:[%s3840_s17 + $0x2a4] sm:$0xf0]  ;;  %v3148_v57 = vor.u32 %v3649_v19, %v3145_v21  ;;  %v3783_v21 = vld [vmem:[%s3840_s17 + $0x574] sm:$0xf0] }
 0x135   : > { %v3739_v19 = vld [vmem:[%s3840_s17 + $0x41c] sm:$0xf] }
 0x138   : > { %v4481_v35 = vpop.f32.mrf.mxu2 }
 0x139   : > { %4909 = vst [vmem:[#allocation46_spill] sm:$0xff] %v4481_v35  ;;  %v4486_v1 = vpop.f32.mrf.mxu3  ;;  %v4488_v2 = vpop.f32.mrf.mxu0  ;;  %v3143_v35 = vld [vmem:[%s3840_s17 + $0x148] sm:$0xf] }
 0x13a   : > { %4910 = vst [vmem:[#allocation47_spill] sm:$0xff] %v4486_v1  ;;  %v4492_v38 = vpop.f32.mrf.mxu1  ;;  %v3135_v1 = vld [vmem:[%s3840_s17 + $0x140] sm:$0xf]  ;;  %v3144_v43 = vor.u32 %v3693_v3, %v3143_v35  ;;  %v3513_v35 = vld [vmem:[%s3840_s17 + $0x578] sm:$0xf0] }
 0x13b   : > { %4911 = vst [vmem:[#allocation48_spill] sm:$0xff] %v4488_v2  ;;  %v3136_v37 = vor.u32 %v3692_v10, %v3135_v1  ;;  %v3511_v10 = vld [vmem:[%s3840_s17 + $0x418] sm:$0xf]  ;;  %v3503_v1 = vld [vmem:[%s3840_s17 + $0x410] sm:$0xf] }
 0x13c   : > { %4912 = vst [vmem:[#allocation49_spill] sm:$0xff] %v4492_v38  ;;  %3589 = vmatmul.msk.bf16.vlgmr.msra.gmra.mxu0 %vm1235_vm0, %v4249_v42  ;;  %3590 = vmatmul.msk.bf16.vlgmr.msra.gmra.mxu1 %vm1235_vm0, %v4249_v42  ;;  %v3648_v38 = vld [vmem:[%s3840_s17 + $0x144] sm:$0xf]  ;;  %v3694_v2 = vld [vmem:[%s3840_s17 + $0x2ac] sm:$0xf0] }
 0x13d   : > { %3591 = vmatmul.msk.bf16.vlgmr.msra.gmra.mxu2 %vm1235_vm0, %v4249_v42  ;;  %2365 = vmatpush.bf16.msra.mxu0 %v3488_v6  ;;  %v3140_v31 = vor.u32 %v3648_v38, %v3137_v24  ;;  %v3782_v38 = vld [vmem:[%s3840_s17 + $0x56c] sm:$0xf0]  ;;  %v3738_v6 = vld [vmem:[%s3840_s17 + $0x414] sm:$0xf] }
 0x13e   : > { %3592 = vmatmul.msk.bf16.vlgmr.msra.gmra.mxu3 %vm1235_vm0, %v4249_v42  ;;  %2393 = vmatpush.bf16.msra.mxu2 %v3496_v41  ;;  %v3505_v24 = vld [vmem:[%s3840_s17 + $0x570] sm:$0xf0] }
 0x13f   : > { %2407 = vmatpush.bf16.msra.mxu3 %v3500_v5  ;;  %2379 = vmatpush.bf16.msra.mxu1 %v3492_v18 }
 0x140   : > { %v4510_v62 = vpop.f32.mrf.mxu2 }
 0x141   : > { %4913 = vst [vmem:[#allocation50_spill] sm:$0xff] %v4510_v62  ;;  %v4512_v23 = vpop.f32.mrf.mxu3  ;;  %v4514_v33 = vpop.f32.mrf.mxu0  ;;  %2366 = vmatpush.bf16.msra.mxu0 %v3136_v37  ;;  %v3516_v37 = vor.u32 %v3739_v19, %v3513_v35  ;;  %v3161_v62 = vld [vmem:[%s3840_s17 + $0x2b8] sm:$0xf0] }
 0x142   : > { %4914 = vst [vmem:[#allocation51_spill] sm:$0xff] %v4512_v23  ;;  %v4516_v3 = vpop.f32.mrf.mxu1  ;;  %2394 = vmatpush.bf16.msra.mxu2 %v3144_v43  ;;  %v3508_v23 = vor.u32 %v3738_v6, %v3505_v24 }
 0x143   : > { %4915 = vst [vmem:[#allocation52_spill] sm:$0xff] %v4514_v33  ;;  %2408 = vmatpush.bf16.msra.mxu3 %v3148_v57  ;;  %2380 = vmatpush.bf16.msra.mxu1 %v3140_v31  ;;  %v3512_v57 = vor.u32 %v3783_v21, %v3511_v10  ;;  %v3504_v31 = vor.u32 %v3782_v38, %v3503_v1  ;;  %v3651_v33 = vld [vmem:[%s3840_s17 + $0x15c] sm:$0xf]  ;;  %v3153_v10 = vld [vmem:[%s3840_s17 + $0x2b0] sm:$0xf0] }
 0x144   : > { %4916 = vst [vmem:[#allocation53_spill] sm:$0xff] %v4516_v3  ;;  %v3695_v3 = vld [vmem:[%s3840_s17 + $0x2b4] sm:$0xf0]  ;;  %v3164_v19 = vor.u32 %v3651_v33, %v3161_v62  ;;  %v3156_v38 = vor.u32 %v3650_v29, %v3153_v10 }
 0x148   : > { %v4521_v18 = vpop.f32.mrf.mxu2 }
 0x149   : > { %4917 = vst [vmem:[#allocation54_spill] sm:$0xff] %v4521_v18  ;;  %v4526_v41 = vpop.f32.mrf.mxu3  ;;  %v4528_v5 = vpop.f32.mrf.mxu0  ;;  %v3159_v18 = vld [vmem:[%s3840_s17 + $0x158] sm:$0xf] }
 0x14a   : > { %4918 = vst [vmem:[#allocation55_spill] sm:$0xff] %v4526_v41  ;;  %v4532_v43 = vpop.f32.mrf.mxu1  ;;  %v3151_v41 = vld [vmem:[%s3840_s17 + $0x150] sm:$0xf]  ;;  %v3160_v21 = vor.u32 %v3695_v3, %v3159_v18 }
 0x14b   : > { %v3152_v35 = vor.u32 %v3694_v2, %v3151_v41 }
 0x14c   : > { %3593 = vmatmul.msk.bf16.vlgmr.msrb.gmra.mxu0 %vm1235_vm0, %v4249_v42  ;;  %3594 = vmatmul.msk.bf16.vlgmr.msrb.gmra.mxu1 %vm1235_vm0, %v4249_v42 }
 0x14d   : > { %3595 = vmatmul.msk.bf16.vlgmr.msrb.gmra.mxu2 %vm1235_vm0, %v4249_v42  ;;  %2421 = vmatpush.bf16.msrb.mxu0 %v3504_v31 }
 0x14e   : > { %3596 = vmatmul.msk.bf16.vlgmr.msrb.gmra.mxu3 %vm1235_vm0, %v4249_v42  ;;  %2449 = vmatpush.bf16.msrb.mxu2 %v3512_v57 }
 0x14f   : > { %2463 = vmatpush.bf16.msrb.mxu3 %v3516_v37  ;;  %2435 = vmatpush.bf16.msrb.mxu1 %v3508_v23 }
 0x150   : > { %v4550_v1 = vpop.f32.mrf.mxu2 }
 0x151   : > { %v4552_v6 = vpop.f32.mrf.mxu3  ;;  %v4554_v24 = vpop.f32.mrf.mxu0  ;;  %2422 = vmatpush.bf16.msrb.mxu0 %v3152_v35 }
 0x152   : > { %v4556_v20 = vpop.f32.mrf.mxu1  ;;  %2450 = vmatpush.bf16.msrb.mxu2 %v3160_v21 }
 0x153   : > { %2464 = vmatpush.bf16.msrb.mxu3 %v3164_v19  ;;  %2436 = vmatpush.bf16.msrb.mxu1 %v3156_v38 }
 0x158   : > { %v4558_v57 = vpop.f32.mrf.mxu2 }
 0x159   : > { %v4560_v3 = vpop.f32.mrf.mxu3  ;;  %v4562_v62 = vpop.f32.mrf.mxu0 }
 0x15a   : > { %v4564_v2 = vpop.f32.mrf.mxu1 }
 0x15c   : > { %3597 = vmatmul.msk.bf16.vlgmr.msra.gmra.mxu0 %vm1235_vm0, %v4249_v42  ;;  %3598 = vmatmul.msk.bf16.vlgmr.msra.gmra.mxu1 %vm1235_vm0, %v4249_v42 }
 0x15d   : > { %3599 = vmatmul.msk.bf16.vlgmr.msra.gmra.mxu2 %vm1235_vm0, %v4249_v42 }
 0x15e   : > { %3600 = vmatmul.msk.bf16.vlgmr.msra.gmra.mxu3 %vm1235_vm0, %v4249_v42 }
 0x160   : > { %v4574_v29 = vpop.f32.mrf.mxu2 }
 0x161   : > { %v4576_v23 = vpop.f32.mrf.mxu3  ;;  %v4578_v33 = vpop.f32.mrf.mxu0 }
 0x162   : > { %v4580_v18 = vpop.f32.mrf.mxu1 }
 0x168   : > { %v4582_v41 = vpop.f32.mrf.mxu2 }
 0x169   : > { %v4584_v37 = vpop.f32.mrf.mxu3  ;;  %v4586_v31 = vpop.f32.mrf.mxu0 }
 0x16a   : > { %4919 = vst [vmem:[#allocation56_spill] sm:$0xff] %v4584_v37  ;;  %v4588_v10 = vpop.f32.mrf.mxu1 }
 0x16c   : > { %3601 = vmatmul.msk.bf16.vlgmr.msrb.gmra.mxu0 %vm1235_vm0, %v4249_v42  ;;  %3602 = vmatmul.msk.bf16.vlgmr.msrb.gmra.mxu1 %vm1235_vm0, %v4249_v42 }
 0x16d   : > { %3603 = vmatmul.msk.bf16.vlgmr.msrb.gmra.mxu2 %vm1235_vm0, %v4249_v42 }
 0x16e   : > { %3604 = vmatmul.msk.bf16.vlgmr.msrb.gmra.mxu3 %vm1235_vm0, %v4249_v42 }
 0x170   : > { %v4598_v21 = vpop.f32.mrf.mxu2 }
 0x171   : > { %4920 = vst [vmem:[#allocation57_spill] sm:$0xff] %v4598_v21  ;;  %v4600_v19 = vpop.f32.mrf.mxu3  ;;  %v4602_v35 = vpop.f32.mrf.mxu0 }
 0x172   : > { %4921 = vst [vmem:[#allocation58_spill] sm:$0xff] %v4600_v19  ;;  %v4604_v38 = vpop.f32.mrf.mxu1 }
 0x173   : > { %4922 = vst [vmem:[#allocation59_spill] sm:$0xff] %v4602_v35 }
 0x174   : > { %4923 = vst [vmem:[#allocation60_spill] sm:$0xff] %v4604_v38 }
 0x178   : > { %v4606_v9 = vpop.f32.mrf.mxu2 }
 0x179   : > { %4924 = vst [vmem:[#allocation61_spill] sm:$0xff] %v4606_v9  ;;  %v4608_v28 = vpop.f32.mrf.mxu3  ;;  %v4610_v45 = vpop.f32.mrf.mxu0 }
 0x17a   : > { %4925 = vst [vmem:[#allocation62_spill] sm:$0xff] %v4608_v28  ;;  %v4612_v25 = vpop.f32.mrf.mxu1 }
 0x17b   : > { %4926 = vst [vmem:[#allocation63_spill] sm:$0xff] %v4610_v45 }
 0x17c   : > { %4927 = vst [vmem:[#allocation64_spill] sm:$0xff] %v4612_v25 }
 0x180   : > { %v4614_v63 = vpop.f32.mrf.mxu2 }
 0x181   : > { %4928 = vst [vmem:[#allocation65_spill] sm:$0xff] %v4614_v63  ;;  %v4616_v37 = vpop.f32.mrf.mxu3  ;;  %v4618_v42 = vpop.f32.mrf.mxu0 }
 0x182   : > { %4929 = vst [vmem:[#allocation66_spill] sm:$0xff] %v4616_v37  ;;  %v4620_v21 = vpop.f32.mrf.mxu1 }
 0x183   : > { %4930 = vst [vmem:[#allocation67_spill] sm:$0xff] %v4618_v42  ;;  %v4646_v42 = vpop.permute.xlu0 %2607 }
 0x184   : > { %4931 = vst [vmem:[#allocation68_spill] sm:$0xff] %v4620_v21 }
 0x188   : > { %v4622_v19 = vpop.f32.mrf.mxu2 }
 0x189   : > { %4932 = vst [vmem:[#allocation69_spill] sm:$0xff] %v4622_v19  ;;  %v4624_v35 = vpop.f32.mrf.mxu3  ;;  %v4626_v38 = vpop.f32.mrf.mxu0 }
 0x18a   : > { %4933 = vst [vmem:[#allocation70_spill] sm:$0xff] %v4624_v35  ;;  %v4628_v9 = vpop.f32.mrf.mxu1 }
 0x18b   : > { %4934 = vst [vmem:[#allocation71_spill] sm:$0xff] %v4626_v38 }
 0x18c   : > { %4935 = vst [vmem:[#allocation72_spill] sm:$0xff] %v4628_v9 }
 0x190   : > { %v4630_v28 = vpop.f32.mrf.mxu2 }
 0x191   : > { %4936 = vst [vmem:[#allocation73_spill] sm:$0xff] %v4630_v28  ;;  %v4632_v45 = vpop.f32.mrf.mxu3  ;;  %v4634_v25 = vpop.f32.mrf.mxu0  ;;  %v2471_v28 = vmax.f32 %v4077_v58, %v4304_v8 }
 0x192   : > { %4937 = vst [vmem:[#allocation74_spill] sm:$0xff] %v4632_v45  ;;  %v4636_v63 = vpop.f32.mrf.mxu1 }
 0x193   : > { %4938 = vst [vmem:[#allocation75_spill] sm:$0xff] %v4634_v25 }
 0x194   : > { %4939 = vst [vmem:[#allocation76_spill] sm:$0xff] %v4636_v63 }
 0x198   : > { %v4638_v37 = vpop.f32.mrf.mxu2 }
 0x199   : > { %4940 = vst [vmem:[#allocation77_spill] sm:$0xff] %v4638_v37  ;;  %v4640_v21 = vpop.f32.mrf.mxu3  ;;  %v4642_v19 = vpop.f32.mrf.mxu0  ;;  %v2472_v37 = vmax.f32 %v4081_v61, %v4306_v12  ;;  %v2494_v61 = vmax.f32 %v4105_v17, %v4320_v47  ;;  %v2474_v47 = vmax.f32 %v4101_v15, %v4326_v55  ;;  %v2475_v15 = vmax.f32 %v4117_v27, %v4344_v44 }
 0x19a   : > { %4941 = vst [vmem:[#allocation78_spill] sm:$0xff] %v4640_v21  ;;  %v4644_v35 = vpop.f32.mrf.mxu1  ;;  %v4675_v17 = vpop.permute.xlu0 %2612  ;;  %v2476_v55 = vmax.f32 %v4121_v30, %v4346_v52  ;;  %v2496_v27 = vmax.f32 %v4115_v26, %v4350_v56 }
 0x19b   : > { %4942 = vst [vmem:[#allocation79_spill] sm:$0xff] %v4642_v19 }
 0x19c   : > { %4943 = vst [vmem:[#allocation80_spill] sm:$0xff] %v4644_v35 }
 0x1a0   : > { %v2172_v38 = vpop.f32.mrf.mxu2 }
 0x1a1   : > { %v2515_v45 = vmax.f32 %v4528_v5, %v2172_v38  ;;  %v2186_v25 = vpop.f32.mrf.mxu3  ;;  %v4651_v9 = vpop.f32.mrf.mxu0  ;;  %v2493_v38 = vmax.f32 %v4103_v16, %v4315_v40 }
 0x1a2   : > { %v2516_v21 = vmax.f32 %v4532_v43, %v2186_v25  ;;  %v4656_v63 = vpop.f32.mrf.mxu1 }
 0x1a3   : > { %v2559_v19 = vmax.f32 %v2471_v28, %v2515_v45 }
 0x1a4   : > { %v2560_v35 = vmax.f32 %v2472_v37, %v2516_v21 }
 0x1a5   : > { %v2615_v59 = vadd.f32 %v4646_v42, %v2559_v19 }
 0x1a6   : > { %v2616_v39 = vadd.f32 %v4646_v42, %v2560_v35 }
 0x1a7   : > { %v2659_v58 = vmax.f32 %v2615_v59, 0.0  ;;  %v2473_v59 = vmax.f32 %v4099_v13, %v4322_v51 }
 0x1a8   : > { %v2660_v8 = vmax.f32 %v2616_v39, 0.0  ;;  %v2174_v5 = vpop.f32.mrf.mxu2 }
 0x1a9   : > { %v2537_v25 = vmax.f32 %v4554_v24, %v2174_v5  ;;  %v2188_v12 = vpop.f32.mrf.mxu3  ;;  %v2200_v43 = vpop.f32.mrf.mxu0 }
 0x1aa   : > { %v2703_v28 = vpack.c.bf16 %v2660_v8, %v2659_v58  ;;  %v2538_v39 = vmax.f32 %v4556_v20, %v2188_v12  ;;  %v2517_v16 = vmax.f32 %v4550_v1, %v2200_v43  ;;  %v2214_v40 = vpop.f32.mrf.mxu1  ;;  %v2495_v12 = vmax.f32 %v4110_v22, %v4348_v53 }
 0x1ab   : > { %v2581_v45 = vmax.f32 %v2493_v38, %v2537_v25  ;;  %v2518_v24 = vmax.f32 %v4552_v6, %v2214_v40 }
 0x1ac   : > { %v2582_v37 = vmax.f32 %v2494_v61, %v2538_v39  ;;  %v2561_v21 = vmax.f32 %v2473_v59, %v2517_v16  ;;  %2725 = vst [vmem:[%s4669_s29] sm:$0xff] %v2703_v28 }
 0x1ad   : > { %v2562_v19 = vmax.f32 %v2474_v47, %v2518_v24  ;;  %v2637_v13 = vadd.f32 %v4675_v17, %v2581_v45  ;;  %v2498_v24 = vmax.f32 %v4145_v50, %v4360_v4 }
 0x1ae   : > { %v2617_v51 = vadd.f32 %v4646_v42, %v2561_v21  ;;  %v2638_v20 = vadd.f32 %v4675_v17, %v2582_v37 }
 0x1af   : > { %v2618_v1 = vadd.f32 %v4646_v42, %v2562_v19  ;;  %v2681_v35 = vmax.f32 %v2637_v13, 0.0 }
 0x1b0   : > { %v2661_v58 = vmax.f32 %v2617_v51, 0.0  ;;  %v2682_v8 = vmax.f32 %v2638_v20, 0.0  ;;  %v2228_v5 = vpop.f32.mrf.mxu2  ;;  %v2477_v51 = vmax.f32 %v4139_v46, %v4362_v7 }
 0x1b1   : > { %v2662_v6 = vmax.f32 %v2618_v1, 0.0  ;;  %v2519_v38 = vmax.f32 %v4562_v62, %v2228_v5  ;;  %v2242_v61 = vpop.f32.mrf.mxu3  ;;  %v2202_v25 = vpop.f32.mrf.mxu0 }
 0x1b2   : > { %v2714_v43 = vpack.c.bf16 %v2682_v8, %v2681_v35  ;;  %v2520_v59 = vmax.f32 %v4564_v2, %v2242_v61  ;;  %v2539_v28 = vmax.f32 %v4558_v57, %v2202_v25  ;;  %v2216_v39 = vpop.f32.mrf.mxu1 }
 0x1b3   : > { %v2704_v44 = vpack.c.bf16 %v2662_v6, %v2661_v58  ;;  %v2563_v30 = vmax.f32 %v2475_v15, %v2519_v38  ;;  %v2540_v52 = vmax.f32 %v4560_v3, %v2216_v39  ;;  %v2497_v3 = vmax.f32 %v4143_v49, %v4355_v14 }
 0x1b4   : > { %2736 = vst [vmem:[%s4669_s29 + $0x58] sm:$0xff] %v2714_v43  ;;  %v2564_v62 = vmax.f32 %v2476_v55, %v2520_v59  ;;  %v2583_v16 = vmax.f32 %v2495_v12, %v2539_v28  ;;  %v2478_v49 = vmax.f32 %v4141_v48, %v4366_v36  ;;  %v2480_v6 = vmax.f32 %v4161_v0, %v4386_v11  ;;  %v4946_v11 = vld [vmem:[#allocation56_spill] sm:$0xff] }
 0x1b5   : > { %2726 = vst [vmem:[%s4669_s29 + $0x8] sm:$0xff] %v2704_v44  ;;  %v2619_v40 = vadd.f32 %v4646_v42, %v2563_v30  ;;  %v2584_v22 = vmax.f32 %v2496_v27, %v2540_v52  ;;  %v2499_v43 = vmax.f32 %v4150_v54, %v4388_v34  ;;  %v4944_v44 = vld [vmem:[#allocation29_spill] sm:$0xff] }
 0x1b6   : > { %v2620_v53 = vadd.f32 %v4646_v42, %v2564_v62  ;;  %v2639_v2 = vadd.f32 %v4675_v17, %v2583_v16 }
 0x1b7   : > { %v2663_v57 = vmax.f32 %v2619_v40, 0.0  ;;  %v2640_v47 = vadd.f32 %v4675_v17, %v2584_v22 }
 0x1b8   : > { %v2664_v45 = vmax.f32 %v2620_v53, 0.0  ;;  %v2683_v26 = vmax.f32 %v2639_v2, 0.0  ;;  %v2230_v56 = vpop.f32.mrf.mxu2 }
 0x1b9   : > { %v2684_v37 = vmax.f32 %v2640_v47, 0.0  ;;  %v2541_v21 = vmax.f32 %v4578_v33, %v2230_v56  ;;  %v2244_v19 = vpop.f32.mrf.mxu3  ;;  %v2256_v13 = vpop.f32.mrf.mxu0  ;;  %v4948_v47 = vld [vmem:[#allocation5_spill] sm:$0xff]  ;;  %v4950_v56 = vld [vmem:[#allocation6_spill] sm:$0xff] }
 0x1ba   : > { %v2705_v20 = vpack.c.bf16 %v2664_v45, %v2663_v57  ;;  %v2542_v1 = vmax.f32 %v4580_v18, %v2244_v19  ;;  %v2521_v35 = vmax.f32 %v4574_v29, %v2256_v13  ;;  %v2270_v58 = vpop.f32.mrf.mxu1  ;;  %v4947_v57 = vld [vmem:[#allocation30_spill] sm:$0xff] }
 0x1bb   : > { %v2715_v14 = vpack.c.bf16 %v2684_v37, %v2683_v26  ;;  %v2585_v50 = vmax.f32 %v2497_v3, %v2541_v21  ;;  %v2522_v4 = vmax.f32 %v4576_v23, %v2270_v58  ;;  %v2479_v23 = vmax.f32 %v4157_v60, %v4384_v32  ;;  %v4945_v60 = vld [vmem:[#allocation2_spill] sm:$0xff]  ;;  %v4949_v26 = vld [vmem:[#allocation31_spill] sm:$0xff]  ;;  %v4954_v58 = vld [vmem:[#allocation60_spill] sm:$0xff] }
 0x1bc   : > { %2727 = vst [vmem:[%s4669_s29 + $0x10] sm:$0xff] %v2705_v20  ;;  %v2586_v33 = vmax.f32 %v2498_v24, %v2542_v1  ;;  %v2565_v8 = vmax.f32 %v2477_v51, %v2521_v35  ;;  %v2500_v32 = vmax.f32 %v4945_v60, %v4944_v44  ;;  %v2501_v45 = vmax.f32 %v4948_v47, %v4947_v57  ;;  %v4951_v37 = vld [vmem:[#allocation59_spill] sm:$0xff]  ;;  %v4952_v51 = vld [vmem:[#allocation32_spill] sm:$0xff]  ;;  %v4962_v44 = vld [vmem:[#allocation10_spill] sm:$0xff] }
 0x1bd   : > { %2737 = vst [vmem:[%s4669_s29 + $0x60] sm:$0xff] %v2715_v14  ;;  %v2641_v5 = vadd.f32 %v4675_v17, %v2585_v50  ;;  %v2566_v46 = vmax.f32 %v2478_v49, %v2522_v4  ;;  %v2502_v3 = vmax.f32 %v4950_v56, %v4949_v26  ;;  %v4953_v20 = vld [vmem:[#allocation3_spill] sm:$0xff]  ;;  %v4955_v14 = vld [vmem:[#allocation57_spill] sm:$0xff]  ;;  %v4970_v26 = vld [vmem:[#allocation62_spill] sm:$0xff] }
 0x1be   : > { %v2642_v7 = vadd.f32 %v4675_v17, %v2586_v33  ;;  %v2621_v18 = vadd.f32 %v4646_v42, %v2565_v8  ;;  %v2481_v1 = vmax.f32 %v4953_v20, %v4952_v51  ;;  %v4956_v33 = vld [vmem:[#allocation33_spill] sm:$0xff]  ;;  %v4957_v8 = vld [vmem:[#allocation4_spill] sm:$0xff] }
 0x1bf   : > { %v2685_v29 = vmax.f32 %v2641_v5, 0.0  ;;  %v2622_v15 = vadd.f32 %v4646_v42, %v2566_v46  ;;  %v2482_v5 = vmax.f32 %v4957_v8, %v4956_v33  ;;  %v4974_v33 = vld [vmem:[#allocation14_spill] sm:$0xff] }
 0x1c0   : > { %v2686_v55 = vmax.f32 %v2642_v7, 0.0  ;;  %v2665_v48 = vmax.f32 %v2621_v18, 0.0  ;;  %v2284_v36 = vpop.f32.mrf.mxu2  ;;  %v4958_v18 = vld [vmem:[#allocation58_spill] sm:$0xff] }
 0x1c1   : > { %v2666_v38 = vmax.f32 %v2622_v15, 0.0  ;;  %v2523_v61 = vmax.f32 %v4586_v31, %v2284_v36  ;;  %v2298_v25 = vpop.f32.mrf.mxu3  ;;  %v2258_v12 = vpop.f32.mrf.mxu0 }
 0x1c2   : > { %v2716_v59 = vpack.c.bf16 %v2686_v55, %v2685_v29  ;;  %v2524_v28 = vmax.f32 %v4588_v10, %v2298_v25  ;;  %v2543_v39 = vmax.f32 %v4582_v41, %v2258_v12  ;;  %v2272_v27 = vpop.f32.mrf.mxu1 }
 0x1c3   : > { %v2706_v30 = vpack.c.bf16 %v2666_v38, %v2665_v48  ;;  %v2567_v0 = vmax.f32 %v2479_v23, %v2523_v61  ;;  %v2544_v52 = vmax.f32 %v4946_v11, %v2272_v27  ;;  %v4961_v27 = vld [vmem:[#allocation35_spill] sm:$0xff] }
 0x1c4   : > { %2738 = vst [vmem:[%s4669_s29 + $0x68] sm:$0xff] %v2716_v59  ;;  %v2568_v31 = vmax.f32 %v2480_v6, %v2524_v28  ;;  %v2587_v62 = vmax.f32 %v2499_v43, %v2543_v39  ;;  %v4959_v59 = vld [vmem:[#allocation34_spill] sm:$0xff]  ;;  %v4960_v28 = vld [vmem:[#allocation9_spill] sm:$0xff]  ;;  %v2484_v60 = vmax.f32 %v4962_v44, %v4961_v27 }
 0x1c5   : > { %2728 = vst [vmem:[%s4669_s29 + $0x18] sm:$0xff] %v2706_v30  ;;  %v2623_v16 = vadd.f32 %v4646_v42, %v2567_v0  ;;  %v2588_v54 = vmax.f32 %v2500_v32, %v2544_v52  ;;  %v2483_v39 = vmax.f32 %v4960_v28, %v4959_v59  ;;  %v4963_v30 = vld [vmem:[#allocation63_spill] sm:$0xff]  ;;  %v4982_v27 = vld [vmem:[#allocation66_spill] sm:$0xff] }
 0x1c6   : > { %v2624_v34 = vadd.f32 %v4646_v42, %v2568_v31  ;;  %v2643_v10 = vadd.f32 %v4675_v17, %v2587_v62  ;;  %v4964_v31 = vld [vmem:[#allocation36_spill] sm:$0xff]  ;;  %v4965_v62 = vld [vmem:[#allocation7_spill] sm:$0xff] }
 0x1c7   : > { %v2667_v41 = vmax.f32 %v2623_v16, 0.0  ;;  %v2644_v40 = vadd.f32 %v4675_v17, %v2588_v54  ;;  %v2503_v16 = vmax.f32 %v4965_v62, %v4964_v31 }
 0x1c8   : > { %v2668_v22 = vmax.f32 %v2624_v34, 0.0  ;;  %v2687_v53 = vmax.f32 %v2643_v10, 0.0  ;;  %v2286_v2 = vpop.f32.mrf.mxu2  ;;  %v4966_v34 = vld [vmem:[#allocation64_spill] sm:$0xff] }
 0x1c9   : > { %v2688_v24 = vmax.f32 %v2644_v40, 0.0  ;;  %v2545_v21 = vmax.f32 %v4951_v37, %v2286_v2  ;;  %v2300_v19 = vpop.f32.mrf.mxu3  ;;  %v2312_v13 = vpop.f32.mrf.mxu0  ;;  %v4969_v2 = vld [vmem:[#allocation8_spill] sm:$0xff] }
 0x1ca   : > { %v2707_v35 = vpack.c.bf16 %v2668_v22, %v2667_v41  ;;  %v2546_v49 = vmax.f32 %v4954_v58, %v2300_v19  ;;  %v2525_v50 = vmax.f32 %v4955_v14, %v2312_v13  ;;  %v2326_v4 = vpop.f32.mrf.mxu1  ;;  %v4967_v41 = vld [vmem:[#allocation61_spill] sm:$0xff] }
 0x1cb   : > { %v2717_v46 = vpack.c.bf16 %v2688_v24, %v2687_v53  ;;  %v2589_v7 = vmax.f32 %v2501_v45, %v2545_v21  ;;  %v2526_v29 = vmax.f32 %v4958_v18, %v2326_v4  ;;  %v4968_v53 = vld [vmem:[#allocation37_spill] sm:$0xff]  ;;  %v4973_v4 = vld [vmem:[#allocation39_spill] sm:$0xff] }
 0x1cc   : > { %2729 = vst [vmem:[%s4669_s29 + $0x20] sm:$0xff] %v2707_v35  ;;  %v2590_v15 = vmax.f32 %v2502_v3, %v2546_v49  ;;  %v2569_v55 = vmax.f32 %v2481_v1, %v2525_v50  ;;  %v2504_v57 = vmax.f32 %v4969_v2, %v4968_v53  ;;  %v4971_v49 = vld [vmem:[#allocation38_spill] sm:$0xff]  ;;  %v4972_v14 = vld [vmem:[#allocation13_spill] sm:$0xff]  ;;  %v2506_v8 = vmax.f32 %v4974_v33, %v4973_v4 }
 0x1cd   : > { %2739 = vst [vmem:[%s4669_s29 + $0x70] sm:$0xff] %v2717_v46  ;;  %v2645_v48 = vadd.f32 %v4675_v17, %v2589_v7  ;;  %v2570_v36 = vmax.f32 %v2482_v5, %v2526_v29  ;;  %v2505_v50 = vmax.f32 %v4972_v14, %v4971_v49  ;;  %v4975_v46 = vld [vmem:[#allocation67_spill] sm:$0xff]  ;;  %v4986_v53 = vld [vmem:[#allocation18_spill] sm:$0xff] }
 0x1ce   : > { %v2646_v23 = vadd.f32 %v4675_v17, %v2590_v15  ;;  %v2625_v6 = vadd.f32 %v4646_v42, %v2569_v55  ;;  %v4976_v15 = vld [vmem:[#allocation40_spill] sm:$0xff]  ;;  %v4977_v55 = vld [vmem:[#allocation11_spill] sm:$0xff]  ;;  %v4994_v4 = vld [vmem:[#allocation70_spill] sm:$0xff] }
 0x1cf   : > { %v2689_v38 = vmax.f32 %v2645_v48, 0.0  ;;  %v2626_v61 = vadd.f32 %v4646_v42, %v2570_v36  ;;  %v2485_v48 = vmax.f32 %v4977_v55, %v4976_v15 }
 0x1d0   : > { %v2690_v25 = vmax.f32 %v2646_v23, 0.0  ;;  %v2669_v12 = vmax.f32 %v2625_v6, 0.0  ;;  %v2340_v43 = vpop.f32.mrf.mxu2  ;;  %v4978_v23 = vld [vmem:[#allocation68_spill] sm:$0xff] }
 0x1d1   : > { %v2670_v32 = vmax.f32 %v2626_v61, 0.0  ;;  %v2527_v0 = vmax.f32 %v4963_v30, %v2340_v43  ;;  %v2354_v11 = vpop.f32.mrf.mxu3  ;;  %v2314_v52 = vpop.f32.mrf.mxu0  ;;  %v4981_v43 = vld [vmem:[#allocation12_spill] sm:$0xff] }
 0x1d2   : > { %v2718_v54 = vpack.c.bf16 %v2690_v25, %v2689_v38  ;;  %v2528_v10 = vmax.f32 %v4966_v34, %v2354_v11  ;;  %v2547_v40 = vmax.f32 %v4967_v41, %v2314_v52  ;;  %v2328_v22 = vpop.f32.mrf.mxu1  ;;  %v4979_v38 = vld [vmem:[#allocation65_spill] sm:$0xff] }
 0x1d3   : > { %v2708_v47 = vpack.c.bf16 %v2670_v32, %v2669_v12  ;;  %v2571_v45 = vmax.f32 %v2483_v39, %v2527_v0  ;;  %v2548_v56 = vmax.f32 %v4970_v26, %v2328_v22  ;;  %v4980_v12 = vld [vmem:[#allocation41_spill] sm:$0xff]  ;;  %v4985_v22 = vld [vmem:[#allocation43_spill] sm:$0xff] }
 0x1d4   : > { %2740 = vst [vmem:[%s4669_s29 + $0x78] sm:$0xff] %v2718_v54  ;;  %v2572_v3 = vmax.f32 %v2484_v60, %v2528_v10  ;;  %v2591_v24 = vmax.f32 %v2503_v16, %v2547_v40  ;;  %v2486_v59 = vmax.f32 %v4981_v43, %v4980_v12  ;;  %v4983_v10 = vld [vmem:[#allocation42_spill] sm:$0xff]  ;;  %v4984_v41 = vld [vmem:[#allocation17_spill] sm:$0xff]  ;;  %v2488_v2 = vmax.f32 %v4986_v53, %v4985_v22 }
 0x1d5   : > { %2730 = vst [vmem:[%s4669_s29 + $0x28] sm:$0xff] %v2708_v47  ;;  %v2627_v37 = vadd.f32 %v4646_v42, %v2571_v45  ;;  %v2592_v21 = vmax.f32 %v2504_v57, %v2548_v56  ;;  %v2487_v40 = vmax.f32 %v4984_v41, %v4983_v10  ;;  %v4987_v47 = vld [vmem:[#allocation71_spill] sm:$0xff]  ;;  %v4998_v12 = vld [vmem:[#allocation22_spill] sm:$0xff] }
 0x1d6   : > { %v2628_v19 = vadd.f32 %v4646_v42, %v2572_v3  ;;  %v2647_v13 = vadd.f32 %v4675_v17, %v2591_v24  ;;  %v4988_v3 = vld [vmem:[#allocation44_spill] sm:$0xff]  ;;  %v4989_v24 = vld [vmem:[#allocation15_spill] sm:$0xff]  ;;  %v5006_v22 = vld [vmem:[#allocation74_spill] sm:$0xff] }
 0x1d7   : > { %v2671_v51 = vmax.f32 %v2627_v37, 0.0  ;;  %v2648_v20 = vadd.f32 %v4675_v17, %v2592_v21  ;;  %v2507_v37 = vmax.f32 %v4989_v24, %v4988_v3 }
 0x1d8   : > { %v2672_v1 = vmax.f32 %v2628_v19, 0.0  ;;  %v2691_v35 = vmax.f32 %v2647_v13, 0.0  ;;  %v2342_v58 = vpop.f32.mrf.mxu2  ;;  %v4990_v19 = vld [vmem:[#allocation72_spill] sm:$0xff] }
 0x1d9   : > { %v2692_v5 = vmax.f32 %v2648_v20, 0.0  ;;  %v2549_v7 = vmax.f32 %v4975_v46, %v2342_v58  ;;  %v2356_v18 = vpop.f32.mrf.mxu3  ;;  %v2368_v29 = vpop.f32.mrf.mxu0  ;;  %v4993_v58 = vld [vmem:[#allocation16_spill] sm:$0xff] }
 0x1da   : > { %v2709_v36 = vpack.c.bf16 %v2672_v1, %v2671_v51  ;;  %v2550_v6 = vmax.f32 %v4978_v23, %v2356_v18  ;;  %v2529_v61 = vmax.f32 %v4979_v38, %v2368_v29  ;;  %v2382_v25 = vpop.f32.mrf.mxu1  ;;  %v4991_v51 = vld [vmem:[#allocation69_spill] sm:$0xff] }
 0x1db   : > { %v2719_v28 = vpack.c.bf16 %v2692_v5, %v2691_v35  ;;  %v2593_v39 = vmax.f32 %v2505_v50, %v2549_v7  ;;  %v2530_v44 = vmax.f32 %v4982_v27, %v2382_v25  ;;  %v4992_v35 = vld [vmem:[#allocation45_spill] sm:$0xff]  ;;  %v4997_v25 = vld [vmem:[#allocation47_spill] sm:$0xff] }
 0x1dc   : > { %2731 = vst [vmem:[%s4669_s29 + $0x30] sm:$0xff] %v2709_v36  ;;  %v2594_v60 = vmax.f32 %v2506_v8, %v2550_v6  ;;  %v2573_v32 = vmax.f32 %v2485_v48, %v2529_v61  ;;  %v2508_v49 = vmax.f32 %v4993_v58, %v4992_v35  ;;  %v4995_v6 = vld [vmem:[#allocation46_spill] sm:$0xff]  ;;  %v4996_v38 = vld [vmem:[#allocation21_spill] sm:$0xff]  ;;  %v2510_v43 = vmax.f32 %v4998_v12, %v4997_v25 }
 0x1dd   : > { %2741 = vst [vmem:[%s4669_s29 + $0x80] sm:$0xff] %v2719_v28  ;;  %v2649_v30 = vadd.f32 %v4675_v17, %v2593_v39  ;;  %v2574_v0 = vmax.f32 %v2486_v59, %v2530_v44  ;;  %v2509_v61 = vmax.f32 %v4996_v38, %v4995_v6  ;;  %v4999_v28 = vld [vmem:[#allocation75_spill] sm:$0xff]  ;;  %v5010_v35 = vld [vmem:[#allocation26_spill] sm:$0xff] }
 0x1de   : > { %v2650_v11 = vadd.f32 %v4675_v17, %v2594_v60  ;;  %v2629_v52 = vadd.f32 %v4646_v42, %v2573_v32  ;;  %v5000_v60 = vld [vmem:[#allocation48_spill] sm:$0xff]  ;;  %v5001_v32 = vld [vmem:[#allocation19_spill] sm:$0xff]  ;;  %v5018_v25 = vld [vmem:[#allocation78_spill] sm:$0xff] }
 0x1df   : > { %v2693_v31 = vmax.f32 %v2649_v30, 0.0  ;;  %v2630_v62 = vadd.f32 %v4646_v42, %v2574_v0  ;;  %v2489_v30 = vmax.f32 %v5001_v32, %v5000_v60 }
 0x1e0   : > { %v2694_v16 = vmax.f32 %v2650_v11, 0.0  ;;  %v2673_v54 = vmax.f32 %v2629_v52, 0.0  ;;  %v2396_v34 = vpop.f32.mrf.mxu2  ;;  %v5002_v11 = vld [vmem:[#allocation76_spill] sm:$0xff] }
 0x1e1   : > { %v2674_v57 = vmax.f32 %v2630_v62, 0.0  ;;  %v2531_v45 = vmax.f32 %v4987_v47, %v2396_v34  ;;  %v2410_v26 = vpop.f32.mrf.mxu3  ;;  %v2370_v56 = vpop.f32.mrf.mxu0  ;;  %v5005_v34 = vld [vmem:[#allocation20_spill] sm:$0xff] }
 0x1e2   : > { %v2720_v21 = vpack.c.bf16 %v2694_v16, %v2693_v31  ;;  %v2532_v13 = vmax.f32 %v4990_v19, %v2410_v26  ;;  %v2551_v20 = vmax.f32 %v4991_v51, %v2370_v56  ;;  %v2384_v1 = vpop.f32.mrf.mxu1  ;;  %v5003_v31 = vld [vmem:[#allocation73_spill] sm:$0xff] }
 0x1e3   : > { %v2710_v14 = vpack.c.bf16 %v2674_v57, %v2673_v54  ;;  %v2575_v50 = vmax.f32 %v2487_v40, %v2531_v45  ;;  %v2552_v33 = vmax.f32 %v4994_v4, %v2384_v1  ;;  %v5004_v54 = vld [vmem:[#allocation49_spill] sm:$0xff]  ;;  %v5009_v1 = vld [vmem:[#allocation51_spill] sm:$0xff] }
 0x1e4   : > { %2742 = vst [vmem:[%s4669_s29 + $0x88] sm:$0xff] %v2720_v21  ;;  %v2576_v8 = vmax.f32 %v2488_v2, %v2532_v13  ;;  %v2595_v5 = vmax.f32 %v2507_v37, %v2551_v20  ;;  %v2490_v10 = vmax.f32 %v5005_v34, %v5004_v54  ;;  %v5007_v13 = vld [vmem:[#allocation50_spill] sm:$0xff]  ;;  %v5008_v51 = vld [vmem:[#allocation25_spill] sm:$0xff]  ;;  %v2492_v58 = vmax.f32 %v5010_v35, %v5009_v1 }
 0x1e5   : > { %2732 = vst [vmem:[%s4669_s29 + $0x38] sm:$0xff] %v2710_v14  ;;  %v2631_v46 = vadd.f32 %v4646_v42, %v2575_v50  ;;  %v2596_v7 = vmax.f32 %v2508_v49, %v2552_v33  ;;  %v2491_v20 = vmax.f32 %v5008_v51, %v5007_v13  ;;  %v5011_v14 = vld [vmem:[#allocation79_spill] sm:$0xff] }
 0x1e6   : > { %v2632_v18 = vadd.f32 %v4646_v42, %v2576_v8  ;;  %v2651_v29 = vadd.f32 %v4675_v17, %v2595_v5  ;;  %v5012_v8 = vld [vmem:[#allocation52_spill] sm:$0xff]  ;;  %v5013_v5 = vld [vmem:[#allocation23_spill] sm:$0xff] }
 0x1e7   : > { %v2675_v15 = vmax.f32 %v2631_v46, 0.0  ;;  %v2652_v55 = vadd.f32 %v4675_v17, %v2596_v7  ;;  %v2511_v46 = vmax.f32 %v5013_v5, %v5012_v8 }
 0x1e8   : > { %v2676_v48 = vmax.f32 %v2632_v18, 0.0  ;;  %v2695_v36 = vmax.f32 %v2651_v29, 0.0  ;;  %v2398_v23 = vpop.f32.mrf.mxu2  ;;  %v5014_v18 = vld [vmem:[#allocation80_spill] sm:$0xff] }
 0x1e9   : > { %v2696_v59 = vmax.f32 %v2652_v55, 0.0  ;;  %v2553_v39 = vmax.f32 %v4999_v28, %v2398_v23  ;;  %v2412_v27 = vpop.f32.mrf.mxu3  ;;  %v2424_v44 = vpop.f32.mrf.mxu0  ;;  %v5017_v23 = vld [vmem:[#allocation24_spill] sm:$0xff] }
 0x1ea   : > { %v2711_v0 = vpack.c.bf16 %v2676_v48, %v2675_v15  ;;  %v2554_v52 = vmax.f32 %v5002_v11, %v2412_v27  ;;  %v2533_v62 = vmax.f32 %v5003_v31, %v2424_v44  ;;  %v2438_v16 = vpop.f32.mrf.mxu1  ;;  %v5015_v15 = vld [vmem:[#allocation77_spill] sm:$0xff]  ;;  %v5020_v31 = vld [vmem:[#allocation27_spill] sm:$0xff] }
 0x1eb   : > { %v2721_v41 = vpack.c.bf16 %v2696_v59, %v2695_v36  ;;  %v2597_v40 = vmax.f32 %v2509_v61, %v2553_v39  ;;  %v2534_v53 = vmax.f32 %v5006_v22, %v2438_v16  ;;  %v5016_v36 = vld [vmem:[#allocation53_spill] sm:$0xff] }
 0x1ec   : > { %2733 = vst [vmem:[%s4669_s29 + $0x40] sm:$0xff] %v2711_v0  ;;  %v2598_v2 = vmax.f32 %v2510_v43, %v2554_v52  ;;  %v2577_v57 = vmax.f32 %v2489_v30, %v2533_v62  ;;  %v2512_v6 = vmax.f32 %v5017_v23, %v5016_v36  ;;  %v5019_v52 = vld [vmem:[#allocation54_spill] sm:$0xff] }
 0x1ed   : > { %2743 = vst [vmem:[%s4669_s29 + $0x90] sm:$0xff] %v2721_v41  ;;  %v2653_v47 = vadd.f32 %v4675_v17, %v2597_v40  ;;  %v2578_v45 = vmax.f32 %v2490_v10, %v2534_v53  ;;  %v2513_v62 = vmax.f32 %v5020_v31, %v5019_v52  ;;  %v5021_v10 = vld [vmem:[#allocation55_spill] sm:$0xff] }
 0x1ee   : > { %v2654_v26 = vadd.f32 %v4675_v17, %v2598_v2  ;;  %v2633_v56 = vadd.f32 %v4646_v42, %v2577_v57 }
 0x1ef   : > { %v2697_v3 = vmax.f32 %v2653_v47, 0.0  ;;  %v2634_v24 = vadd.f32 %v4646_v42, %v2578_v45 }
 0x1f0   : > { %v2698_v37 = vmax.f32 %v2654_v26, 0.0  ;;  %v2677_v21 = vmax.f32 %v2633_v56, 0.0  ;;  %v2452_v19 = vpop.f32.mrf.mxu2 }
 0x1f1   : > { %v2678_v49 = vmax.f32 %v2634_v24, 0.0  ;;  %v2535_v50 = vmax.f32 %v5011_v14, %v2452_v19  ;;  %v2466_v4 = vpop.f32.mrf.mxu3  ;;  %v2426_v33 = vpop.f32.mrf.mxu0 }
 0x1f2   : > { %v2722_v7 = vpack.c.bf16 %v2698_v37, %v2697_v3  ;;  %v2536_v29 = vmax.f32 %v5014_v18, %v2466_v4  ;;  %v2555_v55 = vmax.f32 %v5015_v15, %v2426_v33  ;;  %v2440_v48 = vpop.f32.mrf.mxu1 }
 0x1f3   : > { %v2712_v38 = vpack.c.bf16 %v2678_v49, %v2677_v21  ;;  %v2579_v61 = vmax.f32 %v2491_v20, %v2535_v50  ;;  %v2556_v12 = vmax.f32 %v5018_v25, %v2440_v48 }
 0x1f4   : > { %2744 = vst [vmem:[%s4669_s29 + $0x98] sm:$0xff] %v2722_v7  ;;  %v2580_v43 = vmax.f32 %v2492_v58, %v2536_v29  ;;  %v2599_v59 = vmax.f32 %v2511_v46, %v2555_v55 }
 0x1f5   : > { %2734 = vst [vmem:[%s4669_s29 + $0x48] sm:$0xff] %v2712_v38  ;;  %v2635_v28 = vadd.f32 %v4646_v42, %v2579_v61  ;;  %v2600_v39 = vmax.f32 %v2512_v6, %v2556_v12 }
 0x1f6   : > { %v2636_v27 = vadd.f32 %v4646_v42, %v2580_v43  ;;  %v2655_v44 = vadd.f32 %v4675_v17, %v2599_v59  ;;  %v5022_v42 = vld [vmem:[#allocation28_spill] sm:$0xff] }
 0x1f7   : > { %v2679_v60 = vmax.f32 %v2635_v28, 0.0  ;;  %v2656_v32 = vadd.f32 %v4675_v17, %v2600_v39  ;;  %v2514_v41 = vmax.f32 %v5022_v42, %v5021_v10 }
 0x1f8   : > { %v2680_v30 = vmax.f32 %v2636_v27, 0.0  ;;  %v2699_v0 = vmax.f32 %v2655_v44, 0.0  ;;  %v2454_v11 = vpop.f32.mrf.mxu2 }
 0x1f9   : > { %v2700_v16 = vmax.f32 %v2656_v32, 0.0  ;;  %v2557_v54 = vmax.f32 %v4651_v9, %v2454_v11  ;;  %v2468_v34 = vpop.f32.mrf.mxu3 }
 0x1fa   : > { %v2713_v40 = vpack.c.bf16 %v2680_v30, %v2679_v60  ;;  %v2558_v22 = vmax.f32 %v4656_v63, %v2468_v34 }
 0x1fb   : > { %v2723_v53 = vpack.c.bf16 %v2700_v16, %v2699_v0  ;;  %v2601_v2 = vmax.f32 %v2513_v62, %v2557_v54 }
 0x1fc   : > { %2735 = vst [vmem:[%s4669_s29 + $0x50] sm:$0xff] %v2713_v40  ;;  %v2602_v57 = vmax.f32 %v2514_v41, %v2558_v22 }
 0x1fd   : > { %2745 = vst [vmem:[%s4669_s29 + $0xa0] sm:$0xff] %v2723_v53  ;;  %v2657_v47 = vadd.f32 %v4675_v17, %v2601_v2 }
 0x1fe   : > { %v2658_v45 = vadd.f32 %v4675_v17, %v2602_v57 }
 0x1ff   : > { %v2701_v26 = vmax.f32 %v2657_v47, 0.0 }
 0x200   : > { %v2702_v56 = vmax.f32 %v2658_v45, 0.0 }
 0x202   : > { %v2724_v3 = vpack.c.bf16 %v2702_v56, %v2701_v26 }
 0x204   : > { %2746 = vst [vmem:[%s4669_s29 + $0xa8] sm:$0xff] %v2724_v3 }
 0x205 PF: > { %s13_s12 = sadd.s32 1, %s3803_s12  }
 0x206   : > { %p10_p4 = scmp.ge.s32.totalorder %s13_s12, 4  }
 0x208   :  { %12 = sbr.rel (!%p10_p4) target bundleno = 1 (0x1), region = 62 }

// kernel: cnn_forward.5
= control target key start
LH: loop header
LB: loop body
LE: loop exit
PB: predicated region body
PF: predicated region fallthrough
CT: control target
= control target key end

     0   :  { %s1521_s12 = smov 0   ;;  %s1852_s0 = inlined_call_operand.vmem [shape: bf16[2,144,1024], index: 0, kind: input, shape index: {}]   ;;  %s1853_s1 = inlined_call_operand.vmem [shape: bf16[32,144], index: 1, kind: input, shape index: {}]   ;;  %s1854_s2 = inlined_call_operand.vmem [shape: f32[32,1], index: 2, kind: input, shape index: {}]   ;;  %s1855_s3 = inlined_call_operand.vmem [shape: bf16[2,32,256], index: 3, kind: output, shape index: {}]  }
   0x1 LB: > { %s1064_s13 = sadd.s32 4294967295, %s1498_s12   ;;  %p1068_p0 = scmp.ge.s32.totalorder %s1498_s12, 1  ;;  %s1498_s12 = sphi %s1521_s12, %s13_s12  }
   0x2   : > { %p137_p1 = scmp.lt.s32.totalorder %s1498_s12, 3 }
   0x4   : > { %p138_p2 = pnand %p1068_p0, %p137_p1 }
   0x5   : > { %p161_p3 = scmp.lt.s32.totalorder (!%p138_p2), %s1064_s13, 1 }
   0x6   : > { %141 = sbr.rel (%p138_p2) target bundleno = 305 (0x131), region = 32 }
   0xb   : > { %s1857_s13 = smov (!%p161_p3, %s1064_s13), 1  ;;  %v1395_v0 = vld [vmem:[%s1853_s1 + $0x4] sm:$0xf]  ;;  %v1076_v1 = vld [vmem:[%s1853_s1 + $0x8] sm:$0xf0]  ;;  %vm626_vm0 = vcmask 130048  }
   0xc   : > { %s1480_s14 = smul.u32 576, %s1857_s13  ;;  %v1552_v15 = vor.u32 %v1395_v0, %v1076_v1  ;;  %v1397_v52 = vld [vmem:[%s1853_s1 + $0x14] sm:$0xf]  ;;  %v1084_v54 = vld [vmem:[%s1853_s1 + $0x18] sm:$0xf0] }
   0xd   : > { %v1595_v62 = vor.u32 %v1397_v52, %v1084_v54 }
   0xe   : > { %s1535_s17 = scalar_lea.vmem %s1852_s0, %s1480_s14 }
   0xf   : > { %v1314_v2 = vld [vmem:[%s1535_s17 + $0x1c0] sm:$0xf]  ;;  %v1455_v7 = vld [vmem:[%s1535_s17 + $0x1c4] sm:$0xf]  ;;  %v1354_v13 = vld [vmem:[%s1535_s17 + $0x208] sm:$0xf] }
  0x10   : > { %v1459_v3 = vld [vmem:[%s1535_s17 + $0x1dc] sm:$0xf0]  ;;  %v1316_v8 = vld [vmem:[%s1535_s17 + $0x1e0] sm:$0xf0]  ;;  %v1468_v16 = vld [vmem:[%s1535_s17 + $0x224] sm:$0xf0] }
  0x11   : > { %v1346_v4 = vld [vmem:[%s1535_s17 + $0x200] sm:$0xf]  ;;  %v1315_v5 = vor.u32 %v1459_v3, %v1314_v2  ;;  %v1319_v10 = vor.u32 %v1455_v7, %v1316_v8  ;;  %v1463_v11 = vld [vmem:[%s1535_s17 + $0x204] sm:$0xf]  ;;  %v1355_v19 = vor.u32 %v1468_v16, %v1354_v13  ;;  %v1322_v23 = vld [vmem:[%s1535_s17 + $0x1c8] sm:$0xf] }
  0x12   : > { %v1467_v6 = vld [vmem:[%s1535_s17 + $0x21c] sm:$0xf0]  ;;  %v1348_v12 = vld [vmem:[%s1535_s17 + $0x220] sm:$0xf0]  ;;  %v1460_v25 = vld [vmem:[%s1535_s17 + $0x1e4] sm:$0xf0] }
  0x13   : > { %v1347_v9 = vor.u32 %v1467_v6, %v1346_v4  ;;  %633 = vmatpush.bf16.msra.mxu0 %v1315_v5  ;;  %v1351_v14 = vor.u32 %v1463_v11, %v1348_v12  ;;  %v1282_v17 = vld [vmem:[%s1535_s17 + $0x180] sm:$0xf]  ;;  %671 = vmatpush.bf16.msra.mxu2 %v1319_v10  ;;  %v1447_v21 = vld [vmem:[%s1535_s17 + $0x184] sm:$0xf]  ;;  %v1323_v28 = vor.u32 %v1460_v25, %v1322_v23  ;;  %v1290_v31 = vld [vmem:[%s1535_s17 + $0x188] sm:$0xf] }
  0x14   : > { %v1451_v18 = vld [vmem:[%s1535_s17 + $0x19c] sm:$0xf0]  ;;  %v1284_v22 = vld [vmem:[%s1535_s17 + $0x1a0] sm:$0xf0]  ;;  %v1452_v33 = vld [vmem:[%s1535_s17 + $0x1a4] sm:$0xf0] }
  0x15   : > { %659 = vmatpush.bf16.msra.mxu1 %v1347_v9  ;;  %v1283_v20 = vor.u32 %v1451_v18, %v1282_v17  ;;  %697 = vmatpush.bf16.msra.mxu3 %v1351_v14  ;;  %v1287_v24 = vor.u32 %v1447_v21, %v1284_v22  ;;  %v1250_v26 = vld [vmem:[%s1535_s17 + $0x140] sm:$0xf]  ;;  %v1439_v29 = vld [vmem:[%s1535_s17 + $0x144] sm:$0xf]  ;;  %v1291_v37 = vor.u32 %v1452_v33, %v1290_v31  ;;  %v1258_v40 = vld [vmem:[%s1535_s17 + $0x148] sm:$0xf] }
  0x16   : > { %v1443_v27 = vld [vmem:[%s1535_s17 + $0x15c] sm:$0xf0]  ;;  %v1252_v30 = vld [vmem:[%s1535_s17 + $0x160] sm:$0xf0]  ;;  %v1444_v41 = vld [vmem:[%s1535_s17 + $0x164] sm:$0xf0] }
  0x17   : > { %634 = vmatpush.bf16.msra.mxu0 %v1283_v20  ;;  %v1251_v32 = vor.u32 %v1443_v27, %v1250_v26  ;;  %672 = vmatpush.bf16.msra.mxu2 %v1287_v24  ;;  %v1255_v34 = vor.u32 %v1439_v29, %v1252_v30  ;;  %v1218_v35 = vld [vmem:[%s1535_s17 + $0x100] sm:$0xf]  ;;  %v1431_v38 = vld [vmem:[%s1535_s17 + $0x104] sm:$0xf]  ;;  %v1259_v46 = vor.u32 %v1444_v41, %v1258_v40  ;;  %v1226_v49 = vld [vmem:[%s1535_s17 + $0x108] sm:$0xf] }
  0x18   : > { %1376 = vmatmul.msk.bf16.vlgmr.msra.gmra.mxu1 %vm626_vm0, %v1552_v15  ;;  %1378 = vmatmul.msk.bf16.vlgmr.msra.gmra.mxu3 %vm626_vm0, %v1552_v15  ;;  %v1435_v36 = vld [vmem:[%s1535_s17 + $0x11c] sm:$0xf0]  ;;  %v1220_v39 = vld [vmem:[%s1535_s17 + $0x120] sm:$0xf0]  ;;  %v1436_v50 = vld [vmem:[%s1535_s17 + $0x124] sm:$0xf0] }
  0x19   : > { %735 = vmatpush.bf16.msrb.mxu3 %v1355_v19  ;;  %709 = vmatpush.bf16.msrb.mxu1 %v1323_v28  ;;  %v1219_v42 = vor.u32 %v1435_v36, %v1218_v35  ;;  %v1223_v43 = vor.u32 %v1431_v38, %v1220_v39  ;;  %v1186_v44 = vld [vmem:[%s1535_s17 + $0xc0] sm:$0xf]  ;;  %v1423_v47 = vld [vmem:[%s1535_s17 + $0xc4] sm:$0xf]  ;;  %v1227_v57 = vor.u32 %v1436_v50, %v1226_v49  ;;  %v1194_v60 = vld [vmem:[%s1535_s17 + $0xc8] sm:$0xf] }
  0x1a   : > { %v1427_v45 = vld [vmem:[%s1535_s17 + $0xdc] sm:$0xf0]  ;;  %v1188_v48 = vld [vmem:[%s1535_s17 + $0xe0] sm:$0xf0]  ;;  %v1428_v61 = vld [vmem:[%s1535_s17 + $0xe4] sm:$0xf0] }
  0x1b   : > { %635 = vmatpush.bf16.msra.mxu0 %v1251_v32  ;;  %673 = vmatpush.bf16.msra.mxu2 %v1255_v34  ;;  %v1187_v51 = vor.u32 %v1427_v45, %v1186_v44  ;;  %v1191_v53 = vor.u32 %v1423_v47, %v1188_v48  ;;  %v1154_v55 = vld [vmem:[%s1535_s17 + $0x80] sm:$0xf]  ;;  %v1415_v58 = vld [vmem:[%s1535_s17 + $0x84] sm:$0xf]  ;;  %v1464_v0 = vld [vmem:[%s1535_s17 + $0x20c] sm:$0xf]  ;;  %v1195_v6 = vor.u32 %v1428_v61, %v1194_v60 }
  0x1c   : > { %v1419_v56 = vld [vmem:[%s1535_s17 + $0x9c] sm:$0xf0]  ;;  %v1156_v59 = vld [vmem:[%s1535_s17 + $0xa0] sm:$0xf0]  ;;  %v1356_v1 = vld [vmem:[%s1535_s17 + $0x228] sm:$0xf0] }
  0x1d   : > { %710 = vmatpush.bf16.msrb.mxu1 %v1291_v37  ;;  %v1155_v63 = vor.u32 %v1419_v56, %v1154_v55  ;;  %v1159_v2 = vor.u32 %v1415_v58, %v1156_v59  ;;  %v1122_v3 = vld [vmem:[%s1535_s17 + $0x40] sm:$0xf]  ;;  %v1359_v5 = vor.u32 %v1464_v0, %v1356_v1  ;;  %v1407_v7 = vld [vmem:[%s1535_s17 + $0x44] sm:$0xf]  ;;  %v1162_v9 = vld [vmem:[%s1535_s17 + $0x88] sm:$0xf] }
  0x1e   : > { %v1411_v4 = vld [vmem:[%s1535_s17 + $0x5c] sm:$0xf0]  ;;  %v1124_v8 = vld [vmem:[%s1535_s17 + $0x60] sm:$0xf0]  ;;  %v1420_v10 = vld [vmem:[%s1535_s17 + $0xa4] sm:$0xf0] }
  0x1f   : > { %636 = vmatpush.bf16.msra.mxu0 %v1219_v42  ;;  %674 = vmatpush.bf16.msra.mxu2 %v1223_v43  ;;  %v1123_v11 = vor.u32 %v1411_v4, %v1122_v3  ;;  %v1127_v12 = vor.u32 %v1407_v7, %v1124_v8  ;;  %v1090_v13 = vld [vmem:[%s1535_s17] sm:$0xf]  ;;  %v1399_v16 = vld [vmem:[%s1535_s17 + $0x4] sm:$0xf]  ;;  %v1163_v17 = vor.u32 %v1420_v10, %v1162_v9  ;;  %v1456_v19 = vld [vmem:[%s1535_s17 + $0x1cc] sm:$0xf] }
  0x20   : > { %1471 = vmatpush.bf16.msra.mxu3 %v1359_v5  ;;  %v1403_v14 = vld [vmem:[%s1535_s17 + $0x1c] sm:$0xf0]  ;;  %v1092_v18 = vld [vmem:[%s1535_s17 + $0x20] sm:$0xf0]  ;;  %v1324_v20 = vld [vmem:[%s1535_s17 + $0x1e8] sm:$0xf0] }
  0x21   : > { %711 = vmatpush.bf16.msrb.mxu1 %v1259_v46  ;;  %v1130_v21 = vld [vmem:[%s1535_s17 + $0x48] sm:$0xf]  ;;  %v1091_v23 = vor.u32 %v1403_v14, %v1090_v13  ;;  %v1074_v24 = vld [vmem:[%s1853_s1] sm:$0xf]  ;;  %v1095_v26 = vor.u32 %v1399_v16, %v1092_v18  ;;  %v1327_v27 = vor.u32 %v1456_v19, %v1324_v20  ;;  %v1448_v29 = vld [vmem:[%s1535_s17 + $0x18c] sm:$0xf] }
  0x22   : > { %v1412_v22 = vld [vmem:[%s1535_s17 + $0x64] sm:$0xf0]  ;;  %v1292_v30 = vld [vmem:[%s1535_s17 + $0x1a8] sm:$0xf0]  ;;  %v1330_v34 = vld [vmem:[%s1535_s17 + $0x1d0] sm:$0xf] }
  0x23   : > { %637 = vmatpush.bf16.msra.mxu0 %v1187_v51  ;;  %675 = vmatpush.bf16.msra.mxu2 %v1191_v53  ;;  %v1396_v25 = vld [vmem:[%s1853_s1 + $0x4] sm:$0xf0]  ;;  %v1131_v28 = vor.u32 %v1412_v22, %v1130_v21  ;;  %v1461_v35 = vld [vmem:[%s1535_s17 + $0x1ec] sm:$0xf0]  ;;  %v1295_v36 = vor.u32 %v1448_v29, %v1292_v30  ;;  %v1440_v39 = vld [vmem:[%s1535_s17 + $0x14c] sm:$0xf] }
  0x24   : > { %v1625_v31 = vor.u32 %v1396_v25, %v1074_v24  ;;  %v1098_v32 = vld [vmem:[%s1535_s17 + $0x8] sm:$0xf]  ;;  %v1331_v38 = vor.u32 %v1461_v35, %v1330_v34  ;;  %v1260_v40 = vld [vmem:[%s1535_s17 + $0x168] sm:$0xf0]  ;;  %v1298_v41 = vld [vmem:[%s1535_s17 + $0x190] sm:$0xf] }
  0x25   : > { %712 = vmatpush.bf16.msrb.mxu1 %v1227_v57  ;;  %v1404_v33 = vld [vmem:[%s1535_s17 + $0x24] sm:$0xf0]  ;;  %v1453_v42 = vld [vmem:[%s1535_s17 + $0x1ac] sm:$0xf0]  ;;  %v1263_v43 = vor.u32 %v1440_v39, %v1260_v40  ;;  %v1432_v45 = vld [vmem:[%s1535_s17 + $0x10c] sm:$0xf] }
  0x26   : > { %v1099_v37 = vor.u32 %v1404_v33, %v1098_v32  ;;  %v1299_v44 = vor.u32 %v1453_v42, %v1298_v41  ;;  %v1228_v46 = vld [vmem:[%s1535_s17 + $0x128] sm:$0xf0]  ;;  %v1266_v47 = vld [vmem:[%s1535_s17 + $0x150] sm:$0xf]  ;;  %v1465_v51 = vld [vmem:[%s1535_s17 + $0x214] sm:$0xf] }
  0x27   : > { %638 = vmatpush.bf16.msra.mxu0 %v1155_v63  ;;  %676 = vmatpush.bf16.msra.mxu2 %v1159_v2  ;;  %v1445_v48 = vld [vmem:[%s1535_s17 + $0x16c] sm:$0xf0]  ;;  %v1231_v52 = vor.u32 %v1432_v45, %v1228_v46  ;;  %v1364_v54 = vld [vmem:[%s1535_s17 + $0x230] sm:$0xf0]  ;;  %v1424_v57 = vld [vmem:[%s1535_s17 + $0xcc] sm:$0xf] }
  0x28   : > { %1377 = vmatmul.msk.bf16.gmra.mxu1 %vm626_vm0, %v1595_v62  ;;  %1379 = vmatmul.msk.bf16.gmra.mxu3 %vm626_vm0, %v1595_v62  ;;  %v1362_v49 = vld [vmem:[%s1535_s17 + $0x210] sm:$0xf]  ;;  %v1267_v55 = vor.u32 %v1445_v48, %v1266_v47  ;;  %v1196_v58 = vld [vmem:[%s1535_s17 + $0xe8] sm:$0xf0]  ;;  %v1367_v59 = vor.u32 %v1465_v51, %v1364_v54  ;;  %v1398_v60 = vld [vmem:[%s1853_s1 + $0x14] sm:$0xf0] }
  0x29   : > { %713 = vmatpush.bf16.msrb.mxu1 %v1195_v6  ;;  %v1469_v50 = vld [vmem:[%s1535_s17 + $0x22c] sm:$0xf0]  ;;  %v1199_v0 = vor.u32 %v1424_v57, %v1196_v58  ;;  %v1416_v3 = vld [vmem:[%s1535_s17 + $0x8c] sm:$0xf]  ;;  %v1457_v20 = vld [vmem:[%s1535_s17 + $0x1d4] sm:$0xf] }
  0x2a   : > { %v1363_v53 = vor.u32 %v1469_v50, %v1362_v49  ;;  %v1082_v56 = vld [vmem:[%s1853_s1 + $0x10] sm:$0xf]  ;;  %v1164_v4 = vld [vmem:[%s1535_s17 + $0xa8] sm:$0xf0]  ;;  %v1332_v21 = vld [vmem:[%s1535_s17 + $0x1f0] sm:$0xf0] }
  0x2b   : > { %639 = vmatpush.bf16.msra.mxu0 %v1123_v11  ;;  %677 = vmatpush.bf16.msra.mxu2 %v1127_v12  ;;  %v1234_v61 = vld [vmem:[%s1535_s17 + $0x110] sm:$0xf]  ;;  %v1658_v1 = vor.u32 %v1398_v60, %v1082_v56  ;;  %v1167_v7 = vor.u32 %v1416_v3, %v1164_v4  ;;  %v1408_v9 = vld [vmem:[%s1535_s17 + $0x4c] sm:$0xf]  ;;  %v1335_v24 = vor.u32 %v1457_v20, %v1332_v21  ;;  %v1338_v29 = vld [vmem:[%s1535_s17 + $0x1d8] sm:$0xf] }
  0x2c   : > { %v1437_v63 = vld [vmem:[%s1535_s17 + $0x12c] sm:$0xf0]  ;;  %v1132_v10 = vld [vmem:[%s1535_s17 + $0x68] sm:$0xf0]  ;;  %v1462_v30 = vld [vmem:[%s1535_s17 + $0x1f4] sm:$0xf0] }
  0x2d   : > { %714 = vmatpush.bf16.msrb.mxu1 %v1163_v17  ;;  %v1235_v2 = vor.u32 %v1437_v63, %v1234_v61  ;;  %v1429_v6 = vld [vmem:[%s1535_s17 + $0xec] sm:$0xf0]  ;;  %v1135_v13 = vor.u32 %v1408_v9, %v1132_v10  ;;  %v1400_v16 = vld [vmem:[%s1535_s17 + $0xc] sm:$0xf]  ;;  %v1466_v32 = vld [vmem:[%s1535_s17 + $0x21c] sm:$0xf] }
  0x2e   : > { %v1170_v11 = vld [vmem:[%s1535_s17 + $0x90] sm:$0xf]  ;;  %v1100_v17 = vld [vmem:[%s1535_s17 + $0x28] sm:$0xf0]  ;;  %v1372_v33 = vld [vmem:[%s1535_s17 + $0x238] sm:$0xf0] }
  0x2f   : > { %640 = vmatpush.bf16.msra.mxu0 %v1091_v23  ;;  %678 = vmatpush.bf16.msra.mxu2 %v1095_v26  ;;  %v1421_v12 = vld [vmem:[%s1535_s17 + $0xac] sm:$0xf0]  ;;  %v1103_v22 = vor.u32 %v1400_v16, %v1100_v17  ;;  %v1375_v39 = vor.u32 %v1466_v32, %v1372_v33  ;;  %v1306_v40 = vld [vmem:[%s1535_s17 + $0x198] sm:$0xf]  ;;  %v1433_v45 = vld [vmem:[%s1535_s17 + $0x114] sm:$0xf] }
  0x30   : > { %v1171_v14 = vor.u32 %v1421_v12, %v1170_v11  ;;  %v1138_v18 = vld [vmem:[%s1535_s17 + $0x50] sm:$0xf]  ;;  %v1454_v41 = vld [vmem:[%s1535_s17 + $0x1b4] sm:$0xf0]  ;;  %v1236_v46 = vld [vmem:[%s1535_s17 + $0x130] sm:$0xf0] }
  0x31   : > { %715 = vmatpush.bf16.msrb.mxu1 %v1131_v28  ;;  %v1413_v19 = vld [vmem:[%s1535_s17 + $0x6c] sm:$0xf0]  ;;  %v1300_v28 = vld [vmem:[%s1535_s17 + $0x1b0] sm:$0xf0]  ;;  %v1370_v42 = vld [vmem:[%s1535_s17 + $0x218] sm:$0xf]  ;;  %v1307_v47 = vor.u32 %v1454_v41, %v1306_v40  ;;  %v1239_v51 = vor.u32 %v1433_v45, %v1236_v46 }
  0x32   : > { %641 = vmatmul.bf16.vlgmr.msra.gmra.mxu0 %v1625_v31  ;;  %679 = vmatmul.bf16.vlgmr.msra.gmra.mxu2 %v1625_v31  ;;  %v1139_v23 = vor.u32 %v1413_v19, %v1138_v18  ;;  %v1106_v25 = vld [vmem:[%s1535_s17 + $0x10] sm:$0xf]  ;;  %v1274_v49 = vld [vmem:[%s1535_s17 + $0x158] sm:$0xf]  ;;  %v1417_v58 = vld [vmem:[%s1535_s17 + $0x94] sm:$0xf] }
  0x33   : > { %747 = vmatpush.bf16.msrb.mxu0 %v1327_v27  ;;  %773 = vmatpush.bf16.msrb.mxu2 %v1359_v5  ;;  %v1202_v5 = vld [vmem:[%s1535_s17 + $0xd0] sm:$0xf]  ;;  %v1449_v27 = vld [vmem:[%s1535_s17 + $0x194] sm:$0xf]  ;;  %v1446_v50 = vld [vmem:[%s1535_s17 + $0x174] sm:$0xf0] }
  0x34   : > { %v1203_v8 = vor.u32 %v1429_v6, %v1202_v5  ;;  %v1405_v26 = vld [vmem:[%s1535_s17 + $0x2c] sm:$0xf0]  ;;  %v1303_v35 = vor.u32 %v1449_v27, %v1300_v28  ;;  %v1275_v54 = vor.u32 %v1446_v50, %v1274_v49  ;;  %v1438_v56 = vld [vmem:[%s1535_s17 + $0x134] sm:$0xf0]  ;;  %v1140_v3 = vld [vmem:[%s1535_s17 + $0x70] sm:$0xf0] }
  0x35   : > { %716 = vmatpush.bf16.msrb.mxu1 %v1099_v37  ;;  %v1107_v34 = vor.u32 %v1405_v26, %v1106_v25  ;;  %v1441_v37 = vld [vmem:[%s1535_s17 + $0x154] sm:$0xf]  ;;  %v1210_v61 = vld [vmem:[%s1535_s17 + $0xd8] sm:$0xf]  ;;  %v1458_v11 = vld [vmem:[%s1535_s17 + $0x1dc] sm:$0xf] }
  0x36   : > { %v1430_v63 = vld [vmem:[%s1535_s17 + $0xf4] sm:$0xf0]  ;;  %v1108_v9 = vld [vmem:[%s1535_s17 + $0x30] sm:$0xf0]  ;;  %v1340_v12 = vld [vmem:[%s1535_s17 + $0x1f8] sm:$0xf0] }
  0x37   : > { %748 = vmatpush.bf16.msrb.mxu0 %v1295_v36  ;;  %849 = vmatpush.bf16.msra.mxu2 %v1367_v59  ;;  %v1339_v36 = vor.u32 %v1462_v30, %v1338_v29  ;;  %v1172_v59 = vld [vmem:[%s1535_s17 + $0xb0] sm:$0xf0]  ;;  %v1211_v4 = vor.u32 %v1430_v63, %v1210_v61  ;;  %v1178_v5 = vld [vmem:[%s1535_s17 + $0x98] sm:$0xf]  ;;  %v1343_v17 = vor.u32 %v1458_v11, %v1340_v12  ;;  %v1450_v19 = vld [vmem:[%s1535_s17 + $0x19c] sm:$0xf] }
  0x38   : > { %717 = vmatmul.bf16.vlgmr.msrb.gmra.mxu1 %v1625_v31  ;;  %1380 = vmatmul.msk.bf16.vlgmr.msrb.gmra.mxu3 %vm626_vm0, %v1552_v15  ;;  %v1422_v6 = vld [vmem:[%s1535_s17 + $0xb4] sm:$0xf0]  ;;  %v1308_v20 = vld [vmem:[%s1535_s17 + $0x1b8] sm:$0xf0]  ;;  %v963_v45 = vld [vmem:[%s1854_s2 + $0x10] sm:$0xff] }
  0x39   : > { %785 = vmatpush.bf16.msra.mxu1 %v1331_v38  ;;  %811 = vmatpush.bf16.msrb.mxu3 %v1363_v53  ;;  %v1268_v38 = vld [vmem:[%s1535_s17 + $0x170] sm:$0xf0]  ;;  %v1179_v10 = vor.u32 %v1422_v6, %v1178_v5  ;;  %v1114_v21 = vld [vmem:[%s1535_s17 + $0x18] sm:$0xf]  ;;  %v1442_v25 = vld [vmem:[%s1535_s17 + $0x15c] sm:$0xf] }
  0x3a   : > { %v1204_v53 = vld [vmem:[%s1535_s17 + $0xf0] sm:$0xf0]  ;;  %v1276_v26 = vld [vmem:[%s1535_s17 + $0x178] sm:$0xf0]  ;;  %v962_v46 = vld [vmem:[%s1854_s2 + $0x8] sm:$0xff] }
  0x3b   : > { %749 = vmatpush.bf16.msrb.mxu0 %v1263_v43  ;;  %v1470_v43 = vld [vmem:[%s1535_s17 + $0x234] sm:$0xf0]  ;;  %v1279_v27 = vor.u32 %v1442_v25, %v1276_v26  ;;  %v1434_v28 = vld [vmem:[%s1535_s17 + $0x11c] sm:$0xf] }
  0x3c   : > { %v1371_v48 = vor.u32 %v1470_v43, %v1370_v42  ;;  %v1244_v29 = vld [vmem:[%s1535_s17 + $0x138] sm:$0xf0] }
  0x3d   : > { %786 = vmatpush.bf16.msra.mxu1 %v1299_v44  ;;  %v1271_v44 = vor.u32 %v1441_v37, %v1268_v38  ;;  %v1247_v30 = vor.u32 %v1434_v28, %v1244_v29  ;;  %v1426_v32 = vld [vmem:[%s1535_s17 + $0xdc] sm:$0xf]  ;;  %v961_v37 = vld [vmem:[%s1854_s2] sm:$0xff] }
  0x3e   : > { %v1212_v33 = vld [vmem:[%s1535_s17 + $0xf8] sm:$0xf0] }
  0x3f   : > { %750 = vmatpush.bf16.msrb.mxu0 %v1231_v52  ;;  %v1425_v52 = vld [vmem:[%s1535_s17 + $0xd4] sm:$0xf]  ;;  %v1410_v40 = vld [vmem:[%s1535_s17 + $0x5c] sm:$0xf] }
  0x40   : > { %v1207_v57 = vor.u32 %v1425_v52, %v1204_v53  ;;  %v1148_v41 = vld [vmem:[%s1535_s17 + $0x78] sm:$0xf0] }
  0x41   : > { %787 = vmatpush.bf16.msra.mxu1 %v1267_v55  ;;  %v1242_v55 = vld [vmem:[%s1535_s17 + $0x118] sm:$0xf]  ;;  %v1151_v42 = vor.u32 %v1410_v40, %v1148_v41  ;;  %v1402_v43 = vld [vmem:[%s1535_s17 + $0x1c] sm:$0xf] }
  0x42   : > { %646 = vmatmul.bf16.gmra.mxu0 %v1658_v1  ;;  %684 = vmatmul.bf16.gmra.mxu2 %v1658_v1  ;;  %v1243_v60 = vor.u32 %v1438_v56, %v1242_v55 }
  0x43   : > { %751 = vmatpush.bf16.msrb.mxu0 %v1199_v0  ;;  %v1175_v0 = vor.u32 %v1417_v58, %v1172_v59 }
  0x45   : > { %788 = vmatpush.bf16.msra.mxu1 %v1235_v2  ;;  %v1409_v2 = vld [vmem:[%s1535_s17 + $0x54] sm:$0xf] }
  0x47   : > { %752 = vmatpush.bf16.msrb.mxu0 %v1167_v7  ;;  %v1143_v7 = vor.u32 %v1409_v2, %v1140_v3 }
  0x48   : > { %722 = vmatmul.bf16.gmra.mxu1 %v1658_v1  ;;  %1381 = vmatmul.msk.bf16.gmra.mxu3 %vm626_vm0, %v1595_v62 }
  0x49   : > { %789 = vmatpush.bf16.msra.mxu1 %v1203_v8  ;;  %v1401_v8 = vld [vmem:[%s1535_s17 + $0x14] sm:$0xf] }
  0x4a   : > { %v1111_v16 = vor.u32 %v1401_v8, %v1108_v9 }
  0x4b   : > { %753 = vmatpush.bf16.msrb.mxu0 %v1135_v13  ;;  %v1146_v13 = vld [vmem:[%s1535_s17 + $0x58] sm:$0xf] }
  0x4d   : > { %790 = vmatpush.bf16.msra.mxu1 %v1171_v14  ;;  %v1414_v14 = vld [vmem:[%s1535_s17 + $0x74] sm:$0xf0] }
  0x4e   : > { %v1147_v18 = vor.u32 %v1414_v14, %v1146_v13 }
  0x4f   : > { %754 = vmatpush.bf16.msrb.mxu0 %v1103_v22  ;;  %v1406_v22 = vld [vmem:[%s1535_s17 + $0x34] sm:$0xf0] }
  0x51   : > { %791 = vmatpush.bf16.msra.mxu1 %v1139_v23  ;;  %v1311_v23 = vor.u32 %v1450_v19, %v1308_v20 }
  0x52   : > { %755 = vmatmul.bf16.vlgmr.msrb.gmra.mxu0 %v1625_v31  ;;  %1382 = vmatmul.msk.bf16.vlgmr.msrb.gmra.mxu2 %vm626_vm0, %v1552_v15 }
  0x53   : > { %823 = vmatpush.bf16.msra.mxu0 %v1335_v24  ;;  %925 = vmatpush.bf16.msrb.mxu2 %v1375_v39  ;;  %v1115_v24 = vor.u32 %v1406_v22, %v1114_v21  ;;  %v1500_v39 = vmov 0  }
  0x54   : > { %1490 = vset.pattern.permute.xlu0 %v1500_v39  ;;  %1491 = vset.pattern.permute.xlu1 %v1500_v39 }
  0x55   : > { %792 = vmatpush.bf16.msra.mxu1 %v1107_v34  ;;  %v1215_v34 = vor.u32 %v1426_v32, %v1212_v33  ;;  %967 = vperm.xlu0 %1490, %v961_v37  }
  0x56   : > { %977 = vperm.xlu1 %1491, %v963_v45  }
  0x57   : > { %824 = vmatpush.bf16.msra.mxu0 %v1303_v35  ;;  %v1418_v35 = vld [vmem:[%s1535_s17 + $0x9c] sm:$0xf] }
  0x58   : > { %1383 = vmatmul.msk.bf16.vlgmr.msra.gmra.mxu3 %vm626_vm0, %v1595_v62  ;;  %793 = vmatmul.bf16.vlgmr.msra.gmra.mxu1 %v1625_v31 }
  0x59   : > { %861 = vmatpush.bf16.msrb.mxu1 %v1339_v36  ;;  %887 = vmatpush.bf16.msra.mxu3 %v1371_v48  ;;  %v1180_v36 = vld [vmem:[%s1535_s17 + $0xb8] sm:$0xf0] }
  0x5a   : > { %v1183_v38 = vor.u32 %v1418_v35, %v1180_v36  ;;  %v964_v48 = vld [vmem:[%s1854_s2 + $0x18] sm:$0xff] }
  0x5b   : > { %825 = vmatpush.bf16.msra.mxu0 %v1271_v44  ;;  %v1116_v44 = vld [vmem:[%s1535_s17 + $0x38] sm:$0xf0]  ;;  %s1394_s17 = sshll.u32 %s1857_s13, 5 }
  0x5c   : > { %s1830_s20 = scalar_lea.vmem %s1855_s3, %s1394_s17 }
  0x5d   : > { %862 = vmatpush.bf16.msrb.mxu1 %v1307_v47  ;;  %v1119_v47 = vor.u32 %v1402_v43, %v1116_v44  ;;  %972 = vperm.xlu0 %1490, %v962_v46  }
  0x5e   : > { %982 = vperm.xlu1 %1491, %v964_v48  }
  0x5f   : > { %826 = vmatpush.bf16.msra.mxu0 %v1239_v51 }
  0x61   : > { %863 = vmatpush.bf16.msrb.mxu1 %v1275_v54 }
  0x62   : > { %760 = vmatmul.bf16.gmra.mxu0 %v1658_v1  ;;  %1386 = vmatmul.msk.bf16.vlgmr.msra.gmra.mxu2 %vm626_vm0, %v1552_v15 }
  0x63   : > { %827 = vmatpush.bf16.msra.mxu0 %v1207_v57 }
  0x65   : > { %864 = vmatpush.bf16.msrb.mxu1 %v1243_v60 }
  0x67   : > { %828 = vmatpush.bf16.msra.mxu0 %v1175_v0 }
  0x68   : > { %798 = vmatmul.bf16.gmra.mxu1 %v1658_v1  ;;  %1384 = vmatmul.msk.bf16.vlgmr.msrb.gmra.mxu3 %vm626_vm0, %v1552_v15 }
  0x69   : > { %865 = vmatpush.bf16.msrb.mxu1 %v1211_v4 }
  0x6b   : > { %829 = vmatpush.bf16.msra.mxu0 %v1143_v7 }
  0x6d   : > { %866 = vmatpush.bf16.msrb.mxu1 %v1179_v10 }
  0x6f   : > { %830 = vmatpush.bf16.msra.mxu0 %v1111_v16 }
  0x71   : > { %867 = vmatpush.bf16.msrb.mxu1 %v1147_v18 }
  0x72   : > { %831 = vmatmul.bf16.vlgmr.msra.gmra.mxu0 %v1625_v31  ;;  %1387 = vmatmul.msk.bf16.gmra.mxu2 %vm626_vm0, %v1595_v62 }
  0x73   : > { %899 = vmatpush.bf16.msrb.mxu0 %v1343_v17 }
  0x75   : > { %868 = vmatpush.bf16.msrb.mxu1 %v1115_v24 }
  0x77   : > { %900 = vmatpush.bf16.msrb.mxu0 %v1311_v23 }
  0x78   : > { %1385 = vmatmul.msk.bf16.gmra.mxu3 %vm626_vm0, %v1595_v62  ;;  %869 = vmatmul.bf16.vlgmr.msrb.gmra.mxu1 %v1625_v31 }
  0x79   : > { %1472 = vmatpush.bf16.msra.mxu1 %v1343_v17 }
  0x7b   : > { %901 = vmatpush.bf16.msrb.mxu0 %v1279_v27 }
  0x7d   : > { %1473 = vmatpush.bf16.msra.mxu1 %v1311_v23 }
  0x7f   : > { %902 = vmatpush.bf16.msrb.mxu0 %v1247_v30 }
  0x81   : > { %1474 = vmatpush.bf16.msra.mxu1 %v1279_v27 }
  0x82   : > { %836 = vmatmul.bf16.gmra.mxu0 %v1658_v1  ;;  %1390 = vmatmul.msk.bf16.vlgmr.msrb.gmra.mxu2 %vm626_vm0, %v1552_v15 }
  0x83   : > { %903 = vmatpush.bf16.msrb.mxu0 %v1215_v34 }
  0x85   : > { %1475 = vmatpush.bf16.msra.mxu1 %v1247_v30 }
  0x87   : > { %904 = vmatpush.bf16.msrb.mxu0 %v1183_v38 }
  0x88   : > { %874 = vmatmul.bf16.gmra.mxu1 %v1658_v1  ;;  %1388 = vmatmul.msk.bf16.vlgmr.msra.gmra.mxu3 %vm626_vm0, %v1552_v15 }
  0x89   : > { %1476 = vmatpush.bf16.msra.mxu1 %v1215_v34 }
  0x8b   : > { %905 = vmatpush.bf16.msrb.mxu0 %v1151_v42 }
  0x8d   : > { %1477 = vmatpush.bf16.msra.mxu1 %v1183_v38 }
  0x8f   : > { %906 = vmatpush.bf16.msrb.mxu0 %v1119_v47 }
  0x91   : > { %1478 = vmatpush.bf16.msra.mxu1 %v1151_v42 }
  0x92   : > { %907 = vmatmul.bf16.vlgmr.msrb.gmra.mxu0 %v1625_v31  ;;  %1391 = vmatmul.msk.bf16.gmra.mxu2 %vm626_vm0, %v1595_v62 }
  0x95   : > { %1479 = vmatpush.bf16.msra.mxu1 %v1119_v47  ;;  %v661_v49 = vpop.f32.mrf.mxu1 }
  0x98   : > { %1389 = vmatmul.msk.bf16.gmra.mxu3 %vm626_vm0, %v1595_v62  ;;  %912 = vmatmul.bf16.vlgmr.msra.gmra.mxu1 %v1658_v1 }
  0x9b   : > { %v699_v15 = vpop.f32.mrf.mxu3 }
  0x9d   : > { %v663_v50 = vpop.f32.mrf.mxu1 }
  0xa3   : > { %v701_v51 = vpop.f32.mrf.mxu3 }
  0xa5   : > { %v666_v52 = vpop.f32.mrf.mxu1 }
  0xab   : > { %v704_v53 = vpop.f32.mrf.mxu3 }
  0xad   : > { %v668_v54 = vpop.f32.mrf.mxu1 }
  0xaf   : > { %v642_v55 = vpop.f32.mrf.mxu0 }
  0xb0   : > { %v1773_v56 = vadd.f32 %v661_v49, %v642_v55 }
  0xb3   : > { %v706_v57 = vpop.f32.mrf.mxu3 }
  0xb5   : > { %v718_v31 = vpop.f32.mrf.mxu1  ;;  %v680_v58 = vpop.f32.mrf.mxu2 }
  0xb6   : > { %v1775_v59 = vadd.f32 %v699_v15, %v680_v58 }
  0xb7   : > { %v644_v60 = vpop.f32.mrf.mxu0 }
  0xb8   : > { %v1777_v61 = vadd.f32 %v663_v50, %v644_v60 }
  0xbb   : > { %v737_v62 = vpop.f32.mrf.mxu3 }
  0xbc   : > { %v1779_v63 = vadd.f32 %v737_v62, %v718_v31 }
  0xbd   : > { %v720_v1 = vpop.f32.mrf.mxu1  ;;  %v682_v2 = vpop.f32.mrf.mxu2 }
  0xbe   : > { %v937_v0 = vmax.f32 %v1773_v56, %v1779_v63  ;;  %v1783_v3 = vadd.f32 %v701_v51, %v682_v2 }
  0xbf   : > { %v647_v4 = vpop.f32.mrf.mxu0 }
  0xc0   : > { %v1785_v5 = vadd.f32 %v666_v52, %v647_v4 }
  0xc3   : > { %v739_v6 = vpop.f32.mrf.mxu3 }
  0xc4   : > { %v1787_v7 = vadd.f32 %v739_v6, %v720_v1 }
  0xc5   : > { %v723_v8 = vpop.f32.mrf.mxu1  ;;  %v685_v10 = vpop.f32.mrf.mxu2 }
  0xc6   : > { %v939_v9 = vmax.f32 %v1777_v61, %v1787_v7  ;;  %v1791_v11 = vadd.f32 %v704_v53, %v685_v10 }
  0xc7   : > { %v649_v12 = vpop.f32.mrf.mxu0 }
  0xc8   : > { %v1793_v13 = vadd.f32 %v668_v54, %v649_v12 }
  0xcb   : > { %v742_v14 = vpop.f32.mrf.mxu3 }
  0xcc   : > { %v1795_v16 = vadd.f32 %v742_v14, %v723_v8  ;;  %v968_v8 = vpop.permute.xlu0 %967 }
  0xcd   : > { %v725_v17 = vpop.f32.mrf.mxu1  ;;  %v687_v19 = vpop.f32.mrf.mxu2 }
  0xce   : > { %v941_v18 = vmax.f32 %v1785_v5, %v1795_v16  ;;  %v1799_v20 = vadd.f32 %v706_v57, %v687_v19 }
  0xcf   : > { %v756_v21 = vpop.f32.mrf.mxu0 }
  0xd3   : > { %v744_v22 = vpop.f32.mrf.mxu3 }
  0xd4   : > { %v1801_v23 = vadd.f32 %v744_v22, %v725_v17 }
  0xd5   : > { %v794_v24 = vpop.f32.mrf.mxu1  ;;  %v775_v26 = vpop.f32.mrf.mxu2 }
  0xd6   : > { %v943_v25 = vmax.f32 %v1793_v13, %v1801_v23  ;;  %v776_v27 = vadd.f32 %v775_v26, %v756_v21 }
  0xd7   : > { %v758_v28 = vpop.f32.mrf.mxu0 }
  0xd8   : > { %v938_v29 = vmax.f32 %v1775_v59, %v776_v27 }
  0xdb   : > { %v780_v30 = vpop.f32.mrf.mxu3 }
  0xdd   : > { %v796_v32 = vpop.f32.mrf.mxu1  ;;  %v777_v33 = vpop.f32.mrf.mxu2 }
  0xde   : > { %v1806_v34 = vadd.f32 %v777_v33, %v758_v28 }
  0xdf   : > { %v761_v35 = vpop.f32.mrf.mxu0 }
  0xe0   : > { %v1808_v36 = vadd.f32 %v780_v30, %v761_v35  ;;  %v940_v37 = vmax.f32 %v1783_v3, %v1806_v34 }
  0xe2   : > { %v942_v38 = vmax.f32 %v1791_v11, %v1808_v36 }
  0xe3   : > { %v782_v39 = vpop.f32.mrf.mxu3 }
  0xe5   : > { %v799_v40 = vpop.f32.mrf.mxu1  ;;  %v851_v41 = vpop.f32.mrf.mxu2 }
  0xe7   : > { %v763_v42 = vpop.f32.mrf.mxu0 }
  0xe8   : > { %v1814_v43 = vadd.f32 %v782_v39, %v763_v42 }
  0xea   : > { %v944_v44 = vmax.f32 %v1799_v20, %v1814_v43 }
  0xeb   : > { %v813_v45 = vpop.f32.mrf.mxu3 }
  0xec   : > { %v814_v62 = vadd.f32 %v813_v45, %v794_v24 }
  0xed   : > { %v1818_v46 = vpop.f32.mrf.mxu1  ;;  %v853_v47 = vpop.f32.mrf.mxu2 }
  0xef   : > { %v832_v48 = vpop.f32.mrf.mxu0 }
  0xf0   : > { %v852_v11 = vadd.f32 %v851_v41, %v832_v48 }
  0xf3   : > { %v815_v49 = vpop.f32.mrf.mxu3 }
  0xf4   : > { %v816_v21 = vadd.f32 %v815_v49, %v796_v32 }
  0xf5   : > { %v870_v15 = vpop.f32.mrf.mxu1  ;;  %v856_v50 = vpop.f32.mrf.mxu2 }
  0xf7   : > { %v834_v51 = vpop.f32.mrf.mxu0 }
  0xf8   : > { %v854_v35 = vadd.f32 %v853_v47, %v834_v51 }
  0xfb   : > { %v818_v52 = vpop.f32.mrf.mxu3 }
  0xfc   : > { %v819_v48 = vadd.f32 %v818_v52, %v799_v40 }
  0xfd   : > { %v872_v53 = vpop.f32.mrf.mxu1  ;;  %v858_v54 = vpop.f32.mrf.mxu2 }
  0xff   : > { %v837_v55 = vpop.f32.mrf.mxu0 }
 0x100   : > { %v857_v36 = vadd.f32 %v856_v50, %v837_v55 }
 0x103   : > { %v820_v57 = vpop.f32.mrf.mxu3 }
 0x105   : > { %v875_v31 = vpop.f32.mrf.mxu1  ;;  %v927_v58 = vpop.f32.mrf.mxu2 }
 0x107   : > { %v839_v59 = vpop.f32.mrf.mxu0 }
 0x10b   : > { %v889_v60 = vpop.f32.mrf.mxu3 }
 0x10c   : > { %v890_v1 = vadd.f32 %v889_v60, %v870_v15  ;;  %v859_v60 = vadd.f32 %v858_v54, %v839_v59 }
 0x10d   : > { %v877_v2 = vpop.f32.mrf.mxu1  ;;  %v929_v6 = vpop.f32.mrf.mxu2 }
 0x10e   : > { %v945_v4 = vmax.f32 %v814_v62, %v890_v1 }
 0x10f   : > { %v908_v10 = vpop.f32.mrf.mxu0 }
 0x110   : > { %v953_v12 = vmax.f32 %v937_v0, %v945_v4  ;;  %v928_v14 = vadd.f32 %v927_v58, %v908_v10 }
 0x112   : > { %v946_v17 = vmax.f32 %v852_v11, %v928_v14  ;;  %v985_v22 = vadd.f32 %v968_v8, %v953_v12 }
 0x113   : > { %v891_v19 = vpop.f32.mrf.mxu3 }
 0x114   : > { %v954_v26 = vmax.f32 %v938_v29, %v946_v17  ;;  %v892_v27 = vadd.f32 %v891_v19, %v872_v53  ;;  %v993_v42 = vmax.f32 %v985_v22, 0.0  ;;  %v973_v29 = vpop.permute.xlu0 %972 }
 0x115   : > { %v913_v24 = vpop.f32.mrf.mxu1  ;;  %v932_v33 = vpop.f32.mrf.mxu2 }
 0x116   : > { %v986_v28 = vadd.f32 %v968_v8, %v954_v26  ;;  %v947_v30 = vmax.f32 %v816_v21, %v892_v27  ;;  %v933_v39 = vadd.f32 %v932_v33, %v913_v24 }
 0x117   : > { %v910_v41 = vpop.f32.mrf.mxu0 }
 0x118   : > { %v994_v45 = vmax.f32 %v986_v28, 0.0  ;;  %v955_v56 = vmax.f32 %v939_v9, %v947_v30  ;;  %v930_v63 = vadd.f32 %v929_v6, %v910_v41  ;;  %v950_v0 = vmax.f32 %v857_v36, %v933_v39  ;;  %v978_v9 = vpop.permute.xlu1 %977 }
 0x11a   : > { %v1001_v32 = vpack.c.bf16 %v994_v45, %v993_v42  ;;  %v948_v47 = vmax.f32 %v854_v35, %v930_v63  ;;  %v958_v15 = vmax.f32 %v942_v38, %v950_v0  ;;  %v987_v50 = vadd.f32 %v973_v29, %v955_v56 }
 0x11b   : > { %v894_v49 = vpop.f32.mrf.mxu3 }
 0x11c   : > { %1005 = vst [vmem:[%s1830_s20] sm:$0xff] %v1001_v32  ;;  %v956_v61 = vmax.f32 %v940_v37, %v948_v47  ;;  %v895_v7 = vadd.f32 %v894_v49, %v875_v31  ;;  %v990_v1 = vadd.f32 %v978_v9, %v958_v15  ;;  %v995_v4 = vmax.f32 %v987_v50, 0.0 }
 0x11d   : > { %v915_v55 = vpop.f32.mrf.mxu1  ;;  %v934_v58 = vpop.f32.mrf.mxu2  ;;  %v821_v37 = vadd.f32 %v820_v57, %v1818_v46 }
 0x11e   : > { %v988_v51 = vadd.f32 %v973_v29, %v956_v61  ;;  %v949_v53 = vmax.f32 %v819_v48, %v895_v7  ;;  %v935_v62 = vadd.f32 %v934_v58, %v915_v55  ;;  %v998_v6 = vmax.f32 %v990_v1, 0.0 }
 0x120   : > { %v996_v40 = vmax.f32 %v988_v51, 0.0  ;;  %v957_v38 = vmax.f32 %v941_v18, %v949_v53  ;;  %v952_v52 = vmax.f32 %v859_v60, %v935_v62  ;;  %v983_v12 = vpop.permute.xlu1 %982 }
 0x122   : > { %v1002_v3 = vpack.c.bf16 %v996_v40, %v995_v4  ;;  %v989_v34 = vadd.f32 %v978_v9, %v957_v38  ;;  %v960_v54 = vmax.f32 %v944_v44, %v952_v52 }
 0x123   : > { %v896_v31 = vpop.f32.mrf.mxu3 }
 0x124   : > { %1006 = vst [vmem:[%s1830_s20 + $0x8] sm:$0xff] %v1002_v3  ;;  %v997_v8 = vmax.f32 %v989_v34, 0.0  ;;  %v897_v59 = vadd.f32 %v896_v31, %v877_v2  ;;  %v992_v5 = vadd.f32 %v983_v12, %v960_v54 }
 0x126   : > { %v1003_v10 = vpack.c.bf16 %v998_v6, %v997_v8  ;;  %v951_v11 = vmax.f32 %v821_v37, %v897_v59  ;;  %v1000_v46 = vmax.f32 %v992_v5, 0.0 }
 0x128   : > { %1007 = vst [vmem:[%s1830_s20 + $0x10] sm:$0xff] %v1003_v10  ;;  %v959_v16 = vmax.f32 %v943_v25, %v951_v11 }
 0x12a   : > { %v991_v18 = vadd.f32 %v983_v12, %v959_v16 }
 0x12c   : > { %v999_v57 = vmax.f32 %v991_v18, 0.0 }
 0x12e   : > { %v1004_v14 = vpack.c.bf16 %v1000_v46, %v999_v57 }
 0x130   : > { %1008 = vst [vmem:[%s1830_s20 + $0x18] sm:$0xff] %v1004_v14 }
 0x131 PF: > { %s13_s12 = sadd.s32 1, %s1498_s12  }
 0x132   : > { %p10_p4 = scmp.ge.s32.totalorder %s13_s12, 4  }
 0x134   :  { %12 = sbr.rel (!%p10_p4) target bundleno = 1 (0x1), region = 62 }

// kernel: cnn_forward.6
= control target key start
LH: loop header
LB: loop body
LE: loop exit
PB: predicated region body
PF: predicated region fallthrough
CT: control target
= control target key end

     0   :  { %s1712_s12 = smov 0   ;;  %s2171_s0 = inlined_call_operand.vmem [shape: bf16[2,288,512], index: 0, kind: input, shape index: {}]   ;;  %s2172_s1 = inlined_call_operand.vmem [shape: bf16[64,288], index: 1, kind: input, shape index: {}]   ;;  %s2173_s2 = inlined_call_operand.vmem [shape: f32[64,1], index: 2, kind: input, shape index: {}]   ;;  %s2174_s3 = inlined_call_operand.vmem [shape: bf16[2,64,128], index: 3, kind: output, shape index: {}]  }
   0x1 LB: > { %s1200_s13 = sadd.s32 4294967295, %s1689_s12   ;;  %p1204_p0 = scmp.ge.s32.totalorder %s1689_s12, 1  ;;  %s1689_s12 = sphi %s1712_s12, %s13_s12  }
   0x2   : > { %p137_p1 = scmp.lt.s32.totalorder %s1689_s12, 3 }
   0x4   : > { %p138_p2 = pnand %p1204_p0, %p137_p1 }
   0x5   : > { %p161_p3 = scmp.lt.s32.totalorder (!%p138_p2), %s1200_s13, 1 }
   0x6   : > { %141 = sbr.rel (%p138_p2) target bundleno = 380 (0x17c), region = 32 }
   0xb   : > { %s2176_s13 = smov (!%p161_p3, %s1200_s13), 1  ;;  %v1218_v12 = vld [vmem:[%s2172_s1 + $0x8] sm:$0xf]  ;;  %v1565_v13 = vld [vmem:[%s2172_s1 + $0x10] sm:$0xf0]  ;;  %vm680_vm0 = vcmask 261120  }
   0xc   : > { %s1670_s14 = smul.u32 576, %s2176_s13  ;;  %v1755_v31 = vor.u32 %v1565_v13, %v1218_v12  ;;  %v1230_v62 = vld [vmem:[%s2172_s1 + $0x20] sm:$0xf]  ;;  %v1568_v63 = vld [vmem:[%s2172_s1 + $0x28] sm:$0xf0]  ;;  %s1562_s6 = sshll.u32 %s2176_s13, 5 }
   0xd   : > { %v1795_v13 = vor.u32 %v1568_v63, %v1230_v62  ;;  %v1571_v62 = vld [vmem:[%s2172_s1 + $0x40] sm:$0xf0]  ;;  %s2136_s9 = scalar_lea.vmem %s2174_s3, %s1562_s6 }
   0xe   : > { %s1726_s17 = scalar_lea.vmem %s2171_s0, %s1670_s14 }
   0xf   : > { %v1370_v0 = vld [vmem:[%s1726_s17 + $0xe0] sm:$0xf]  ;;  %v1605_v1 = vld [vmem:[%s1726_s17 + $0xec] sm:$0xf0]  ;;  %v1603_v9 = vld [vmem:[%s1726_s17 + $0xe4] sm:$0xf] }
  0x10   : > { %v1498_v2 = vld [vmem:[%s1726_s17 + $0x1e0] sm:$0xf]  ;;  %v1371_v3 = vor.u32 %v1605_v1, %v1370_v0  ;;  %v1637_v4 = vld [vmem:[%s1726_s17 + $0x1ec] sm:$0xf0]  ;;  %v1372_v10 = vld [vmem:[%s1726_s17 + $0xf0] sm:$0xf0] }
  0x11   : > { %v1530_v5 = vld [vmem:[%s1726_s17 + $0x220] sm:$0xf]  ;;  %v1645_v6 = vld [vmem:[%s1726_s17 + $0x22c] sm:$0xf0]  ;;  %v1499_v7 = vor.u32 %v1637_v4, %v1498_v2  ;;  %v1375_v14 = vor.u32 %v1603_v9, %v1372_v10  ;;  %v1599_v22 = vld [vmem:[%s1726_s17 + $0xc4] sm:$0xf] }
  0x12   : > { %v1531_v8 = vor.u32 %v1645_v6, %v1530_v5  ;;  %v1354_v11 = vld [vmem:[%s1726_s17 + $0xc0] sm:$0xf]  ;;  %693 = vmatpush.bf16.msra.mxu0 %v1371_v3  ;;  %v1601_v15 = vld [vmem:[%s1726_s17 + $0xcc] sm:$0xf0]  ;;  %v1356_v24 = vld [vmem:[%s1726_s17 + $0xd0] sm:$0xf0] }
  0x13   : > { %v1482_v16 = vld [vmem:[%s1726_s17 + $0x1c0] sm:$0xf]  ;;  %v1633_v17 = vld [vmem:[%s1726_s17 + $0x1cc] sm:$0xf0]  ;;  %722 = vmatpush.bf16.msra.mxu1 %v1499_v7  ;;  %v1355_v18 = vor.u32 %v1601_v15, %v1354_v11  ;;  %780 = vmatpush.bf16.msra.mxu3 %v1375_v14  ;;  %v1359_v27 = vor.u32 %v1599_v22, %v1356_v24  ;;  %v1595_v30 = vld [vmem:[%s1726_s17 + $0xa4] sm:$0xf] }
  0x14   : > { %757 = vmatpush.bf16.msra.mxu2 %v1531_v8  ;;  %v1483_v19 = vor.u32 %v1633_v17, %v1482_v16  ;;  %v1514_v20 = vld [vmem:[%s1726_s17 + $0x200] sm:$0xf]  ;;  %v1641_v21 = vld [vmem:[%s1726_s17 + $0x20c] sm:$0xf0]  ;;  %v1340_v33 = vld [vmem:[%s1726_s17 + $0xb0] sm:$0xf0] }
  0x15   : > { %v1515_v23 = vor.u32 %v1641_v21, %v1514_v20  ;;  %v1338_v25 = vld [vmem:[%s1726_s17 + $0xa0] sm:$0xf]  ;;  %v1597_v26 = vld [vmem:[%s1726_s17 + $0xac] sm:$0xf0]  ;;  %v1343_v37 = vor.u32 %v1595_v30, %v1340_v33  ;;  %v1591_v40 = vld [vmem:[%s1726_s17 + $0x84] sm:$0xf] }
  0x16   : > { %v1466_v28 = vld [vmem:[%s1726_s17 + $0x1a0] sm:$0xf]  ;;  %v1629_v29 = vld [vmem:[%s1726_s17 + $0x1ac] sm:$0xf0]  ;;  %694 = vmatpush.bf16.msra.mxu0 %v1355_v18  ;;  %v1339_v32 = vor.u32 %v1597_v26, %v1338_v25  ;;  %v1324_v41 = vld [vmem:[%s1726_s17 + $0x90] sm:$0xf0] }
  0x17   : > { %723 = vmatpush.bf16.msra.mxu1 %v1483_v19  ;;  %v1467_v34 = vor.u32 %v1629_v29, %v1466_v28  ;;  %v1322_v35 = vld [vmem:[%s1726_s17 + $0x80] sm:$0xf]  ;;  %v1593_v36 = vld [vmem:[%s1726_s17 + $0x8c] sm:$0xf0]  ;;  %781 = vmatpush.bf16.msra.mxu3 %v1359_v27  ;;  %v1327_v46 = vor.u32 %v1591_v40, %v1324_v41  ;;  %v1587_v49 = vld [vmem:[%s1726_s17 + $0x64] sm:$0xf] }
  0x18   : > { %758 = vmatpush.bf16.msra.mxu2 %v1515_v23  ;;  %v1450_v38 = vld [vmem:[%s1726_s17 + $0x180] sm:$0xf]  ;;  %v1625_v39 = vld [vmem:[%s1726_s17 + $0x18c] sm:$0xf0]  ;;  %v1323_v42 = vor.u32 %v1593_v36, %v1322_v35  ;;  %v1308_v50 = vld [vmem:[%s1726_s17 + $0x70] sm:$0xf0] }
  0x19   : > { %v1451_v43 = vor.u32 %v1625_v39, %v1450_v38  ;;  %v1306_v44 = vld [vmem:[%s1726_s17 + $0x60] sm:$0xf]  ;;  %v1589_v45 = vld [vmem:[%s1726_s17 + $0x6c] sm:$0xf0]  ;;  %v1311_v55 = vor.u32 %v1587_v49, %v1308_v50  ;;  %v1583_v58 = vld [vmem:[%s1726_s17 + $0x44] sm:$0xf] }
  0x1a   : > { %695 = vmatpush.bf16.msra.mxu0 %v1339_v32  ;;  %v1434_v47 = vld [vmem:[%s1726_s17 + $0x160] sm:$0xf]  ;;  %v1621_v48 = vld [vmem:[%s1726_s17 + $0x16c] sm:$0xf0]  ;;  %v1307_v51 = vor.u32 %v1589_v45, %v1306_v44  ;;  %v1292_v59 = vld [vmem:[%s1726_s17 + $0x50] sm:$0xf0] }
  0x1b   : > { %1544 = vmatmul.msk.bf16.vlgmr.msra.gmra.mxu2 %vm680_vm0, %v1755_v31  ;;  %724 = vmatpush.bf16.msra.mxu1 %v1467_v34  ;;  %v1435_v52 = vor.u32 %v1621_v48, %v1434_v47  ;;  %v1290_v53 = vld [vmem:[%s1726_s17 + $0x40] sm:$0xf]  ;;  %v1585_v54 = vld [vmem:[%s1726_s17 + $0x4c] sm:$0xf0]  ;;  %v1635_v60 = vld [vmem:[%s1726_s17 + $0x1e4] sm:$0xf]  ;;  %v1295_v6 = vor.u32 %v1583_v58, %v1292_v59 }
  0x1c   : > { %782 = vmatpush.bf16.msra.mxu3 %v1343_v37  ;;  %v1418_v56 = vld [vmem:[%s1726_s17 + $0x140] sm:$0xf]  ;;  %v1617_v57 = vld [vmem:[%s1726_s17 + $0x14c] sm:$0xf0]  ;;  %v1291_v61 = vor.u32 %v1585_v54, %v1290_v53  ;;  %v1500_v0 = vld [vmem:[%s1726_s17 + $0x1f0] sm:$0xf0] }
  0x1d   : > { %v1419_v1 = vor.u32 %v1617_v57, %v1418_v56  ;;  %v1274_v2 = vld [vmem:[%s1726_s17 + $0x20] sm:$0xf]  ;;  %v1581_v3 = vld [vmem:[%s1726_s17 + $0x2c] sm:$0xf0]  ;;  %v1503_v5 = vor.u32 %v1635_v60, %v1500_v0  ;;  %v1579_v8 = vld [vmem:[%s1726_s17 + $0x24] sm:$0xf] }
  0x1e   : > { %696 = vmatpush.bf16.msra.mxu0 %v1323_v42  ;;  %v1402_v4 = vld [vmem:[%s1726_s17 + $0x120] sm:$0xf]  ;;  %v1613_v7 = vld [vmem:[%s1726_s17 + $0x12c] sm:$0xf0]  ;;  %v1276_v9 = vld [vmem:[%s1726_s17 + $0x30] sm:$0xf0]  ;;  %v1275_v14 = vor.u32 %v1581_v3, %v1274_v2 }
  0x1f   : > { %725 = vmatpush.bf16.msra.mxu1 %v1451_v43  ;;  %v1258_v10 = vld [vmem:[%s1726_s17] sm:$0xf]  ;;  %809 = vmatpush.bf16.msrb.mxu2 %v1503_v5  ;;  %v1631_v11 = vld [vmem:[%s1726_s17 + $0x1c4] sm:$0xf]  ;;  %v1484_v12 = vld [vmem:[%s1726_s17 + $0x1d0] sm:$0xf0]  ;;  %v1403_v19 = vor.u32 %v1613_v7, %v1402_v4  ;;  %v1279_v23 = vor.u32 %v1579_v8, %v1276_v9 }
  0x20   : > { %783 = vmatpush.bf16.msra.mxu3 %v1327_v46  ;;  %v1577_v15 = vld [vmem:[%s1726_s17 + $0xc] sm:$0xf0]  ;;  %v1386_v16 = vld [vmem:[%s1726_s17 + $0x100] sm:$0xf]  ;;  %v1487_v18 = vor.u32 %v1631_v11, %v1484_v12  ;;  %v1575_v20 = vld [vmem:[%s1726_s17 + $0x4] sm:$0xf] }
  0x21   : > { %v1609_v17 = vld [vmem:[%s1726_s17 + $0x10c] sm:$0xf0]  ;;  %v1260_v21 = vld [vmem:[%s1726_s17 + $0x10] sm:$0xf0]  ;;  %v1643_v22 = vld [vmem:[%s1726_s17 + $0x224] sm:$0xf]  ;;  %v1259_v33 = vor.u32 %v1577_v15, %v1258_v10 }
  0x22   : > { %697 = vmatpush.bf16.msra.mxu0 %v1307_v51  ;;  %v1210_v24 = vld [vmem:[%s2172_s1] sm:$0xf]  ;;  %v1532_v25 = vld [vmem:[%s1726_s17 + $0x230] sm:$0xf0]  ;;  %v1627_v26 = vld [vmem:[%s1726_s17 + $0x1a4] sm:$0xf]  ;;  %v1387_v37 = vor.u32 %v1609_v17, %v1386_v16  ;;  %v1263_v42 = vor.u32 %v1575_v20, %v1260_v21 }
  0x23   : > { %726 = vmatpush.bf16.msra.mxu1 %v1435_v52  ;;  %v1468_v27 = vld [vmem:[%s1726_s17 + $0x1b0] sm:$0xf0]  ;;  %v1564_v28 = vld [vmem:[%s2172_s1 + $0x8] sm:$0xf0]  ;;  %v1378_v29 = vld [vmem:[%s1726_s17 + $0xe8] sm:$0xf]  ;;  %810 = vmatpush.bf16.msrb.mxu2 %v1487_v18  ;;  %v1535_v39 = vor.u32 %v1643_v22, %v1532_v25 }
  0x24   : > { %784 = vmatpush.bf16.msra.mxu3 %v1311_v55  ;;  %v1606_v30 = vld [vmem:[%s1726_s17 + $0xf4] sm:$0xf0]  ;;  %v1471_v32 = vor.u32 %v1627_v26, %v1468_v27  ;;  %v1563_v34 = vld [vmem:[%s2172_s1 + $0x4] sm:$0xf]  ;;  %v1506_v35 = vld [vmem:[%s1726_s17 + $0x1e8] sm:$0xf]  ;;  %v1826_v44 = vor.u32 %v1564_v28, %v1210_v24 }
  0x25   : > { %v1638_v36 = vld [vmem:[%s1726_s17 + $0x1f4] sm:$0xf0]  ;;  %v1212_v38 = vld [vmem:[%s2172_s1 + $0xc] sm:$0xf0]  ;;  %v1623_v40 = vld [vmem:[%s1726_s17 + $0x184] sm:$0xf]  ;;  %v1379_v43 = vor.u32 %v1606_v30, %v1378_v29 }
  0x26   : > { %698 = vmatpush.bf16.msra.mxu0 %v1291_v61  ;;  %v1452_v41 = vld [vmem:[%s1726_s17 + $0x190] sm:$0xf0]  ;;  %v1507_v45 = vor.u32 %v1638_v36, %v1506_v35  ;;  %v1362_v46 = vld [vmem:[%s1726_s17 + $0xc8] sm:$0xf]  ;;  %v1602_v47 = vld [vmem:[%s1726_s17 + $0xd4] sm:$0xf0]  ;;  %v1830_v48 = vor.u32 %v1563_v34, %v1212_v38 }
  0x27   : > { %727 = vmatpush.bf16.msra.mxu1 %v1419_v1  ;;  %811 = vmatpush.bf16.msrb.mxu2 %v1471_v32  ;;  %v1490_v49 = vld [vmem:[%s1726_s17 + $0x1c8] sm:$0xf]  ;;  %v1634_v50 = vld [vmem:[%s1726_s17 + $0x1d4] sm:$0xf0]  ;;  %v1455_v51 = vor.u32 %v1623_v40, %v1452_v41  ;;  %v1619_v52 = vld [vmem:[%s1726_s17 + $0x164] sm:$0xf]  ;;  %v1363_v54 = vor.u32 %v1602_v47, %v1362_v46 }
  0x28   : > { %785 = vmatpush.bf16.msra.mxu3 %v1295_v6  ;;  %v1436_v53 = vld [vmem:[%s1726_s17 + $0x170] sm:$0xf0]  ;;  %v1491_v55 = vor.u32 %v1634_v50, %v1490_v49  ;;  %v1346_v56 = vld [vmem:[%s1726_s17 + $0xa8] sm:$0xf]  ;;  %v1598_v57 = vld [vmem:[%s1726_s17 + $0xb4] sm:$0xf0] }
  0x29   : > { %v1474_v58 = vld [vmem:[%s1726_s17 + $0x1a8] sm:$0xf]  ;;  %v1630_v59 = vld [vmem:[%s1726_s17 + $0x1b4] sm:$0xf0]  ;;  %v1439_v60 = vor.u32 %v1619_v52, %v1436_v53  ;;  %v1639_v63 = vld [vmem:[%s1726_s17 + $0x204] sm:$0xf]  ;;  %v1347_v0 = vor.u32 %v1598_v57, %v1346_v56 }
  0x2a   : > { %699 = vmatpush.bf16.msra.mxu0 %v1275_v14  ;;  %v1242_v61 = vld [vmem:[%s2172_s1 + $0x38] sm:$0xf]  ;;  %v1615_v1 = vld [vmem:[%s1726_s17 + $0x144] sm:$0xf]  ;;  %v1420_v2 = vld [vmem:[%s1726_s17 + $0x150] sm:$0xf0]  ;;  %v1475_v4 = vor.u32 %v1630_v59, %v1474_v58 }
  0x2b   : > { %1545 = vmatmul.msk.bf16.gmra.mxu2 %vm680_vm0, %v1795_v13  ;;  %728 = vmatpush.bf16.msra.mxu1 %v1403_v19  ;;  %v1516_v3 = vld [vmem:[%s1726_s17 + $0x210] sm:$0xf0]  ;;  %v1330_v5 = vld [vmem:[%s1726_s17 + $0x88] sm:$0xf]  ;;  %v1594_v6 = vld [vmem:[%s1726_s17 + $0x94] sm:$0xf0]  ;;  %v1855_v8 = vor.u32 %v1571_v62, %v1242_v61  ;;  %v1423_v11 = vor.u32 %v1615_v1, %v1420_v2 }
  0x2c   : > { %786 = vmatpush.bf16.msra.mxu3 %v1279_v23  ;;  %812 = vmatpush.bf16.msrb.mxu2 %v1455_v51  ;;  %v1519_v7 = vor.u32 %v1639_v63, %v1516_v3  ;;  %v1458_v9 = vld [vmem:[%s1726_s17 + $0x188] sm:$0xf]  ;;  %v1626_v10 = vld [vmem:[%s1726_s17 + $0x194] sm:$0xf0]  ;;  %v1331_v12 = vor.u32 %v1594_v6, %v1330_v5  ;;  %v1611_v14 = vld [vmem:[%s1726_s17 + $0x124] sm:$0xf] }
  0x2d   : > { %v1404_v15 = vld [vmem:[%s1726_s17 + $0x130] sm:$0xf0]  ;;  %v1222_v16 = vld [vmem:[%s2172_s1 + $0x18] sm:$0xf]  ;;  %v1459_v17 = vor.u32 %v1626_v10, %v1458_v9  ;;  %v1314_v18 = vld [vmem:[%s1726_s17 + $0x68] sm:$0xf] }
  0x2e   : > { %700 = vmatpush.bf16.msra.mxu0 %v1259_v33  ;;  %v1590_v19 = vld [vmem:[%s1726_s17 + $0x74] sm:$0xf0]  ;;  %v1567_v20 = vld [vmem:[%s2172_s1 + $0x20] sm:$0xf0]  ;;  %v1442_v21 = vld [vmem:[%s1726_s17 + $0x168] sm:$0xf]  ;;  %v1407_v25 = vor.u32 %v1611_v14, %v1404_v15 }
  0x2f   : > { %729 = vmatpush.bf16.msra.mxu1 %v1387_v37  ;;  %v1622_v22 = vld [vmem:[%s1726_s17 + $0x174] sm:$0xf0]  ;;  %v1566_v23 = vld [vmem:[%s2172_s1 + $0x1c] sm:$0xf]  ;;  %v1224_v24 = vld [vmem:[%s2172_s1 + $0x24] sm:$0xf0]  ;;  %v1315_v26 = vor.u32 %v1590_v19, %v1314_v18  ;;  %v1881_v29 = vor.u32 %v1567_v20, %v1222_v16 }
  0x30   : > { %787 = vmatpush.bf16.msra.mxu3 %v1263_v42  ;;  %813 = vmatpush.bf16.msrb.mxu2 %v1439_v60  ;;  %v1607_v27 = vld [vmem:[%s1726_s17 + $0x104] sm:$0xf]  ;;  %v1388_v28 = vld [vmem:[%s1726_s17 + $0x110] sm:$0xf0]  ;;  %v1443_v30 = vor.u32 %v1622_v22, %v1442_v21  ;;  %v1298_v32 = vld [vmem:[%s1726_s17 + $0x48] sm:$0xf]  ;;  %v1885_v34 = vor.u32 %v1566_v23, %v1224_v24 }
  0x31   : > { %701 = vmatmul.bf16.vlgmr.msra.gmra.mxu0 %v1826_v44  ;;  %v1586_v33 = vld [vmem:[%s1726_s17 + $0x54] sm:$0xf0]  ;;  %v1426_v35 = vld [vmem:[%s1726_s17 + $0x148] sm:$0xf]  ;;  %v1391_v37 = vor.u32 %v1607_v27, %v1388_v28  ;;  %v1254_v40 = vld [vmem:[%s2172_s1 + $0x50] sm:$0xf] }
  0x32   : > { %844 = vmatpush.bf16.msrb.mxu0 %v1535_v39  ;;  %730 = vmatmul.bf16.vlgmr.msra.gmra.mxu1 %v1830_v48  ;;  %v1618_v36 = vld [vmem:[%s1726_s17 + $0x154] sm:$0xf0]  ;;  %v1299_v38 = vor.u32 %v1586_v33, %v1298_v32  ;;  %v1574_v41 = vld [vmem:[%s2172_s1 + $0x58] sm:$0xf0]  ;;  %v1410_v42 = vld [vmem:[%s1726_s17 + $0x128] sm:$0xf] }
  0x33   : > { %867 = vmatpush.bf16.msrb.mxu1 %v1379_v43  ;;  %788 = vmatmul.bf16.vlgmr.msra.gmra.mxu3 %v1826_v44  ;;  %v1427_v39 = vor.u32 %v1618_v36, %v1426_v35  ;;  %v1614_v43 = vld [vmem:[%s1726_s17 + $0x134] sm:$0xf0]  ;;  %v1902_v50 = vor.u32 %v1574_v41, %v1254_v40  ;;  %v1234_v51 = vld [vmem:[%s2172_s1 + $0x30] sm:$0xf]  ;;  %v1570_v52 = vld [vmem:[%s2172_s1 + $0x38] sm:$0xf0] }
  0x34   : > { %896 = vmatpush.bf16.msrb.mxu3 %v1507_v45  ;;  %814 = vmatpush.bf16.msrb.mxu2 %v1423_v11  ;;  %v1282_v45 = vld [vmem:[%s1726_s17 + $0x28] sm:$0xf]  ;;  %v1582_v46 = vld [vmem:[%s1726_s17 + $0x34] sm:$0xf0]  ;;  %v1411_v47 = vor.u32 %v1614_v43, %v1410_v42  ;;  %v1569_v56 = vld [vmem:[%s2172_s1 + $0x34] sm:$0xf]  ;;  %v1922_v61 = vor.u32 %v1570_v52, %v1234_v51 }
  0x35   : > { %v1283_v49 = vor.u32 %v1582_v46, %v1282_v45  ;;  %v1394_v53 = vld [vmem:[%s1726_s17 + $0x108] sm:$0xf]  ;;  %v1236_v57 = vld [vmem:[%s2172_s1 + $0x3c] sm:$0xf0]  ;;  %v1578_v59 = vld [vmem:[%s1726_s17 + $0x14] sm:$0xf0] }
  0x36   : > { %845 = vmatpush.bf16.msrb.mxu0 %v1519_v7  ;;  %v1924_v62 = vor.u32 %v1569_v56, %v1236_v57  ;;  %v1538_v63 = vld [vmem:[%s1726_s17 + $0x228] sm:$0xf]  ;;  %v1644_v1 = vld [vmem:[%s1726_s17 + $0x22c] sm:$0xf]  ;;  %v1540_v3 = vld [vmem:[%s1726_s17 + $0x238] sm:$0xf0] }
  0x37   : > { %868 = vmatpush.bf16.msrb.mxu1 %v1363_v54  ;;  %v1610_v54 = vld [vmem:[%s1726_s17 + $0x114] sm:$0xf0]  ;;  %v1380_v5 = vld [vmem:[%s1726_s17 + $0xf8] sm:$0xf0]  ;;  %v1543_v6 = vor.u32 %v1644_v1, %v1540_v3  ;;  %v1636_v9 = vld [vmem:[%s1726_s17 + $0x1ec] sm:$0xf] }
  0x38   : > { %897 = vmatpush.bf16.msrb.mxu3 %v1491_v55  ;;  %815 = vmatpush.bf16.msrb.mxu2 %v1407_v25  ;;  %v1266_v55 = vld [vmem:[%s1726_s17 + $0x8] sm:$0xf]  ;;  %v1395_v58 = vor.u32 %v1610_v54, %v1394_v53  ;;  %v1508_v10 = vld [vmem:[%s1726_s17 + $0x1f8] sm:$0xf0]  ;;  %v1573_v14 = vld [vmem:[%s2172_s1 + $0x50] sm:$0xf0] }
  0x39   : > { %v1267_v60 = vor.u32 %v1578_v59, %v1266_v55  ;;  %v1511_v11 = vor.u32 %v1636_v9, %v1508_v10  ;;  %v1600_v15 = vld [vmem:[%s1726_s17 + $0xcc] sm:$0xf]  ;;  %v1364_v16 = vld [vmem:[%s1726_s17 + $0xd8] sm:$0xf0]  ;;  %v1248_v19 = vld [vmem:[%s2172_s1 + $0x54] sm:$0xf0] }
  0x3a   : > { %v1572_v18 = vld [vmem:[%s2172_s1 + $0x4c] sm:$0xf]  ;;  %v1367_v20 = vor.u32 %v1600_v15, %v1364_v16  ;;  %v1492_v21 = vld [vmem:[%s1726_s17 + $0x1d8] sm:$0xf0]  ;;  %v1522_v40 = vld [vmem:[%s1726_s17 + $0x208] sm:$0xf] }
  0x3b   : > { %869 = vmatpush.bf16.msrb.mxu1 %v1347_v0  ;;  %1546 = vmatmul.msk.bf16.gmra.mxu2 %vm680_vm0, %v1855_v8  ;;  %v1646_v0 = vld [vmem:[%s1726_s17 + $0x234] sm:$0xf0]  ;;  %v1956_v24 = vor.u32 %v1572_v18, %v1248_v19  ;;  %v1596_v25 = vld [vmem:[%s1726_s17 + $0xac] sm:$0xf]  ;;  %v1332_v35 = vld [vmem:[%s1726_s17 + $0x98] sm:$0xf0] }
  0x3c   : > { %898 = vmatpush.bf16.msrb.mxu3 %v1475_v4  ;;  %816 = vmatpush.bf16.msrb.mxu2 %v1391_v37  ;;  %v1539_v2 = vor.u32 %v1646_v0, %v1538_v63  ;;  %v1604_v4 = vld [vmem:[%s1726_s17 + $0xec] sm:$0xf]  ;;  %v1642_v41 = vld [vmem:[%s1726_s17 + $0x214] sm:$0xf0]  ;;  %v1524_v45 = vld [vmem:[%s1726_s17 + $0x218] sm:$0xf0] }
  0x3d   : > { %v1383_v7 = vor.u32 %v1604_v4, %v1380_v5  ;;  %v1628_v27 = vld [vmem:[%s1726_s17 + $0x1ac] sm:$0xf]  ;;  %v1523_v43 = vor.u32 %v1642_v41, %v1522_v40  ;;  %v1444_v53 = vld [vmem:[%s1726_s17 + $0x178] sm:$0xf0]  ;;  %v1691_v15 = vmov 0   ;;  %v1065_v16 = vld [vmem:[%s2173_s2] sm:$0xff] }
  0x3e   : > { %v1592_v33 = vld [vmem:[%s1726_s17 + $0x8c] sm:$0xf]  ;;  %v1300_v56 = vld [vmem:[%s1726_s17 + $0x58] sm:$0xf0]  ;;  %1680 = vset.pattern.permute.xlu0 %v1691_v15  ;;  %1681 = vset.pattern.permute.xlu1 %v1691_v15 }
  0x3f   : > { %870 = vmatpush.bf16.msrb.mxu1 %v1331_v12  ;;  %954 = vmatpush.bf16.msra.mxu0 %v1383_v7  ;;  %v1246_v12 = vld [vmem:[%s2172_s1 + $0x48] sm:$0xf]  ;;  %v1624_v36 = vld [vmem:[%s1726_s17 + $0x18c] sm:$0xf]  ;;  %v1335_v37 = vor.u32 %v1592_v33, %v1332_v35  ;;  %v1428_v59 = vld [vmem:[%s1726_s17 + $0x158] sm:$0xf0] }
  0x40   : > { %899 = vmatpush.bf16.msrb.mxu3 %v1459_v17  ;;  %931 = vmatpush.bf16.msra.mxu2 %v1539_v2  ;;  %v1632_v17 = vld [vmem:[%s1726_s17 + $0x1cc] sm:$0xf]  ;;  %v1954_v23 = vor.u32 %v1573_v14, %v1246_v12  ;;  %v1284_v0 = vld [vmem:[%s1726_s17 + $0x38] sm:$0xf0] }
  0x41   : > { %706 = vmatmul.bf16.gmra.mxu0 %v1881_v29  ;;  %v1495_v22 = vor.u32 %v1632_v17, %v1492_v21  ;;  %v1640_v42 = vld [vmem:[%s1726_s17 + $0x20c] sm:$0xf]  ;;  %v1412_v3 = vld [vmem:[%s1726_s17 + $0x138] sm:$0xf0]  ;;  %1075 = vperm.xlu0 %1680, %v1065_v16  }
  0x42   : > { %735 = vmatmul.bf16.gmra.mxu1 %v1885_v34  ;;  %v1588_v46 = vld [vmem:[%s1726_s17 + $0x6c] sm:$0xf]  ;;  %v1396_v10 = vld [vmem:[%s1726_s17 + $0x118] sm:$0xf0]  ;;  %1682 = vset.pattern.permute.xlu2 %v1691_v15 }
  0x43   : > { %871 = vmatpush.bf16.msrb.mxu1 %v1315_v26  ;;  %793 = vmatmul.bf16.gmra.mxu3 %v1881_v29  ;;  %v1348_v26 = vld [vmem:[%s1726_s17 + $0xb8] sm:$0xf0]  ;;  %v1620_v52 = vld [vmem:[%s1726_s17 + $0x16c] sm:$0xf] }
  0x44   : > { %900 = vmatpush.bf16.msrb.mxu3 %v1443_v30  ;;  %955 = vmatpush.bf16.msra.mxu0 %v1367_v20  ;;  %v1351_v28 = vor.u32 %v1596_v25, %v1348_v26  ;;  %v1476_v30 = vld [vmem:[%s1726_s17 + $0x1b8] sm:$0xf0]  ;;  %v1447_v54 = vor.u32 %v1620_v52, %v1444_v53  ;;  %v1584_v55 = vld [vmem:[%s1726_s17 + $0x4c] sm:$0xf] }
  0x45   : > { %v1479_v32 = vor.u32 %v1628_v27, %v1476_v30  ;;  %932 = vmatpush.bf16.msra.mxu2 %v1523_v43  ;;  %v1616_v57 = vld [vmem:[%s1726_s17 + $0x14c] sm:$0xf] }
  0x46   : > { %v1580_v63 = vld [vmem:[%s1726_s17 + $0x2c] sm:$0xf] }
  0x47   : > { %872 = vmatpush.bf16.msrb.mxu1 %v1299_v38  ;;  %v1460_v38 = vld [vmem:[%s1726_s17 + $0x198] sm:$0xf0]  ;;  %v1612_v1 = vld [vmem:[%s1726_s17 + $0x12c] sm:$0xf]  ;;  %v1287_v2 = vor.u32 %v1580_v63, %v1284_v0 }
  0x48   : > { %901 = vmatpush.bf16.msrb.mxu3 %v1427_v39  ;;  %956 = vmatpush.bf16.msra.mxu0 %v1351_v28  ;;  %v1463_v39 = vor.u32 %v1624_v36, %v1460_v38  ;;  %v1415_v4 = vor.u32 %v1612_v1, %v1412_v3  ;;  %v1576_v5 = vld [vmem:[%s1726_s17 + $0xc] sm:$0xf] }
  0x49   : > { %v1608_v7 = vld [vmem:[%s1726_s17 + $0x10c] sm:$0xf] }
  0x4a   : > { %v1066_v21 = vld [vmem:[%s2173_s2 + $0x8] sm:$0xff] }
  0x4b   : > { %873 = vmatpush.bf16.msrb.mxu1 %v1283_v49  ;;  %1547 = vmatmul.msk.bf16.gmra.mxu2 %vm680_vm0, %v1902_v50  ;;  %v1527_v49 = vor.u32 %v1640_v42, %v1524_v45 }
  0x4c   : > { %902 = vmatpush.bf16.msrb.mxu3 %v1411_v47  ;;  %957 = vmatpush.bf16.msra.mxu0 %v1335_v37  ;;  %v1316_v47 = vld [vmem:[%s1726_s17 + $0x78] sm:$0xf0] }
  0x4d   : > { %v1319_v51 = vor.u32 %v1588_v46, %v1316_v47  ;;  %1080 = vperm.xlu0 %1680, %v1066_v21   ;;  %v1068_v37 = vld [vmem:[%s2173_s2 + $0x18] sm:$0xff] }
  0x4f   : > { %874 = vmatpush.bf16.msrb.mxu1 %v1267_v60  ;;  %v1431_v60 = vor.u32 %v1616_v57, %v1428_v59 }
  0x50   : > { %903 = vmatpush.bf16.msrb.mxu3 %v1395_v58  ;;  %958 = vmatpush.bf16.msra.mxu0 %v1319_v51  ;;  %v1303_v58 = vor.u32 %v1584_v55, %v1300_v56 }
  0x51   : > { %711 = vmatmul.bf16.gmra.mxu0 %v1922_v61 }
  0x52   : > { %740 = vmatmul.bf16.gmra.mxu1 %v1924_v62 }
  0x53   : > { %798 = vmatmul.bf16.gmra.mxu3 %v1922_v61  ;;  %983 = vmatpush.bf16.msra.mxu1 %v1511_v11  ;;  %v1399_v11 = vor.u32 %v1608_v7, %v1396_v10 }
  0x54   : > { %1018 = vmatpush.bf16.msra.mxu3 %v1543_v6  ;;  %959 = vmatpush.bf16.msra.mxu0 %v1303_v58  ;;  %v1268_v6 = vld [vmem:[%s1726_s17 + $0x18] sm:$0xf0] }
  0x55   : > { %v1271_v9 = vor.u32 %v1576_v5, %v1268_v6 }
  0x57   : > { %984 = vmatpush.bf16.msra.mxu1 %v1495_v22 }
  0x58   : > { %1019 = vmatpush.bf16.msra.mxu3 %v1527_v49  ;;  %960 = vmatpush.bf16.msra.mxu0 %v1287_v2 }
  0x5b   : > { %817 = vmatmul.bf16.vlgmr.msrb.gmra.mxu2 %v1830_v48  ;;  %985 = vmatpush.bf16.msra.mxu1 %v1479_v32 }
  0x5c   : > { %961 = vmatpush.bf16.msra.mxu0 %v1271_v9 }
  0x5f   : > { %986 = vmatpush.bf16.msra.mxu1 %v1463_v39 }
  0x61   : > { %716 = vmatmul.bf16.gmra.mxu0 %v1954_v23 }
  0x62   : > { %745 = vmatmul.bf16.gmra.mxu1 %v1956_v24 }
  0x63   : > { %803 = vmatmul.bf16.gmra.mxu3 %v1954_v23  ;;  %987 = vmatpush.bf16.msra.mxu1 %v1447_v54 }
  0x67   : > { %988 = vmatpush.bf16.msra.mxu1 %v1431_v60 }
  0x6b   : > { %822 = vmatmul.bf16.gmra.mxu2 %v1885_v34  ;;  %989 = vmatpush.bf16.msra.mxu1 %v1415_v4 }
  0x6f   : > { %990 = vmatpush.bf16.msra.mxu1 %v1399_v11 }
  0x71   : > { %1548 = vmatmul.msk.bf16.vlgmr.msrb.gmra.mxu0 %vm680_vm0, %v1755_v31 }
  0x72   : > { %875 = vmatmul.bf16.vlgmr.msrb.gmra.mxu1 %v1826_v44 }
  0x73   : > { %904 = vmatmul.bf16.vlgmr.msrb.gmra.mxu3 %v1830_v48 }
  0x7b   : > { %827 = vmatmul.bf16.gmra.mxu2 %v1924_v62 }
  0x81   : > { %1549 = vmatmul.msk.bf16.gmra.mxu0 %vm680_vm0, %v1795_v13 }
  0x82   : > { %880 = vmatmul.bf16.gmra.mxu1 %v1881_v29 }
  0x83   : > { %909 = vmatmul.bf16.gmra.mxu3 %v1885_v34 }
  0x8b   : > { %832 = vmatmul.bf16.gmra.mxu2 %v1956_v24 }
  0x91   : > { %1550 = vmatmul.msk.bf16.gmra.mxu0 %vm680_vm0, %v1855_v8 }
  0x92   : > { %885 = vmatmul.bf16.gmra.mxu1 %v1922_v61 }
  0x93   : > { %914 = vmatmul.bf16.gmra.mxu3 %v1924_v62 }
  0x9b   : > { %1552 = vmatmul.msk.bf16.vlgmr.msra.gmra.mxu2 %vm680_vm0, %v1755_v31 }
  0x9e   : > { %v760_v12 = vpop.f32.mrf.mxu2 }
  0xa1   : > { %1551 = vmatmul.msk.bf16.gmra.mxu0 %vm680_vm0, %v1902_v50 }
  0xa2   : > { %890 = vmatmul.bf16.gmra.mxu1 %v1954_v23 }
  0xa3   : > { %919 = vmatmul.bf16.gmra.mxu3 %v1956_v24 }
  0xa6   : > { %v762_v14 = vpop.f32.mrf.mxu2 }
  0xab   : > { %1553 = vmatmul.msk.bf16.gmra.mxu2 %vm680_vm0, %v1795_v13 }
  0xae   : > { %v765_v17 = vpop.f32.mrf.mxu2  ;;  %v702_v18 = vpop.f32.mrf.mxu0 }
  0xaf   : > { %v731_v19 = vpop.f32.mrf.mxu1 }
  0xb0   : > { %v732_v20 = vadd.f32 %v731_v19, %v702_v18 }
  0xb1   : > { %962 = vmatmul.bf16.vlgmr.msra.gmra.mxu0 %v1826_v44  ;;  %v1067_v44 = vld [vmem:[%s2173_s2 + $0x10] sm:$0xff] }
  0xb2   : > { %v2019_v22 = vadd.f32 %v760_v12, %v732_v20  ;;  %991 = vmatmul.bf16.vlgmr.msra.gmra.mxu1 %v1830_v48  ;;  %1085 = vperm.xlu1 %1681, %v1067_v44  }
  0xb3   : > { %1556 = vmatmul.msk.bf16.vlgmr.msra.gmra.mxu3 %vm680_vm0, %v1755_v31 }
  0xb6   : > { %v767_v25 = vpop.f32.mrf.mxu2  ;;  %v789_v26 = vpop.f32.mrf.mxu3 }
  0xb7   : > { %v704_v27 = vpop.f32.mrf.mxu0  ;;  %v733_v28 = vpop.f32.mrf.mxu1 }
  0xb8   : > { %v734_v30 = vadd.f32 %v733_v28, %v704_v27 }
  0xba   : > { %v2027_v32 = vadd.f32 %v762_v14, %v734_v30  ;;  %1090 = vperm.xlu1 %1681, %v1068_v37  }
  0xbb   : > { %1554 = vmatmul.msk.bf16.gmra.mxu2 %vm680_vm0, %v1855_v8 }
  0xbe   : > { %v770_v48 = vpop.f32.mrf.mxu2  ;;  %v2031_v33 = vpop.f32.mrf.mxu3 }
  0xbf   : > { %v707_v35 = vpop.f32.mrf.mxu0  ;;  %v736_v31 = vpop.f32.mrf.mxu1 }
  0xc0   : > { %v737_v36 = vadd.f32 %v736_v31, %v707_v35 }
  0xc1   : > { %967 = vmatmul.bf16.gmra.mxu0 %v1881_v29 }
  0xc2   : > { %v2037_v38 = vadd.f32 %v765_v17, %v737_v36  ;;  %996 = vmatmul.bf16.gmra.mxu1 %v1885_v34  ;;  %v1071_v34 = vld [vmem:[%s2173_s2 + $0x30] sm:$0xff] }
  0xc3   : > { %1557 = vmatmul.msk.bf16.gmra.mxu3 %vm680_vm0, %v1795_v13  ;;  %v1072_v13 = vld [vmem:[%s2173_s2 + $0x38] sm:$0xff]  ;;  %1105 = vperm.xlu0 %1680, %v1071_v34  }
  0xc4   : > { %1110 = vperm.xlu1 %1681, %v1072_v13  }
  0xc6   : > { %v772_v39 = vpop.f32.mrf.mxu2  ;;  %v794_v40 = vpop.f32.mrf.mxu3 }
  0xc7   : > { %v709_v41 = vpop.f32.mrf.mxu0  ;;  %v738_v42 = vpop.f32.mrf.mxu1 }
  0xc8   : > { %v739_v43 = vadd.f32 %v738_v42, %v709_v41 }
  0xca   : > { %v2042_v45 = vadd.f32 %v767_v25, %v739_v43 }
  0xcb   : > { %1555 = vmatmul.msk.bf16.gmra.mxu2 %vm680_vm0, %v1902_v50 }
  0xce   : > { %v775_v29 = vpop.f32.mrf.mxu2  ;;  %v796_v46 = vpop.f32.mrf.mxu3 }
  0xcf   : > { %v712_v47 = vpop.f32.mrf.mxu0  ;;  %v741_v49 = vpop.f32.mrf.mxu1 }
  0xd0   : > { %v742_v51 = vadd.f32 %v741_v49, %v712_v47 }
  0xd1   : > { %972 = vmatmul.bf16.gmra.mxu0 %v1922_v61 }
  0xd2   : > { %v2053_v52 = vadd.f32 %v770_v48, %v742_v51  ;;  %1001 = vmatmul.bf16.gmra.mxu1 %v1924_v62 }
  0xd3   : > { %1558 = vmatmul.msk.bf16.gmra.mxu3 %vm680_vm0, %v1855_v8  ;;  %v1069_v8 = vld [vmem:[%s2173_s2 + $0x20] sm:$0xff] }
  0xd4   : > { %1095 = vperm.xlu2 %1682, %v1069_v8  }
  0xd6   : > { %v777_v53 = vpop.f32.mrf.mxu2  ;;  %v799_v54 = vpop.f32.mrf.mxu3 }
  0xd7   : > { %v714_v61 = vpop.f32.mrf.mxu0  ;;  %v743_v55 = vpop.f32.mrf.mxu1 }
  0xd8   : > { %v744_v56 = vadd.f32 %v743_v55, %v714_v61 }
  0xda   : > { %v2058_v57 = vadd.f32 %v772_v39, %v744_v56 }
  0xde   : > { %v818_v58 = vpop.f32.mrf.mxu2  ;;  %v801_v59 = vpop.f32.mrf.mxu3 }
  0xdf   : > { %v819_v60 = vadd.f32 %v818_v58, %v789_v26  ;;  %v717_v63 = vpop.f32.mrf.mxu0  ;;  %v746_v0 = vpop.f32.mrf.mxu1 }
  0xe0   : > { %v747_v1 = vadd.f32 %v746_v0, %v717_v63 }
  0xe1   : > { %977 = vmatmul.bf16.gmra.mxu0 %v1954_v23  ;;  %v1070_v23 = vld [vmem:[%s2173_s2 + $0x28] sm:$0xff] }
  0xe2   : > { %v2064_v62 = vadd.f32 %v775_v29, %v747_v1  ;;  %1006 = vmatmul.bf16.gmra.mxu1 %v1956_v24  ;;  %1100 = vperm.xlu2 %1682, %v1070_v23  }
  0xe3   : > { %1559 = vmatmul.msk.bf16.gmra.mxu3 %vm680_vm0, %v1902_v50 }
  0xe6   : > { %v820_v2 = vpop.f32.mrf.mxu2  ;;  %v804_v3 = vpop.f32.mrf.mxu3 }
  0xe7   : > { %v719_v4 = vpop.f32.mrf.mxu0  ;;  %v748_v5 = vpop.f32.mrf.mxu1  ;;  %v821_v15 = vadd.f32 %v820_v2, %v2031_v33 }
  0xe8   : > { %v749_v6 = vadd.f32 %v748_v5, %v719_v4 }
  0xea   : > { %v2072_v7 = vadd.f32 %v777_v53, %v749_v6 }
  0xee   : > { %v823_v9 = vpop.f32.mrf.mxu2  ;;  %v806_v10 = vpop.f32.mrf.mxu3 }
  0xef   : > { %v824_v11 = vadd.f32 %v823_v9, %v794_v40  ;;  %v847_v24 = vpop.f32.mrf.mxu0  ;;  %v876_v14 = vpop.f32.mrf.mxu1 }
  0xf0   : > { %v2074_v12 = vadd.f32 %v847_v24, %v819_v60 }
  0xf2   : > { %v1041_v50 = vmax.f32 %v2019_v22, %v2074_v12 }
  0xf6   : > { %v825_v16 = vpop.f32.mrf.mxu2  ;;  %v905_v17 = vpop.f32.mrf.mxu3 }
  0xf7   : > { %v849_v18 = vpop.f32.mrf.mxu0  ;;  %v906_v19 = vadd.f32 %v905_v17, %v876_v14  ;;  %v878_v21 = vpop.f32.mrf.mxu1  ;;  %v826_v35 = vadd.f32 %v825_v16, %v796_v46 }
  0xf8   : > { %v2079_v20 = vadd.f32 %v849_v18, %v821_v15 }
  0xfa   : > { %v1042_v25 = vmax.f32 %v2027_v32, %v2079_v20 }
  0xfe   : > { %v828_v26 = vpop.f32.mrf.mxu2  ;;  %v907_v28 = vpop.f32.mrf.mxu3 }
  0xff   : > { %v829_v27 = vadd.f32 %v828_v26, %v799_v54  ;;  %v852_v30 = vpop.f32.mrf.mxu0  ;;  %v881_v48 = vpop.f32.mrf.mxu1 }
 0x100   : > { %v2083_v44 = vadd.f32 %v852_v30, %v824_v11 }
 0x102   : > { %v1043_v33 = vmax.f32 %v2037_v38, %v2083_v44 }
 0x106   : > { %v830_v31 = vpop.f32.mrf.mxu2  ;;  %v910_v36 = vpop.f32.mrf.mxu3 }
 0x107   : > { %v854_v37 = vpop.f32.mrf.mxu0  ;;  %v2087_v39 = vadd.f32 %v910_v36, %v881_v48  ;;  %v2091_v41 = vpop.f32.mrf.mxu1  ;;  %v831_v34 = vadd.f32 %v830_v31, %v801_v59 }
 0x108   : > { %v2089_v40 = vadd.f32 %v854_v37, %v826_v35  ;;  %v1076_v48 = vpop.permute.xlu0 %1075  ;;  %v908_v37 = vadd.f32 %v907_v28, %v878_v21 }
 0x10a   : > { %v1044_v42 = vmax.f32 %v2042_v45, %v2089_v40 }
 0x10e   : > { %v833_v43 = vpop.f32.mrf.mxu2  ;;  %v2095_v47 = vpop.f32.mrf.mxu3 }
 0x10f   : > { %v834_v29 = vadd.f32 %v833_v43, %v804_v3  ;;  %v857_v49 = vpop.f32.mrf.mxu0  ;;  %v886_v46 = vpop.f32.mrf.mxu1 }
 0x110   : > { %v2097_v51 = vadd.f32 %v857_v49, %v829_v27 }
 0x112   : > { %v1045_v13 = vmax.f32 %v2053_v52, %v2097_v51 }
 0x116   : > { %v915_v53 = vpop.f32.mrf.mxu3  ;;  %v835_v60 = vpop.f32.mrf.mxu2 }
 0x117   : > { %v859_v54 = vpop.f32.mrf.mxu0  ;;  %v2101_v61 = vadd.f32 %v915_v53, %v886_v46  ;;  %v2105_v56 = vpop.f32.mrf.mxu1  ;;  %v836_v2 = vadd.f32 %v835_v60, %v806_v10 }
 0x118   : > { %v2103_v55 = vadd.f32 %v859_v54, %v831_v34  ;;  %v1081_v60 = vpop.permute.xlu0 %1080 }
 0x11a   : > { %v1046_v58 = vmax.f32 %v2058_v57, %v2103_v55 }
 0x11e   : > { %v2109_v63 = vpop.f32.mrf.mxu3  ;;  %v934_v3 = vpop.f32.mrf.mxu2 }
 0x11f   : > { %v862_v0 = vpop.f32.mrf.mxu0  ;;  %v891_v8 = vpop.f32.mrf.mxu1  ;;  %v935_v26 = vadd.f32 %v934_v3, %v906_v19  ;;  %v918_v45 = vadd.f32 %v2109_v63, %v2105_v56 }
 0x120   : > { %v2111_v1 = vadd.f32 %v862_v0, %v834_v29 }
 0x122   : > { %v1047_v59 = vmax.f32 %v2064_v62, %v2111_v1 }
 0x126   : > { %v920_v4 = vpop.f32.mrf.mxu3  ;;  %v936_v15 = vpop.f32.mrf.mxu2 }
 0x127   : > { %v864_v5 = vpop.f32.mrf.mxu0  ;;  %v2115_v6 = vadd.f32 %v920_v4, %v891_v8  ;;  %v2119_v9 = vpop.f32.mrf.mxu1  ;;  %v937_v46 = vadd.f32 %v936_v15, %v908_v37 }
 0x128   : > { %v2117_v23 = vadd.f32 %v864_v5, %v836_v2 }
 0x12a   : > { %v1048_v11 = vmax.f32 %v2072_v7, %v2117_v23 }
 0x12e   : > { %v2123_v24 = vpop.f32.mrf.mxu3  ;;  %v939_v35 = vpop.f32.mrf.mxu2 }
 0x12f   : > { %v963_v14 = vpop.f32.mrf.mxu0  ;;  %v992_v16 = vpop.f32.mrf.mxu1  ;;  %v923_v57 = vadd.f32 %v2123_v24, %v2119_v9 }
 0x130   : > { %v993_v17 = vadd.f32 %v992_v16, %v963_v14  ;;  %v1086_v14 = vpop.permute.xlu1 %1085 }
 0x136   : > { %v1021_v18 = vpop.f32.mrf.mxu3  ;;  %v941_v19 = vpop.f32.mrf.mxu2 }
 0x137   : > { %v965_v10 = vpop.f32.mrf.mxu0  ;;  %v1022_v27 = vadd.f32 %v1021_v18, %v993_v17  ;;  %v994_v30 = vpop.f32.mrf.mxu1 }
 0x138   : > { %v995_v43 = vadd.f32 %v994_v30, %v965_v10 }
 0x139   : > { %v1049_v31 = vmax.f32 %v935_v26, %v1022_v27 }
 0x13b   : > { %v1057_v36 = vmax.f32 %v1041_v50, %v1049_v31  ;;  %v940_v50 = vadd.f32 %v939_v35, %v2087_v39 }
 0x13d   : > { %v1113_v0 = vadd.f32 %v1076_v48, %v1057_v36  ;;  %v1091_v48 = vpop.permute.xlu1 %1090 }
 0x13e   : > { %v1023_v29 = vpop.f32.mrf.mxu3  ;;  %v944_v39 = vpop.f32.mrf.mxu2 }
 0x13f   : > { %v968_v49 = vpop.f32.mrf.mxu0  ;;  %v1024_v34 = vadd.f32 %v1023_v29, %v995_v43  ;;  %v997_v53 = vpop.f32.mrf.mxu1  ;;  %v1121_v21 = vmax.f32 %v1113_v0, 0.0 }
 0x140   : > { %v998_v8 = vadd.f32 %v997_v53, %v968_v49 }
 0x141   : > { %v1050_v54 = vmax.f32 %v937_v46, %v1024_v34  ;;  %v1096_v46 = vpop.permute.xlu2 %1095 }
 0x143   : > { %v1058_v2 = vmax.f32 %v1042_v25, %v1050_v54  ;;  %v913_v25 = vadd.f32 %v2095_v47, %v2091_v41  ;;  %v945_v41 = vadd.f32 %v944_v39, %v2101_v61  ;;  %v1106_v39 = vpop.permute.xlu0 %1105 }
 0x145   : > { %v1114_v3 = vadd.f32 %v1081_v60, %v1058_v2  ;;  %v942_v10 = vadd.f32 %v941_v19, %v913_v25 }
 0x146   : > { %v1026_v22 = vpop.f32.mrf.mxu3  ;;  %v946_v49 = vpop.f32.mrf.mxu2 }
 0x147   : > { %v970_v12 = vpop.f32.mrf.mxu0  ;;  %v1122_v28 = vmax.f32 %v1114_v3, 0.0  ;;  %v1027_v4 = vadd.f32 %v1026_v22, %v998_v8  ;;  %v999_v5 = vpop.f32.mrf.mxu1  ;;  %v947_v60 = vadd.f32 %v946_v49, %v918_v45 }
 0x148   : > { %v1000_v16 = vadd.f32 %v999_v5, %v970_v12 }
 0x149   : > { %v1650_v15 = vpack.c.bf16 %v1122_v28, %v1121_v21  ;;  %v1051_v32 = vmax.f32 %v940_v50, %v1027_v4  ;;  %v1101_v3 = vpop.permute.xlu2 %1100 }
 0x14b   : > { %1651 = vst [vmem:[%s2136_s9] sm:$0xff] %v1650_v15   ;;  %v1059_v20 = vmax.f32 %v1043_v33, %v1051_v32 }
 0x14d   : > { %v1115_v35 = vadd.f32 %v1086_v14, %v1059_v20 }
 0x14e   : > { %v1028_v17 = vpop.f32.mrf.mxu3  ;;  %v949_v2 = vpop.f32.mrf.mxu2 }
 0x14f   : > { %v973_v18 = vpop.f32.mrf.mxu0  ;;  %v1029_v26 = vadd.f32 %v1028_v17, %v1000_v16  ;;  %v1002_v27 = vpop.f32.mrf.mxu1  ;;  %v1123_v47 = vmax.f32 %v1115_v35, 0.0  ;;  %v950_v56 = vadd.f32 %v949_v2, %v2115_v6 }
 0x150   : > { %v1003_v31 = vadd.f32 %v1002_v27, %v973_v18  ;;  %v1111_v18 = vpop.permute.xlu1 %1110 }
 0x151   : > { %v1052_v30 = vmax.f32 %v942_v10, %v1029_v26 }
 0x153   : > { %v1060_v38 = vmax.f32 %v1044_v42, %v1052_v30 }
 0x155   : > { %v1116_v44 = vadd.f32 %v1091_v48, %v1060_v38 }
 0x156   : > { %v1031_v33 = vpop.f32.mrf.mxu3  ;;  %v951_v32 = vpop.f32.mrf.mxu2 }
 0x157   : > { %v975_v36 = vpop.f32.mrf.mxu0  ;;  %v1124_v37 = vmax.f32 %v1116_v44, 0.0  ;;  %v1032_v43 = vadd.f32 %v1031_v33, %v1003_v31  ;;  %v1004_v29 = vpop.f32.mrf.mxu1  ;;  %v952_v6 = vadd.f32 %v951_v32, %v923_v57 }
 0x158   : > { %v1005_v40 = vadd.f32 %v1004_v29, %v975_v36 }
 0x159   : > { %v1655_v34 = vpack.c.bf16 %v1124_v37, %v1123_v47  ;;  %v1053_v53 = vmax.f32 %v945_v41, %v1032_v43 }
 0x15b   : > { %1667 = vst [vmem:[%s2136_s9 + $0x8] sm:$0xff] %v1655_v34   ;;  %v1061_v54 = vmax.f32 %v1045_v13, %v1053_v53 }
 0x15d   : > { %v1117_v22 = vadd.f32 %v1096_v46, %v1061_v54 }
 0x15e   : > { %v1033_v42 = vpop.f32.mrf.mxu3 }
 0x15f   : > { %v1034_v61 = vadd.f32 %v1033_v42, %v1005_v40  ;;  %v978_v19 = vpop.f32.mrf.mxu0  ;;  %v1007_v0 = vpop.f32.mrf.mxu1  ;;  %v1125_v63 = vmax.f32 %v1117_v22, 0.0 }
 0x160   : > { %v1008_v12 = vadd.f32 %v1007_v0, %v978_v19 }
 0x161   : > { %v1054_v8 = vmax.f32 %v947_v60, %v1034_v61 }
 0x163   : > { %v1062_v52 = vmax.f32 %v1046_v58, %v1054_v8 }
 0x165   : > { %v1118_v51 = vadd.f32 %v1101_v3, %v1062_v52 }
 0x166   : > { %v1036_v13 = vpop.f32.mrf.mxu3 }
 0x167   : > { %v1126_v50 = vmax.f32 %v1118_v51, 0.0  ;;  %v1037_v21 = vadd.f32 %v1036_v13, %v1008_v12  ;;  %v980_v5 = vpop.f32.mrf.mxu0  ;;  %v1009_v14 = vpop.f32.mrf.mxu1 }
 0x168   : > { %v1010_v55 = vadd.f32 %v1009_v14, %v980_v5 }
 0x169   : > { %v1660_v28 = vpack.c.bf16 %v1126_v50, %v1125_v63  ;;  %v1055_v4 = vmax.f32 %v950_v56, %v1037_v21 }
 0x16b   : > { %1668 = vst [vmem:[%s2136_s9 + $0x10] sm:$0xff] %v1660_v28   ;;  %v1063_v15 = vmax.f32 %v1047_v59, %v1055_v4 }
 0x16d   : > { %v1119_v16 = vadd.f32 %v1106_v39, %v1063_v15 }
 0x16e   : > { %v1038_v58 = vpop.f32.mrf.mxu3 }
 0x16f   : > { %v1039_v20 = vadd.f32 %v1038_v58, %v1010_v55  ;;  %v1127_v62 = vmax.f32 %v1119_v16, 0.0 }
 0x171   : > { %v1056_v25 = vmax.f32 %v952_v6, %v1039_v20 }
 0x173   : > { %v1064_v17 = vmax.f32 %v1048_v11, %v1056_v25 }
 0x175   : > { %v1120_v10 = vadd.f32 %v1111_v18, %v1064_v17 }
 0x177   : > { %v1128_v1 = vmax.f32 %v1120_v10, 0.0 }
 0x179   : > { %v1665_v59 = vpack.c.bf16 %v1128_v1, %v1127_v62 }
 0x17b   : > { %1669 = vst [vmem:[%s2136_s9 + $0x18] sm:$0xff] %v1665_v59  }
 0x17c PF: > { %s13_s12 = sadd.s32 1, %s1689_s12  }
 0x17d   : > { %p10_p4 = scmp.ge.s32.totalorder %s13_s12, 4  }
 0x17f   :  { %12 = sbr.rel (!%p10_p4) target bundleno = 1 (0x1), region = 62 }

// kernel: cnn_forward.7
= control target key start
LH: loop header
LB: loop body
LE: loop exit
PB: predicated region body
PF: predicated region fallthrough
CT: control target
= control target key end

     0   :  { %s883_s0 = inlined_call_operand.vmem [shape: bf16[2,576], index: 0, kind: input, shape index: {}]   ;;  %s884_s1 = inlined_call_operand.vmem [shape: bf16[576,64], index: 1, kind: input, shape index: {}]   ;;  %s885_s2 = inlined_call_operand.vmem [shape: f32[1,64], index: 2, kind: input, shape index: {}]   ;;  %s886_s3 = inlined_call_operand.vmem [shape: bf16[64,10], index: 3, kind: input, shape index: {}]   ;;  %s887_s4 = inlined_call_operand.vmem [shape: f32[1,10], index: 4, kind: input, shape index: {}]   ;;  %s888_s5 = inlined_call_operand.hbm [shape: f32[2,10], index: 5, kind: output, shape index: {}]  }
   0x1   :  { %v649_v0 = vld [vmem:[%s884_s1 + $0x38] sm:$0xff]  ;;  %v648_v4 = vld [vmem:[%s884_s1 + $0x30] sm:$0xff]  ;;  %v647_v8 = vld [vmem:[%s884_s1 + $0x28] sm:$0xff] }
   0x2   :  { %v665_v1 = vld [vmem:[%s884_s1 + $0xb8] sm:$0xff]  ;;  %329 = vmatpush.bf16.msra.mxu0 %v649_v0  ;;  %v664_v5 = vld [vmem:[%s884_s1 + $0xb0] sm:$0xff]  ;;  %v663_v9 = vld [vmem:[%s884_s1 + $0xa8] sm:$0xff] }
   0x3   :  { %v673_v2 = vld [vmem:[%s884_s1 + $0xf8] sm:$0xff]  ;;  %355 = vmatpush.bf16.msra.mxu2 %v665_v1  ;;  %v672_v6 = vld [vmem:[%s884_s1 + $0xf0] sm:$0xff]  ;;  %v671_v10 = vld [vmem:[%s884_s1 + $0xe8] sm:$0xff] }
   0x4   :  { %v657_v3 = vld [vmem:[%s884_s1 + $0x78] sm:$0xff]  ;;  %368 = vmatpush.bf16.msra.mxu3 %v673_v2  ;;  %v656_v7 = vld [vmem:[%s884_s1 + $0x70] sm:$0xff]  ;;  %v655_v11 = vld [vmem:[%s884_s1 + $0x68] sm:$0xff] }
   0x5   :  { %342 = vmatpush.bf16.msra.mxu1 %v657_v3  ;;  %v646_v12 = vld [vmem:[%s884_s1 + $0x20] sm:$0xff] }
   0x6   :  { %330 = vmatpush.bf16.msra.mxu0 %v648_v4  ;;  %v662_v13 = vld [vmem:[%s884_s1 + $0xa0] sm:$0xff] }
   0x7   :  { %356 = vmatpush.bf16.msra.mxu2 %v664_v5  ;;  %v22_v14 = vld [vmem:[%s883_s0] sm:$0x1f] }
   0x8   :  { %369 = vmatpush.bf16.msra.mxu3 %v672_v6  ;;  %v670_v15 = vld [vmem:[%s884_s1 + $0xe0] sm:$0xff]  ;;  %100 = vst [vmem:[#allocation1] ss:$9 sm:$0xff] %v22_v14 }
   0x9   :  { %343 = vmatpush.bf16.msra.mxu1 %v656_v7  ;;  %v654_v16 = vld [vmem:[%s884_s1 + $0x60] sm:$0xff] }
   0xa   :  { %331 = vmatpush.bf16.msra.mxu0 %v647_v8 }
   0xb   :  { %357 = vmatpush.bf16.msra.mxu2 %v663_v9 }
   0xc   :  { %370 = vmatpush.bf16.msra.mxu3 %v671_v10 }
   0xd   :  { %344 = vmatpush.bf16.msra.mxu1 %v655_v11 }
   0xe   :  { %10 = vsyncpa [#allocation3], 0  ;;  %332 = vmatpush.bf16.msra.mxu0 %v646_v12  ;;  %v645_v17 = vld [vmem:[%s884_s1 + $0x18] sm:$0xff]  ;;  %v644_v21 = vld [vmem:[%s884_s1 + $0x10] sm:$0xff]  ;;  %vm326_vm0 = vcmask 523264   ;;  %vm449_vm1 = vcmask 74752  }
   0xf   :  { %358 = vmatpush.bf16.msra.mxu2 %v662_v13  ;;  %v661_v18 = vld [vmem:[%s884_s1 + $0x98] sm:$0xff]  ;;  %v660_v22 = vld [vmem:[%s884_s1 + $0x90] sm:$0xff]  ;;  %v643_v25 = vld [vmem:[%s884_s1 + $0x8] sm:$0xff]  ;;  %s471_s27 = sshll.u32 %s888_s5, 4  ;;  %s472_s27 = int_to_ptr.hbm [resolvable:$true] %s471_s27 }
  0x10   :  { %371 = vmatpush.bf16.msra.mxu3 %v670_v15  ;;  %v669_v19 = vld [vmem:[%s884_s1 + $0xd8] sm:$0xff]  ;;  %v668_v23 = vld [vmem:[%s884_s1 + $0xd0] sm:$0xff]  ;;  %v659_v26 = vld [vmem:[%s884_s1 + $0x88] sm:$0xff] }
  0x11   :  { %345 = vmatpush.bf16.msra.mxu1 %v654_v16  ;;  %v653_v20 = vld [vmem:[%s884_s1 + $0x58] sm:$0xff]  ;;  %v652_v24 = vld [vmem:[%s884_s1 + $0x50] sm:$0xff]  ;;  %v667_v27 = vld [vmem:[%s884_s1 + $0xc8] sm:$0xff] }
  0x12   :  { %333 = vmatpush.bf16.msra.mxu0 %v645_v17  ;;  %v651_v28 = vld [vmem:[%s884_s1 + $0x48] sm:$0xff]  ;;  %v642_v29 = vld [vmem:[%s884_s1] sm:$0xff]  ;;  %v677_v33 = vld [vmem:[%s884_s1 + $0x118] sm:$0xff] }
  0x13   :  { %359 = vmatpush.bf16.msra.mxu2 %v661_v18  ;;  %v658_v30 = vld [vmem:[%s884_s1 + $0x80] sm:$0xff]  ;;  %v103_v35 = vld [vmem:[#allocation1 + $0x12] sm:$0xff]  ;;  %v102_v37 = vld [vmem:[#allocation1 + $0x9] sm:$0xff] }
  0x14   :  { %372 = vmatpush.bf16.msra.mxu3 %v669_v19  ;;  %v666_v31 = vld [vmem:[%s884_s1 + $0xc0] sm:$0xff]  ;;  %v676_v38 = vld [vmem:[%s884_s1 + $0x110] sm:$0xff]  ;;  %v675_v39 = vld [vmem:[%s884_s1 + $0x108] sm:$0xff] }
  0x15   :  { %346 = vmatpush.bf16.msra.mxu1 %v653_v20  ;;  %v650_v32 = vld [vmem:[%s884_s1 + $0x40] sm:$0xff]  ;;  %v681_v42 = vld [vmem:[%s886_s3 + $0x18] sm:$0xff]  ;;  %v680_v43 = vld [vmem:[%s886_s3 + $0x10] sm:$0xff] }
  0x16   :  { %334 = vmatpush.bf16.msra.mxu0 %v644_v21  ;;  %v101_v34 = vld [vmem:[#allocation1] sm:$0xff]  ;;  %v679_v44 = vld [vmem:[%s886_s3 + $0x8] sm:$0xff] }
  0x17   :  { %360 = vmatpush.bf16.msra.mxu2 %v660_v22  ;;  %v104_v36 = vld [vmem:[#allocation1 + $0x1b] sm:$0xff]  ;;  %v105_v41 = vld [vmem:[#allocation1 + $0x24] sm:$0xff] }
  0x18   :  { %373 = vmatpush.bf16.msra.mxu3 %v668_v23  ;;  %v674_v40 = vld [vmem:[%s884_s1 + $0x100] sm:$0xff] }
  0x19   :  { %347 = vmatpush.bf16.msra.mxu1 %v652_v24  ;;  %v678_v45 = vld [vmem:[%s886_s3] sm:$0xff] }
  0x1a   :  { %335 = vmatpush.bf16.msra.mxu0 %v643_v25  ;;  %v683_v47 = vld [vmem:[%s885_s2] ss:$0 sm:$0xff] }
  0x1b   :  { %361 = vmatpush.bf16.msra.mxu2 %v659_v26  ;;  %v684_v0 = vld [vmem:[%s887_s4] ss:$0 sm:$0xff]  ;;  %s715_s4 = smov [#allocation2]  }
  0x1c   :  { %374 = vmatpush.bf16.msra.mxu3 %v667_v27  ;;  %s469_s24 = sshll.u32 %s715_s4, 4  ;;  %s470_s24 = int_to_ptr.vmem [resolvable:$true] %s469_s24 }
  0x1d   :  { %348 = vmatpush.bf16.msra.mxu1 %v651_v28 }
  0x1e   :  { %336 = vmatpush.bf16.msra.mxu0 %v642_v29 }
  0x1f   :  { %362 = vmatpush.bf16.msra.mxu2 %v658_v30 }
  0x20   :  { %375 = vmatpush.bf16.msra.mxu3 %v666_v31 }
  0x21   :  { %349 = vmatpush.bf16.msra.mxu1 %v650_v32  ;;  %337 = vmatmul.bf16.vlgmr.msra.gmra.mxu0 %v101_v34 }
  0x22   :  { %385 = vmatpush.bf16.msrb.mxu0 %v677_v33  ;;  %363 = vmatmul.bf16.vlgmr.msra.gmra.mxu2 %v103_v35 }
  0x23   :  { %376 = vmatmul.bf16.vlgmr.msra.gmra.mxu3 %v104_v36 }
  0x24   :  { %350 = vmatmul.bf16.vlgmr.msra.gmra.mxu1 %v102_v37 }
  0x25   :  { %439 = vmatpush.bf16.msrb.mxu1 %v681_v42 }
  0x26   :  { %386 = vmatpush.bf16.msrb.mxu0 %v676_v38 }
  0x29   :  { %440 = vmatpush.bf16.msrb.mxu1 %v680_v43 }
  0x2a   :  { %387 = vmatpush.bf16.msrb.mxu0 %v675_v39 }
  0x2d   :  { %441 = vmatpush.bf16.msrb.mxu1 %v679_v44 }
  0x2e   :  { %388 = vmatpush.bf16.msrb.mxu0 %v674_v40 }
  0x31   :  { %624 = vmatmul.msk.bf16.vlgmr.msrb.gmra.mxu0 %vm326_vm0, %v105_v41  ;;  %442 = vmatpush.bf16.msrb.mxu1 %v678_v45 }
  0x9e   :  { %v338_v46 = vpop.f32.mrf.mxu0 }
  0x9f   :  { %v339_v49 = vadd.f32 %v683_v47, %v338_v46 }
  0xa1   :  { %v351_v48 = vpop.f32.mrf.mxu1 }
  0xa2   :  { %v352_v53 = vadd.f32 %v351_v48, %v339_v49 }
  0xa5   :  { %v364_v50 = vpop.f32.mrf.mxu2 }
  0xa6   :  { %v377_v51 = vpop.f32.mrf.mxu3  ;;  %v340_v52 = vpop.f32.mrf.mxu0  ;;  %v365_v55 = vadd.f32 %v364_v50, %v352_v53 }
  0xa8   :  { %v378_v57 = vadd.f32 %v377_v51, %v365_v55 }
  0xa9   :  { %v353_v54 = vpop.f32.mrf.mxu1 }
  0xad   :  { %v366_v56 = vpop.f32.mrf.mxu2 }
  0xae   :  { %v379_v58 = vpop.f32.mrf.mxu3  ;;  %v390_v59 = vpop.f32.mrf.mxu0 }
  0xaf   :  { %v391_v60 = vadd.f32 %v390_v59, %v378_v57 }
  0xb1   :  { %v394_v61 = vmax.f32 %v391_v60, 0.0 }
  0xb3   :  { %v395_v62 = vpack.c.bf16 %v394_v61, %v394_v61 }
  0xb5   :  { %641 = vmatmul.msk.bf16.vlgmr.msrb.gmra.mxu1 %vm326_vm0, %v395_v62 }
  0xb6   :  { %v392_v63 = vpop.f32.mrf.mxu0 }
 0x132   :  { %v444_v1 = vpop.f32.mrf.mxu1 }
 0x133   :  { %v445_v2 = vadd.f32 %v684_v0, %v444_v1 }
 0x135   :  { %v448_v3 = vmax.f32 %v445_v2, 0.0 }
 0x137   :  { %v450_v4 = vsel %vm449_vm1, %v448_v3, -inf }
 0x138   :  { %451 = vmax.xlane.f32.xlu0 %v450_v4 }
 0x13a   :  { %v446_v5 = vpop.f32.mrf.mxu1 }
 0x1ab   :  { %v452_v6 = vpop.xlane.xlu0 %451 }
 0x1ac   :  { %v453_v7 = vsub.f32 %v448_v3, %v452_v6 }
 0x1ae   :  { %v454_v8 = vmul.f32 1.442695, %v453_v7 }
 0x1b0   :  { %685 = vpow2.f32 %v454_v8 }
 0x1b6   :  { %v686_v9 = vpop.eup %685 }
 0x1b7   :  { %v456_v10 = vsel %vm449_vm1, %v686_v9, 0.0 }
 0x1b8   :  { %457 = vadd.xlane.f32.xlu0 %v456_v10 }
 0x22b   :  { %v458_v11 = vpop.xlane.xlu0 %457 }
 0x22c   :  { %687 = vlog2.f32 %v458_v11 }
 0x232   :  { %v688_v12 = vpop.eup %687 }
 0x233   :  { %v460_v13 = vmul.f32 0.6931472, %v688_v12 }
 0x235   :  { %v461_v14 = vadd.f32 %v460_v13, %v452_v6 }
 0x237   :  { %v462_v15 = vsub.f32 %v448_v3, %v461_v14 }
 0x239   :  { %463 = vst.msk [vmem:[#allocation2] sm:$0x3] %vm449_vm1, %v462_v15 }
 0x23a   :  { %474 = dma.vmem_to_hbm [thread:$0]  %s470_s24, 32, %s472_s27, [#allocation3]  }
 0x23b   :  { %713 = dma.done.wait [#allocation3], 32  }
 0x23c   :  { %714 = vsyncadd [#allocation3], 4294967264 }
 0x23d   :  { %479 = vsyncpa [#allocation3], 1 }

</bundles_post_ra>
